<compile_context>
chip_gen: v7x
topology: tpu7x:2x2x1
jax: 0.10.0
libtpu: 0.0.40
codegen_flags: <defaults>
</compile_context>

<pallas_src>
import functools

import jax
import jax.numpy as jnp
from jax.experimental import pallas as pl
from jax.experimental.pallas import tpu as pltpu

_LANE = 128
_EPS = 1e-5


def _pad_to(n, m):
    return ((n + m - 1) // m) * m


# ------------------------------ Pallas kernels ------------------------------ #

def _conv3x3x3_kernel(xm_ref, x0_ref, xp_ref, w_ref, scale_ref, shift_ref,
                      y_ref, s_ref, sq_ref, *, fuse_bn_relu):
    """One (n, d) grid step: 3x3x3 / stride-1 / pad-1 conv of a full HxW plane.

    Patches are built in-register from three depth slabs (d-1, d, d+1); each slab
    is zero-padded in H/W inside the kernel, so no im2col / padded copy touches
    HBM.  Optionally fuses the previous layer's BatchNorm-apply + ReLU onto the
    input slabs (used by conv2).  Raw conv output is stored bf16; per-channel f32
    sum / sum-of-squares partials are emitted per grid step (reduced in XLA).
    """
    H, W, C = x0_ref.shape
    cout_p = y_ref.shape[-1]
    d = pl.program_id(1)
    num_d = pl.num_programs(1)

    def prep(slab, valid):
        v = slab
        if fuse_bn_relu:
            v = jnp.maximum(v.astype(jnp.float32) * scale_ref[...] + shift_ref[...], 0.0)
        if valid is not None:                  # zero out-of-range depth contribution
            v = v * valid.astype(v.dtype)
        v = v.astype(jnp.bfloat16)
        zr = jnp.zeros((1, W, C), jnp.bfloat16)
        v = jnp.concatenate([zr, v, zr], axis=0)       # pad H -> H+2
        zc = jnp.zeros((H + 2, 1, C), jnp.bfloat16)
        return jnp.concatenate([zc, v, zc], axis=1)    # pad W -> W+2

    slabs = (prep(xm_ref[...], d > 0),
             prep(x0_ref[...], None),
             prep(xp_ref[...], d < num_d - 1))

    acc = jnp.zeros((H * W, cout_p), jnp.float32)
    for kd in range(3):
        sp = slabs[kd]
        cols = [sp[kh:kh + H, kw:kw + W, :] for kh in range(3) for kw in range(3)]
        a = jnp.concatenate(cols, axis=-1).reshape(H * W, 9 * C)   # bf16 patches
        acc = acc + jnp.dot(a, w_ref[kd], preferred_element_type=jnp.float32)

    y_ref[...] = acc.astype(jnp.bfloat16).reshape(H, W, cout_p)
    s_ref[...] = jnp.sum(acc, axis=0, keepdims=True)
    sq_ref[...] = jnp.sum(acc * acc, axis=0, keepdims=True)


def _bn_relu_kernel(y_ref, scale_ref, shift_ref, o_ref):
    """Lane-dense fused BatchNorm-apply + ReLU (only needed after the final conv)."""
    y = y_ref[...].astype(jnp.float32)
    o_ref[...] = jnp.maximum(y * scale_ref[...] + shift_ref[...], 0.0)


# ------------------------------ layer wrappers ------------------------------ #

def _conv_layer(x, w, scale_in, shift_in, *, cout_pad, fuse_bn_relu):
    """Raw Conv3d(k=3,s=1,p=1, no bias) over NDHWC bf16 input.

    Returns (y_raw bf16 (N,D,H,W,cout_pad), per-channel f32 sum, f32 sum-of-sq).
    If fuse_bn_relu, relu(x*scale_in + shift_in) is applied to the input on the fly.
    """
    N, D, H, W, C = x.shape
    Cout, Cin_w = w.shape[0], w.shape[1]

    # Weights as (kd, 9*C, cout_pad) with K order (kh, kw, ci); zero-pad ci -> C and
    # co -> cout_pad so padded lanes contribute exactly zero.
    wt = jnp.transpose(w, (2, 3, 4, 1, 0))                         # (3,3,3,Cin,Cout)
    wt = jnp.pad(wt, ((0, 0), (0, 0), (0, 0),
                      (0, C - Cin_w), (0, cout_pad - Cout)))
    wmat = wt.reshape(3, 9 * C, cout_pad).astype(jnp.bfloat16)
    # TODO(synk): for very large Cin*Cout the whole (3, 9*C, cout_pad) weight block
    # should be tiled over K / Cout (extra 'arbitrary' grid axes + VMEM acc scratch)
    # to stay inside v7x's 64 MiB VMEM; unnecessary at these channel counts.

    if scale_in is None:
        scale_in = jnp.zeros((1, C), jnp.float32)
        shift_in = jnp.zeros((1, C), jnp.float32)

    def xspec(index_map):
        return pl.BlockSpec((None, None, H, W, C), index_map)

    y, ps, pq = pl.pallas_call(
        functools.partial(_conv3x3x3_kernel, fuse_bn_relu=fuse_bn_relu),
        out_shape=(
            jax.ShapeDtypeStruct((N, D, H, W, cout_pad), jnp.bfloat16),
            jax.ShapeDtypeStruct((N, D, 1, cout_pad), jnp.float32),
            jax.ShapeDtypeStruct((N, D, 1, cout_pad), jnp.float32),
        ),
        grid_spec=pltpu.PrefetchScalarGridSpec(
            num_scalar_prefetch=0,
            grid=(N, D),
            in_specs=[
                xspec(lambda n, d: (n, jnp.maximum(d - 1, 0), 0, 0, 0)),      # d-1
                xspec(lambda n, d: (n, d, 0, 0, 0)),                          # d
                xspec(lambda n, d: (n, jnp.minimum(d + 1, D - 1), 0, 0, 0)),  # d+1
                pl.BlockSpec((3, 9 * C, cout_pad), lambda n, d: (0, 0, 0)),
                pl.BlockSpec((1, C), lambda n, d: (0, 0)),
                pl.BlockSpec((1, C), lambda n, d: (0, 0)),
            ],
            out_specs=(
                pl.BlockSpec((None, None, H, W, cout_pad), lambda n, d: (n, d, 0, 0, 0)),
                pl.BlockSpec((None, None, 1, cout_pad), lambda n, d: (n, d, 0, 0)),
                pl.BlockSpec((None, None, 1, cout_pad), lambda n, d: (n, d, 0, 0)),
            ),
        ),
        compiler_params=pltpu.CompilerParams(
            dimension_semantics=("parallel", "parallel"),
            vmem_limit_bytes=48 * 1024 * 1024,
        ),
    )(x, x, x, wmat, scale_in, shift_in)

    return y, jnp.sum(ps, axis=(0, 1, 2)), jnp.sum(pq, axis=(0, 1, 2))


def _bn_scale_shift(csum, csq, gamma, beta, m, cpad, eps=_EPS):
    """Training-mode BN: batch mean / biased variance folded into scale & shift."""
    mean = csum / m
    var = jnp.maximum(csq / m - mean * mean, 0.0)
    # TODO(synk): E[y^2]-mean^2 can cancel for large-magnitude activations; switch to
    # an offset / Welford-style accumulation if that regime matters.
    g = jnp.pad(gamma, (0, cpad - gamma.shape[0]))
    b = jnp.pad(beta, (0, cpad - beta.shape[0]))
    scale = g / jnp.sqrt(var + eps)
    shift = b - mean * scale
    return scale.reshape(1, cpad), shift.reshape(1, cpad)


def _bn_relu_apply(y2d, scale, shift, *, tm=1024):
    """Standalone BN-apply + ReLU over a lane-dense (M, Cpad) bf16 tensor."""
    M, C = y2d.shape
    tm = min(tm, _pad_to(M, 8))
    mp = _pad_to(M, tm)
    if mp != M:
        y2d = jnp.pad(y2d, ((0, mp - M), (0, 0)))
    out = pl.pallas_call(
        _bn_relu_kernel,
        out_shape=jax.ShapeDtypeStruct((mp, C), jnp.float32),
        grid_spec=pltpu.PrefetchScalarGridSpec(
            num_scalar_prefetch=0,
            grid=(mp // tm,),
            in_specs=[
                pl.BlockSpec((tm, C), lambda i: (i, 0)),
                pl.BlockSpec((1, C), lambda i: (0, 0)),
                pl.BlockSpec((1, C), lambda i: (0, 0)),
            ],
            out_specs=pl.BlockSpec((tm, C), lambda i: (i, 0)),
        ),
        compiler_params=pltpu.CompilerParams(
            dimension_semantics=("parallel",)),
    )(y2d, scale, shift)
    return out[:M]


# ----------------------------- DoubleConv module ----------------------------- #

def init_double_conv_params(key, in_channels, out_channels):
    mid = out_channels // 2 if in_channels < out_channels else in_channels // 2
    k1, k2, k3, k4, k5, k6, k7, k8 = jax.random.split(key, 8)
    return {
        "w1": 0.1 * jax.random.normal(k1, (mid, in_channels, 3, 3, 3), jnp.float32),
        "b1": 0.05 * jax.random.normal(k2, (mid,), jnp.float32),
        "g1": 1.0 + 0.1 * jax.random.normal(k3, (mid,), jnp.float32),
        "be1": 0.05 * jax.random.normal(k4, (mid,), jnp.float32),
        "w2": 0.1 * jax.random.normal(k5, (out_channels, mid, 3, 3, 3), jnp.float32),
        "b2": 0.05 * jax.random.normal(k6, (out_channels,), jnp.float32),
        "g2": 1.0 + 0.1 * jax.random.normal(k7, (out_channels,), jnp.float32),
        "be2": 0.05 * jax.random.normal(k8, (out_channels,), jnp.float32),
    }


@jax.jit
def double_conv_forward(x_ncdhw, params):
    """Conv3d(3,1,1)+BN+ReLU twice, training-mode BN batch stats (eps=1e-5).

    Conv biases b1/b2 are intentionally NOT added in-kernel: with training-mode
    BatchNorm the bias cancels exactly (mean absorbs it, variance is unchanged),
    so the output is identical and we drop the per-element add + its DMA stream.
    """
    # TODO(synk): BatchNorm running_mean/running_var momentum updates (training
    # buffer side effect) are not produced; only the forward output is reproduced.
    N, _, D, H, W = x_ncdhw.shape
    Cmid = params["w1"].shape[0]
    Cout = params["w2"].shape[0]
    cp1 = _pad_to(Cmid, _LANE)
    cp2 = _pad_to(Cout, _LANE)
    M = N * D * H * W

    # NCDHW -> channels-last NDHWC, bf16 for the MXU (f32 accumulation in-kernel).
    x = jnp.transpose(x_ncdhw, (0, 2, 3, 4, 1)).astype(jnp.bfloat16)

    # conv1: raw conv + f32 BN statistics in one pass.
    y1, s1, q1 = _conv_layer(x, params["w1"], None, None,
                             cout_pad=cp1, fuse_bn_relu=False)
    scale1, shift1 = _bn_scale_shift(s1, q1, params["g1"], params["be1"], M, cp1)

    # conv2: BN1-apply + ReLU fused into the input path (no standalone pass over y1).
    y2, s2, q2 = _conv_layer(y1, params["w2"], scale1, shift1,
                             cout_pad=cp2, fuse_bn_relu=True)
    scale2, shift2 = _bn_scale_shift(s2, q2, params["g2"], params["be2"], M, cp2)

    out = _bn_relu_apply(y2.reshape(M, cp2), scale2, shift2)
    out = out[:, :Cout].reshape(N, D, H, W, Cout)
    return jnp.transpose(out, (0, 4, 1, 2, 3))          # NDHWC -> NCDHW


# ----------------------------- pure-JAX reference ---------------------------- #

def _ref_conv_bn_relu(x_ndhwc, w, b, gamma, beta, eps=_EPS):
    kern = jnp.transpose(w, (2, 3, 4, 1, 0))            # DHWIO
    y = jax.lax.conv_general_dilated(
        x_ndhwc, kern, window_strides=(1, 1, 1), padding="SAME",
        dimension_numbers=("NDHWC", "DHWIO", "NDHWC")) + b
    mean = jnp.mean(y, axis=(0, 1, 2, 3))
    var = jnp.var(y, axis=(0, 1, 2, 3))
    return jnp.maximum((y - mean) / jnp.sqrt(var + eps) * gamma + beta, 0.0)


def double_conv_ref(x_ncdhw, params):
    x = jnp.transpose(x_ncdhw, (0, 2, 3, 4, 1))
    h = _ref_conv_bn_relu(x, params["w1"], params["b1"], params["g1"], params["be1"])
    o = _ref_conv_bn_relu(h, params["w2"], params["b2"], params["g2"], params["be2"])
    return jnp.transpose(o, (0, 4, 1, 2, 3))


# ---------------------------------- main ------------------------------------- #

if __name__ == "__main__":
    key = jax.random.PRNGKey(0)
    kx, kp = jax.random.split(key)

    N, Cin, Cout, D, H, W = 2, 4, 8, 8, 8, 8            # in=4 < out=8 -> mid = 4
    x = jax.random.normal(kx, (N, Cin, D, H, W), jnp.float32)   # NCDHW like PyTorch
    params = init_double_conv_params(kp, Cin, Cout)

    out = jax.block_until_ready(double_conv_forward(x, params))
    assert out.shape == (N, Cout, D, H, W), out.shape

    ref = double_conv_ref(x, params)
    max_err = float(jnp.max(jnp.abs(out - ref)))
    # bf16 MXU inputs + bf16 intermediate -> bf16-grade tolerance vs the f32 reference.
    assert jnp.allclose(out, ref, atol=5e-2, rtol=5e-2), f"max_err={max_err}"

    print("KERNEL_OK")
</pallas_src>

<mosaic_0001>
module attributes {stable_mosaic.version = 11 : i64} {
  func.func @_conv3x3x3_kernel(%arg0: i32, %arg1: i32, %arg2: memref<1x1x8x8x4xbf16, #tpu.memory_space<vmem>>, %arg3: memref<1x1x8x8x4xbf16, #tpu.memory_space<vmem>>, %arg4: memref<1x1x8x8x4xbf16, #tpu.memory_space<vmem>>, %arg5: memref<3x36x128xbf16, #tpu.memory_space<vmem>>, %arg6: memref<1x4xf32, #tpu.memory_space<vmem>>, %arg7: memref<1x4xf32, #tpu.memory_space<vmem>>, %arg8: memref<1x1x8x8x128xbf16, #tpu.memory_space<vmem>>, %arg9: memref<1x1x1x128xf32, #tpu.memory_space<vmem>>, %arg10: memref<1x1x1x128xf32, #tpu.memory_space<vmem>>) attributes {dimension_semantics = [#tpu.dimension_semantics<parallel>, #tpu.dimension_semantics<parallel>], iteration_bounds = array<i64: 2, 8>, scalar_prefetch = 0 : i64, scratch_operands = 0 : i64, tpu.core_type = #tpu.core_type<tc>, window_params = [{transform_indices = @transform_0, window_bounds = array<i64: 1, 1, 8, 8, 4>}, {transform_indices = @transform_1, window_bounds = array<i64: 1, 1, 8, 8, 4>}, {transform_indices = @transform_2, window_bounds = array<i64: 1, 1, 8, 8, 4>}, {pipeline_mode = #tpu.pipeline_mode<synchronous>, transform_indices = @transform_3, window_bounds = array<i64: 3, 36, 128>}, {pipeline_mode = #tpu.pipeline_mode<synchronous>, transform_indices = @transform_4, window_bounds = array<i64: 1, 4>}, {pipeline_mode = #tpu.pipeline_mode<synchronous>, transform_indices = @transform_5, window_bounds = array<i64: 1, 4>}, {transform_indices = @transform_6, window_bounds = array<i64: 1, 1, 8, 8, 128>}, {transform_indices = @transform_7, window_bounds = array<i64: 1, 1, 1, 128>}, {transform_indices = @transform_8, window_bounds = array<i64: 1, 1, 1, 128>}]} {
    %c0 = arith.constant 0 : index
    %c0_0 = arith.constant 0 : index
    %c0_1 = arith.constant 0 : index
    %c0_2 = arith.constant 0 : index
    %c0_3 = arith.constant 0 : index
    %0 = vector.load %arg2[%c0, %c0_0, %c0_1, %c0_2, %c0_3] : memref<1x1x8x8x4xbf16, #tpu.memory_space<vmem>>, vector<1x1x8x8x4xbf16>
    %1 = vector.shape_cast %0 : vector<1x1x8x8x4xbf16> to vector<8x8x4xbf16>
    %c0_i32 = arith.constant 0 : i32
    %2 = arith.cmpi sgt, %arg1, %c0_i32 : i32
    %3 = arith.extui %2 : i1 to i32
    %4 = arith.sitofp %3 : i32 to f32
    %5 = arith.truncf %4 : f32 to bf16
    %6 = vector.broadcast %5 : bf16 to vector<8x8x4xbf16>
    %7 = arith.mulf %1, %6 : vector<8x8x4xbf16>
    %cst = arith.constant 0.000000e+00 : bf16
    %8 = vector.broadcast %cst : bf16 to vector<1x8x4xbf16>
    %9 = tpu.concatenate %8, %7, %8 in 0 : vector<1x8x4xbf16>, vector<8x8x4xbf16>, vector<1x8x4xbf16> -> vector<10x8x4xbf16>
    %cst_4 = arith.constant 0.000000e+00 : bf16
    %10 = vector.broadcast %cst_4 : bf16 to vector<10x1x4xbf16>
    %11 = tpu.concatenate %10, %9, %10 in 1 : vector<10x1x4xbf16>, vector<10x8x4xbf16>, vector<10x1x4xbf16> -> vector<10x10x4xbf16>
    %c0_5 = arith.constant 0 : index
    %c0_6 = arith.constant 0 : index
    %c0_7 = arith.constant 0 : index
    %c0_8 = arith.constant 0 : index
    %c0_9 = arith.constant 0 : index
    %12 = vector.load %arg3[%c0_5, %c0_6, %c0_7, %c0_8, %c0_9] : memref<1x1x8x8x4xbf16, #tpu.memory_space<vmem>>, vector<1x1x8x8x4xbf16>
    %13 = vector.shape_cast %12 : vector<1x1x8x8x4xbf16> to vector<8x8x4xbf16>
    %cst_10 = arith.constant 0.000000e+00 : bf16
    %14 = vector.broadcast %cst_10 : bf16 to vector<1x8x4xbf16>
    %15 = tpu.concatenate %14, %13, %14 in 0 : vector<1x8x4xbf16>, vector<8x8x4xbf16>, vector<1x8x4xbf16> -> vector<10x8x4xbf16>
    %cst_11 = arith.constant 0.000000e+00 : bf16
    %16 = vector.broadcast %cst_11 : bf16 to vector<10x1x4xbf16>
    %17 = tpu.concatenate %16, %15, %16 in 1 : vector<10x1x4xbf16>, vector<10x8x4xbf16>, vector<10x1x4xbf16> -> vector<10x10x4xbf16>
    %c0_12 = arith.constant 0 : index
    %c0_13 = arith.constant 0 : index
    %c0_14 = arith.constant 0 : index
    %c0_15 = arith.constant 0 : index
    %c0_16 = arith.constant 0 : index
    %18 = vector.load %arg4[%c0_12, %c0_13, %c0_14, %c0_15, %c0_16] : memref<1x1x8x8x4xbf16, #tpu.memory_space<vmem>>, vector<1x1x8x8x4xbf16>
    %19 = vector.shape_cast %18 : vector<1x1x8x8x4xbf16> to vector<8x8x4xbf16>
    %c7_i32 = arith.constant 7 : i32
    %20 = arith.cmpi slt, %arg1, %c7_i32 : i32
    %21 = arith.extui %20 : i1 to i32
    %22 = arith.sitofp %21 : i32 to f32
    %23 = arith.truncf %22 : f32 to bf16
    %24 = vector.broadcast %23 : bf16 to vector<8x8x4xbf16>
    %25 = arith.mulf %19, %24 : vector<8x8x4xbf16>
    %cst_17 = arith.constant 0.000000e+00 : bf16
    %26 = vector.broadcast %cst_17 : bf16 to vector<1x8x4xbf16>
    %27 = tpu.concatenate %26, %25, %26 in 0 : vector<1x8x4xbf16>, vector<8x8x4xbf16>, vector<1x8x4xbf16> -> vector<10x8x4xbf16>
    %cst_18 = arith.constant 0.000000e+00 : bf16
    %28 = vector.broadcast %cst_18 : bf16 to vector<10x1x4xbf16>
    %29 = tpu.concatenate %28, %27, %28 in 1 : vector<10x1x4xbf16>, vector<10x8x4xbf16>, vector<10x1x4xbf16> -> vector<10x10x4xbf16>
    %cst_19 = arith.constant 0.000000e+00 : f32
    %30 = vector.broadcast %cst_19 : f32 to vector<64x128xf32>
    %31 = vector.extract_strided_slice %11 {offsets = [0, 0, 0], sizes = [8, 8, 4], strides = [1, 1, 1]} : vector<10x10x4xbf16> to vector<8x8x4xbf16>
    %32 = vector.extract_strided_slice %11 {offsets = [0, 1, 0], sizes = [8, 8, 4], strides = [1, 1, 1]} : vector<10x10x4xbf16> to vector<8x8x4xbf16>
    %33 = vector.extract_strided_slice %11 {offsets = [0, 2, 0], sizes = [8, 8, 4], strides = [1, 1, 1]} : vector<10x10x4xbf16> to vector<8x8x4xbf16>
    %34 = vector.extract_strided_slice %11 {offsets = [1, 0, 0], sizes = [8, 8, 4], strides = [1, 1, 1]} : vector<10x10x4xbf16> to vector<8x8x4xbf16>
    %35 = vector.extract_strided_slice %11 {offsets = [1, 1, 0], sizes = [8, 8, 4], strides = [1, 1, 1]} : vector<10x10x4xbf16> to vector<8x8x4xbf16>
    %36 = vector.extract_strided_slice %11 {offsets = [1, 2, 0], sizes = [8, 8, 4], strides = [1, 1, 1]} : vector<10x10x4xbf16> to vector<8x8x4xbf16>
    %37 = vector.extract_strided_slice %11 {offsets = [2, 0, 0], sizes = [8, 8, 4], strides = [1, 1, 1]} : vector<10x10x4xbf16> to vector<8x8x4xbf16>
    %38 = vector.extract_strided_slice %11 {offsets = [2, 1, 0], sizes = [8, 8, 4], strides = [1, 1, 1]} : vector<10x10x4xbf16> to vector<8x8x4xbf16>
    %39 = vector.extract_strided_slice %11 {offsets = [2, 2, 0], sizes = [8, 8, 4], strides = [1, 1, 1]} : vector<10x10x4xbf16> to vector<8x8x4xbf16>
    %40 = tpu.concatenate %31, %32, %33, %34, %35, %36, %37, %38, %39 in 2 : vector<8x8x4xbf16>, vector<8x8x4xbf16>, vector<8x8x4xbf16>, vector<8x8x4xbf16>, vector<8x8x4xbf16>, vector<8x8x4xbf16>, vector<8x8x4xbf16>, vector<8x8x4xbf16>, vector<8x8x4xbf16> -> vector<8x8x36xbf16>
    %41 = vector.shape_cast %40 : vector<8x8x36xbf16> to vector<64x36xbf16>
    %c0_20 = arith.constant 0 : index
    %c0_21 = arith.constant 0 : index
    %c0_22 = arith.constant 0 : index
    %42 = vector.load %arg5[%c0_20, %c0_21, %c0_22] : memref<3x36x128xbf16, #tpu.memory_space<vmem>>, vector<1x36x128xbf16>
    %43 = vector.shape_cast %42 : vector<1x36x128xbf16> to vector<36x128xbf16>
    %cst_23 = arith.constant dense<0.000000e+00> : vector<64x128xf32>
    %44 = tpu.matmul %41, %43, %cst_23 {dimension_numbers = #tpu.dot_dimension_numbers<[1], [0], [0], [1], [0, 0, 1, 1], [], []>} : vector<64x36xbf16>, vector<36x128xbf16>, vector<64x128xf32> -> vector<64x128xf32>
    %45 = arith.addf %30, %44 : vector<64x128xf32>
    %46 = vector.extract_strided_slice %17 {offsets = [0, 0, 0], sizes = [8, 8, 4], strides = [1, 1, 1]} : vector<10x10x4xbf16> to vector<8x8x4xbf16>
    %47 = vector.extract_strided_slice %17 {offsets = [0, 1, 0], sizes = [8, 8, 4], strides = [1, 1, 1]} : vector<10x10x4xbf16> to vector<8x8x4xbf16>
    %48 = vector.extract_strided_slice %17 {offsets = [0, 2, 0], sizes = [8, 8, 4], strides = [1, 1, 1]} : vector<10x10x4xbf16> to vector<8x8x4xbf16>
    %49 = vector.extract_strided_slice %17 {offsets = [1, 0, 0], sizes = [8, 8, 4], strides = [1, 1, 1]} : vector<10x10x4xbf16> to vector<8x8x4xbf16>
    %50 = vector.extract_strided_slice %17 {offsets = [1, 1, 0], sizes = [8, 8, 4], strides = [1, 1, 1]} : vector<10x10x4xbf16> to vector<8x8x4xbf16>
    %51 = vector.extract_strided_slice %17 {offsets = [1, 2, 0], sizes = [8, 8, 4], strides = [1, 1, 1]} : vector<10x10x4xbf16> to vector<8x8x4xbf16>
    %52 = vector.extract_strided_slice %17 {offsets = [2, 0, 0], sizes = [8, 8, 4], strides = [1, 1, 1]} : vector<10x10x4xbf16> to vector<8x8x4xbf16>
    %53 = vector.extract_strided_slice %17 {offsets = [2, 1, 0], sizes = [8, 8, 4], strides = [1, 1, 1]} : vector<10x10x4xbf16> to vector<8x8x4xbf16>
    %54 = vector.extract_strided_slice %17 {offsets = [2, 2, 0], sizes = [8, 8, 4], strides = [1, 1, 1]} : vector<10x10x4xbf16> to vector<8x8x4xbf16>
    %55 = tpu.concatenate %46, %47, %48, %49, %50, %51, %52, %53, %54 in 2 : vector<8x8x4xbf16>, vector<8x8x4xbf16>, vector<8x8x4xbf16>, vector<8x8x4xbf16>, vector<8x8x4xbf16>, vector<8x8x4xbf16>, vector<8x8x4xbf16>, vector<8x8x4xbf16>, vector<8x8x4xbf16> -> vector<8x8x36xbf16>
    %56 = vector.shape_cast %55 : vector<8x8x36xbf16> to vector<64x36xbf16>
    %c1 = arith.constant 1 : index
    %c0_24 = arith.constant 0 : index
    %c0_25 = arith.constant 0 : index
    %57 = vector.load %arg5[%c1, %c0_24, %c0_25] : memref<3x36x128xbf16, #tpu.memory_space<vmem>>, vector<1x36x128xbf16>
    %58 = vector.shape_cast %57 : vector<1x36x128xbf16> to vector<36x128xbf16>
    %cst_26 = arith.constant dense<0.000000e+00> : vector<64x128xf32>
    %59 = tpu.matmul %56, %58, %cst_26 {dimension_numbers = #tpu.dot_dimension_numbers<[1], [0], [0], [1], [0, 0, 1, 1], [], []>} : vector<64x36xbf16>, vector<36x128xbf16>, vector<64x128xf32> -> vector<64x128xf32>
    %60 = arith.addf %45, %59 : vector<64x128xf32>
    %61 = vector.extract_strided_slice %29 {offsets = [0, 0, 0], sizes = [8, 8, 4], strides = [1, 1, 1]} : vector<10x10x4xbf16> to vector<8x8x4xbf16>
    %62 = vector.extract_strided_slice %29 {offsets = [0, 1, 0], sizes = [8, 8, 4], strides = [1, 1, 1]} : vector<10x10x4xbf16> to vector<8x8x4xbf16>
    %63 = vector.extract_strided_slice %29 {offsets = [0, 2, 0], sizes = [8, 8, 4], strides = [1, 1, 1]} : vector<10x10x4xbf16> to vector<8x8x4xbf16>
    %64 = vector.extract_strided_slice %29 {offsets = [1, 0, 0], sizes = [8, 8, 4], strides = [1, 1, 1]} : vector<10x10x4xbf16> to vector<8x8x4xbf16>
    %65 = vector.extract_strided_slice %29 {offsets = [1, 1, 0], sizes = [8, 8, 4], strides = [1, 1, 1]} : vector<10x10x4xbf16> to vector<8x8x4xbf16>
    %66 = vector.extract_strided_slice %29 {offsets = [1, 2, 0], sizes = [8, 8, 4], strides = [1, 1, 1]} : vector<10x10x4xbf16> to vector<8x8x4xbf16>
    %67 = vector.extract_strided_slice %29 {offsets = [2, 0, 0], sizes = [8, 8, 4], strides = [1, 1, 1]} : vector<10x10x4xbf16> to vector<8x8x4xbf16>
    %68 = vector.extract_strided_slice %29 {offsets = [2, 1, 0], sizes = [8, 8, 4], strides = [1, 1, 1]} : vector<10x10x4xbf16> to vector<8x8x4xbf16>
    %69 = vector.extract_strided_slice %29 {offsets = [2, 2, 0], sizes = [8, 8, 4], strides = [1, 1, 1]} : vector<10x10x4xbf16> to vector<8x8x4xbf16>
    %70 = tpu.concatenate %61, %62, %63, %64, %65, %66, %67, %68, %69 in 2 : vector<8x8x4xbf16>, vector<8x8x4xbf16>, vector<8x8x4xbf16>, vector<8x8x4xbf16>, vector<8x8x4xbf16>, vector<8x8x4xbf16>, vector<8x8x4xbf16>, vector<8x8x4xbf16>, vector<8x8x4xbf16> -> vector<8x8x36xbf16>
    %71 = vector.shape_cast %70 : vector<8x8x36xbf16> to vector<64x36xbf16>
    %c2 = arith.constant 2 : index
    %c0_27 = arith.constant 0 : index
    %c0_28 = arith.constant 0 : index
    %72 = vector.load %arg5[%c2, %c0_27, %c0_28] : memref<3x36x128xbf16, #tpu.memory_space<vmem>>, vector<1x36x128xbf16>
    %73 = vector.shape_cast %72 : vector<1x36x128xbf16> to vector<36x128xbf16>
    %cst_29 = arith.constant dense<0.000000e+00> : vector<64x128xf32>
    %74 = tpu.matmul %71, %73, %cst_29 {dimension_numbers = #tpu.dot_dimension_numbers<[1], [0], [0], [1], [0, 0, 1, 1], [], []>} : vector<64x36xbf16>, vector<36x128xbf16>, vector<64x128xf32> -> vector<64x128xf32>
    %75 = arith.addf %60, %74 : vector<64x128xf32>
    %76 = arith.truncf %75 : vector<64x128xf32> to vector<64x128xbf16>
    %77 = vector.shape_cast %76 : vector<64x128xbf16> to vector<8x8x128xbf16>
    %c0_30 = arith.constant 0 : index
    %c0_31 = arith.constant 0 : index
    %c0_32 = arith.constant 0 : index
    %c0_33 = arith.constant 0 : index
    %c0_34 = arith.constant 0 : index
    %78 = vector.load %arg8[%c0_30, %c0_31, %c0_32, %c0_33, %c0_34] : memref<1x1x8x8x128xbf16, #tpu.memory_space<vmem>>, vector<1x1x8x8x128xbf16>
    %79 = vector.shape_cast %78 : vector<1x1x8x8x128xbf16> to vector<8x8x128xbf16>
    %80 = vector.shape_cast %77 : vector<8x8x128xbf16> to vector<1x1x8x8x128xbf16>
    tpu.vector_store %arg8[%c0_30, %c0_31, %c0_32, %c0_33, %c0_34], %80 {strides = array<i32>} : memref<1x1x8x8x128xbf16, #tpu.memory_space<vmem>>, vector<1x1x8x8x128xbf16>,
    %cst_35 = arith.constant dense<0.000000e+00> : vector<128xf32>
    %81 = vector.multi_reduction <add>, %75, %cst_35 [0] : vector<64x128xf32> to vector<128xf32>
    %82 = vector.shape_cast %81 : vector<128xf32> to vector<1x128xf32>
    %c0_36 = arith.constant 0 : index
    %c0_37 = arith.constant 0 : index
    %c0_38 = arith.constant 0 : index
    %c0_39 = arith.constant 0 : index
    %83 = vector.load %arg9[%c0_36, %c0_37, %c0_38, %c0_39] : memref<1x1x1x128xf32, #tpu.memory_space<vmem>>, vector<1x1x1x128xf32>
    %84 = vector.shape_cast %83 : vector<1x1x1x128xf32> to vector<1x128xf32>
    %85 = vector.shape_cast %82 : vector<1x128xf32> to vector<1x1x1x128xf32>
    tpu.vector_store %arg9[%c0_36, %c0_37, %c0_38, %c0_39], %85 {strides = array<i32>} : memref<1x1x1x128xf32, #tpu.memory_space<vmem>>, vector<1x1x1x128xf32>,
    %86 = arith.mulf %75, %75 : vector<64x128xf32>
    %cst_40 = arith.constant dense<0.000000e+00> : vector<128xf32>
    %87 = vector.multi_reduction <add>, %86, %cst_40 [0] : vector<64x128xf32> to vector<128xf32>
    %88 = vector.shape_cast %87 : vector<128xf32> to vector<1x128xf32>
    %c0_41 = arith.constant 0 : index
    %c0_42 = arith.constant 0 : index
    %c0_43 = arith.constant 0 : index
    %c0_44 = arith.constant 0 : index
    %89 = vector.load %arg10[%c0_41, %c0_42, %c0_43, %c0_44] : memref<1x1x1x128xf32, #tpu.memory_space<vmem>>, vector<1x1x1x128xf32>
    %90 = vector.shape_cast %89 : vector<1x1x1x128xf32> to vector<1x128xf32>
    %91 = vector.shape_cast %88 : vector<1x128xf32> to vector<1x1x1x128xf32>
    tpu.vector_store %arg10[%c0_41, %c0_42, %c0_43, %c0_44], %91 {strides = array<i32>} : memref<1x1x1x128xf32, #tpu.memory_space<vmem>>, vector<1x1x1x128xf32>,
    return
  }
  func.func @transform_0(%arg0: i32, %arg1: i32) -> (i32, i32, i32, i32, i32) {
    %c1_i32 = arith.constant 1 : i32
    %0 = arith.subi %arg1, %c1_i32 : i32
    %c0_i32 = arith.constant 0 : i32
    %1 = arith.maxsi %0, %c0_i32 : i32
    %c0_i32_0 = arith.constant 0 : i32
    %c0_i32_1 = arith.constant 0 : i32
    %c0_i32_2 = arith.constant 0 : i32
    %c0_i32_3 = arith.constant 0 : i32
    return %arg0, %1, %c0_i32_0, %c0_i32_1, %c0_i32_2 : i32, i32, i32, i32, i32
  }
  func.func @transform_1(%arg0: i32, %arg1: i32) -> (i32, i32, i32, i32, i32) {
    %c0_i32 = arith.constant 0 : i32
    %c0_i32_0 = arith.constant 0 : i32
    %c0_i32_1 = arith.constant 0 : i32
    %c0_i32_2 = arith.constant 0 : i32
    return %arg0, %arg1, %c0_i32, %c0_i32_0, %c0_i32_1 : i32, i32, i32, i32, i32
  }
  func.func @transform_2(%arg0: i32, %arg1: i32) -> (i32, i32, i32, i32, i32) {
    %c1_i32 = arith.constant 1 : i32
    %0 = arith.addi %arg1, %c1_i32 : i32
    %c7_i32 = arith.constant 7 : i32
    %1 = arith.minsi %0, %c7_i32 : i32
    %c0_i32 = arith.constant 0 : i32
    %c0_i32_0 = arith.constant 0 : i32
    %c0_i32_1 = arith.constant 0 : i32
    %c0_i32_2 = arith.constant 0 : i32
    return %arg0, %1, %c0_i32, %c0_i32_0, %c0_i32_1 : i32, i32, i32, i32, i32
  }
  func.func @transform_3(%arg0: i32, %arg1: i32) -> (i32, i32, i32) {
    %c0_i32 = arith.constant 0 : i32
    %c0_i32_0 = arith.constant 0 : i32
    %c0_i32_1 = arith.constant 0 : i32
    %c0_i32_2 = arith.constant 0 : i32
    return %c0_i32, %c0_i32_0, %c0_i32_1 : i32, i32, i32
  }
  func.func @transform_4(%arg0: i32, %arg1: i32) -> (i32, i32) {
    %c0_i32 = arith.constant 0 : i32
    %c0_i32_0 = arith.constant 0 : i32
    %c0_i32_1 = arith.constant 0 : i32
    return %c0_i32, %c0_i32_0 : i32, i32
  }
  func.func @transform_5(%arg0: i32, %arg1: i32) -> (i32, i32) {
    %c0_i32 = arith.constant 0 : i32
    %c0_i32_0 = arith.constant 0 : i32
    %c0_i32_1 = arith.constant 0 : i32
    return %c0_i32, %c0_i32_0 : i32, i32
  }
  func.func @transform_6(%arg0: i32, %arg1: i32) -> (i32, i32, i32, i32, i32) {
    %c0_i32 = arith.constant 0 : i32
    %c0_i32_0 = arith.constant 0 : i32
    %c0_i32_1 = arith.constant 0 : i32
    %c0_i32_2 = arith.constant 0 : i32
    return %arg0, %arg1, %c0_i32, %c0_i32_0, %c0_i32_1 : i32, i32, i32, i32, i32
  }
  func.func @transform_7(%arg0: i32, %arg1: i32) -> (i32, i32, i32, i32) {
    %c0_i32 = arith.constant 0 : i32
    %c0_i32_0 = arith.constant 0 : i32
    %c0_i32_1 = arith.constant 0 : i32
    return %arg0, %arg1, %c0_i32, %c0_i32_0 : i32, i32, i32, i32
  }
  func.func @transform_8(%arg0: i32, %arg1: i32) -> (i32, i32, i32, i32) {
    %c0_i32 = arith.constant 0 : i32
    %c0_i32_0 = arith.constant 0 : i32
    %c0_i32_1 = arith.constant 0 : i32
    return %arg0, %arg1, %c0_i32, %c0_i32_0 : i32, i32, i32, i32
  }
}

module attributes {stable_mosaic.version = 11 : i64} {
  func.func @_conv3x3x3_kernel(%arg0: i32, %arg1: i32, %arg2: memref<1x1x8x8x128xbf16, #tpu.memory_space<vmem>>, %arg3: memref<1x1x8x8x128xbf16, #tpu.memory_space<vmem>>, %arg4: memref<1x1x8x8x128xbf16, #tpu.memory_space<vmem>>, %arg5: memref<3x1152x128xbf16, #tpu.memory_space<vmem>>, %arg6: memref<1x128xf32, #tpu.memory_space<vmem>>, %arg7: memref<1x128xf32, #tpu.memory_space<vmem>>, %arg8: memref<1x1x8x8x128xbf16, #tpu.memory_space<vmem>>, %arg9: memref<1x1x1x128xf32, #tpu.memory_space<vmem>>, %arg10: memref<1x1x1x128xf32, #tpu.memory_space<vmem>>) attributes {dimension_semantics = [#tpu.dimension_semantics<parallel>, #tpu.dimension_semantics<parallel>], iteration_bounds = array<i64: 2, 8>, scalar_prefetch = 0 : i64, scratch_operands = 0 : i64, tpu.core_type = #tpu.core_type<tc>, window_params = [{transform_indices = @transform_0, window_bounds = array<i64: 1, 1, 8, 8, 128>}, {transform_indices = @transform_1, window_bounds = array<i64: 1, 1, 8, 8, 128>}, {transform_indices = @transform_2, window_bounds = array<i64: 1, 1, 8, 8, 128>}, {pipeline_mode = #tpu.pipeline_mode<synchronous>, transform_indices = @transform_3, window_bounds = array<i64: 3, 1152, 128>}, {pipeline_mode = #tpu.pipeline_mode<synchronous>, transform_indices = @transform_4, window_bounds = array<i64: 1, 128>}, {pipeline_mode = #tpu.pipeline_mode<synchronous>, transform_indices = @transform_5, window_bounds = array<i64: 1, 128>}, {transform_indices = @transform_6, window_bounds = array<i64: 1, 1, 8, 8, 128>}, {transform_indices = @transform_7, window_bounds = array<i64: 1, 1, 1, 128>}, {transform_indices = @transform_8, window_bounds = array<i64: 1, 1, 1, 128>}]} {
    %c0 = arith.constant 0 : index
    %c0_0 = arith.constant 0 : index
    %c0_1 = arith.constant 0 : index
    %c0_2 = arith.constant 0 : index
    %c0_3 = arith.constant 0 : index
    %0 = vector.load %arg2[%c0, %c0_0, %c0_1, %c0_2, %c0_3] : memref<1x1x8x8x128xbf16, #tpu.memory_space<vmem>>, vector<1x1x8x8x128xbf16>
    %1 = vector.shape_cast %0 : vector<1x1x8x8x128xbf16> to vector<8x8x128xbf16>
    %c0_i32 = arith.constant 0 : i32
    %2 = arith.cmpi sgt, %arg1, %c0_i32 : i32
    %3 = arith.extf %1 : vector<8x8x128xbf16> to vector<8x8x128xf32>
    %c0_4 = arith.constant 0 : index
    %c0_5 = arith.constant 0 : index
    %4 = vector.load %arg6[%c0_4, %c0_5] : memref<1x128xf32, #tpu.memory_space<vmem>>, vector<1x128xf32>
    %5 = vector.shape_cast %4 : vector<1x128xf32> to vector<1x1x128xf32>
    %6 = vector.broadcast %5 : vector<1x1x128xf32> to vector<8x8x128xf32>
    %7 = arith.mulf %3, %6 : vector<8x8x128xf32>
    %c0_6 = arith.constant 0 : index
    %c0_7 = arith.constant 0 : index
    %8 = vector.load %arg7[%c0_6, %c0_7] : memref<1x128xf32, #tpu.memory_space<vmem>>, vector<1x128xf32>
    %9 = vector.shape_cast %8 : vector<1x128xf32> to vector<1x1x128xf32>
    %10 = vector.broadcast %9 : vector<1x1x128xf32> to vector<8x8x128xf32>
    %11 = arith.addf %7, %10 : vector<8x8x128xf32>
    %cst = arith.constant 0.000000e+00 : f32
    %12 = vector.broadcast %cst : f32 to vector<8x8x128xf32>
    %13 = arith.maximumf %11, %12 : vector<8x8x128xf32>
    %14 = arith.extui %2 : i1 to i32
    %15 = arith.sitofp %14 : i32 to f32
    %16 = vector.broadcast %15 : f32 to vector<8x8x128xf32>
    %17 = arith.mulf %13, %16 : vector<8x8x128xf32>
    %18 = arith.truncf %17 : vector<8x8x128xf32> to vector<8x8x128xbf16>
    %cst_8 = arith.constant 0.000000e+00 : bf16
    %19 = vector.broadcast %cst_8 : bf16 to vector<1x8x128xbf16>
    %20 = tpu.concatenate %19, %18, %19 in 0 : vector<1x8x128xbf16>, vector<8x8x128xbf16>, vector<1x8x128xbf16> -> vector<10x8x128xbf16>
    %cst_9 = arith.constant 0.000000e+00 : bf16
    %21 = vector.broadcast %cst_9 : bf16 to vector<10x1x128xbf16>
    %22 = tpu.concatenate %21, %20, %21 in 1 : vector<10x1x128xbf16>, vector<10x8x128xbf16>, vector<10x1x128xbf16> -> vector<10x10x128xbf16>
    %c0_10 = arith.constant 0 : index
    %c0_11 = arith.constant 0 : index
    %c0_12 = arith.constant 0 : index
    %c0_13 = arith.constant 0 : index
    %c0_14 = arith.constant 0 : index
    %23 = vector.load %arg3[%c0_10, %c0_11, %c0_12, %c0_13, %c0_14] : memref<1x1x8x8x128xbf16, #tpu.memory_space<vmem>>, vector<1x1x8x8x128xbf16>
    %24 = vector.shape_cast %23 : vector<1x1x8x8x128xbf16> to vector<8x8x128xbf16>
    %25 = arith.extf %24 : vector<8x8x128xbf16> to vector<8x8x128xf32>
    %c0_15 = arith.constant 0 : index
    %c0_16 = arith.constant 0 : index
    %26 = vector.load %arg6[%c0_15, %c0_16] : memref<1x128xf32, #tpu.memory_space<vmem>>, vector<1x128xf32>
    %27 = vector.shape_cast %26 : vector<1x128xf32> to vector<1x1x128xf32>
    %28 = vector.broadcast %27 : vector<1x1x128xf32> to vector<8x8x128xf32>
    %29 = arith.mulf %25, %28 : vector<8x8x128xf32>
    %c0_17 = arith.constant 0 : index
    %c0_18 = arith.constant 0 : index
    %30 = vector.load %arg7[%c0_17, %c0_18] : memref<1x128xf32, #tpu.memory_space<vmem>>, vector<1x128xf32>
    %31 = vector.shape_cast %30 : vector<1x128xf32> to vector<1x1x128xf32>
    %32 = vector.broadcast %31 : vector<1x1x128xf32> to vector<8x8x128xf32>
    %33 = arith.addf %29, %32 : vector<8x8x128xf32>
    %cst_19 = arith.constant 0.000000e+00 : f32
    %34 = vector.broadcast %cst_19 : f32 to vector<8x8x128xf32>
    %35 = arith.maximumf %33, %34 : vector<8x8x128xf32>
    %36 = arith.truncf %35 : vector<8x8x128xf32> to vector<8x8x128xbf16>
    %cst_20 = arith.constant 0.000000e+00 : bf16
    %37 = vector.broadcast %cst_20 : bf16 to vector<1x8x128xbf16>
    %38 = tpu.concatenate %37, %36, %37 in 0 : vector<1x8x128xbf16>, vector<8x8x128xbf16>, vector<1x8x128xbf16> -> vector<10x8x128xbf16>
    %cst_21 = arith.constant 0.000000e+00 : bf16
    %39 = vector.broadcast %cst_21 : bf16 to vector<10x1x128xbf16>
    %40 = tpu.concatenate %39, %38, %39 in 1 : vector<10x1x128xbf16>, vector<10x8x128xbf16>, vector<10x1x128xbf16> -> vector<10x10x128xbf16>
    %c0_22 = arith.constant 0 : index
    %c0_23 = arith.constant 0 : index
    %c0_24 = arith.constant 0 : index
    %c0_25 = arith.constant 0 : index
    %c0_26 = arith.constant 0 : index
    %41 = vector.load %arg4[%c0_22, %c0_23, %c0_24, %c0_25, %c0_26] : memref<1x1x8x8x128xbf16, #tpu.memory_space<vmem>>, vector<1x1x8x8x128xbf16>
    %42 = vector.shape_cast %41 : vector<1x1x8x8x128xbf16> to vector<8x8x128xbf16>
    %c7_i32 = arith.constant 7 : i32
    %43 = arith.cmpi slt, %arg1, %c7_i32 : i32
    %44 = arith.extf %42 : vector<8x8x128xbf16> to vector<8x8x128xf32>
    %c0_27 = arith.constant 0 : index
    %c0_28 = arith.constant 0 : index
    %45 = vector.load %arg6[%c0_27, %c0_28] : memref<1x128xf32, #tpu.memory_space<vmem>>, vector<1x128xf32>
    %46 = vector.shape_cast %45 : vector<1x128xf32> to vector<1x1x128xf32>
    %47 = vector.broadcast %46 : vector<1x1x128xf32> to vector<8x8x128xf32>
    %48 = arith.mulf %44, %47 : vector<8x8x128xf32>
    %c0_29 = arith.constant 0 : index
    %c0_30 = arith.constant 0 : index
    %49 = vector.load %arg7[%c0_29, %c0_30] : memref<1x128xf32, #tpu.memory_space<vmem>>, vector<1x128xf32>
    %50 = vector.shape_cast %49 : vector<1x128xf32> to vector<1x1x128xf32>
    %51 = vector.broadcast %50 : vector<1x1x128xf32> to vector<8x8x128xf32>
    %52 = arith.addf %48, %51 : vector<8x8x128xf32>
    %cst_31 = arith.constant 0.000000e+00 : f32
    %53 = vector.broadcast %cst_31 : f32 to vector<8x8x128xf32>
    %54 = arith.maximumf %52, %53 : vector<8x8x128xf32>
    %55 = arith.extui %43 : i1 to i32
    %56 = arith.sitofp %55 : i32 to f32
    %57 = vector.broadcast %56 : f32 to vector<8x8x128xf32>
    %58 = arith.mulf %54, %57 : vector<8x8x128xf32>
    %59 = arith.truncf %58 : vector<8x8x128xf32> to vector<8x8x128xbf16>
    %cst_32 = arith.constant 0.000000e+00 : bf16
    %60 = vector.broadcast %cst_32 : bf16 to vector<1x8x128xbf16>
    %61 = tpu.concatenate %60, %59, %60 in 0 : vector<1x8x128xbf16>, vector<8x8x128xbf16>, vector<1x8x128xbf16> -> vector<10x8x128xbf16>
    %cst_33 = arith.constant 0.000000e+00 : bf16
    %62 = vector.broadcast %cst_33 : bf16 to vector<10x1x128xbf16>
    %63 = tpu.concatenate %62, %61, %62 in 1 : vector<10x1x128xbf16>, vector<10x8x128xbf16>, vector<10x1x128xbf16> -> vector<10x10x128xbf16>
    %cst_34 = arith.constant 0.000000e+00 : f32
    %64 = vector.broadcast %cst_34 : f32 to vector<64x128xf32>
    %65 = vector.extract_strided_slice %22 {offsets = [0, 0, 0], sizes = [8, 8, 128], strides = [1, 1, 1]} : vector<10x10x128xbf16> to vector<8x8x128xbf16>
    %66 = vector.extract_strided_slice %22 {offsets = [0, 1, 0], sizes = [8, 8, 128], strides = [1, 1, 1]} : vector<10x10x128xbf16> to vector<8x8x128xbf16>
    %67 = vector.extract_strided_slice %22 {offsets = [0, 2, 0], sizes = [8, 8, 128], strides = [1, 1, 1]} : vector<10x10x128xbf16> to vector<8x8x128xbf16>
    %68 = vector.extract_strided_slice %22 {offsets = [1, 0, 0], sizes = [8, 8, 128], strides = [1, 1, 1]} : vector<10x10x128xbf16> to vector<8x8x128xbf16>
    %69 = vector.extract_strided_slice %22 {offsets = [1, 1, 0], sizes = [8, 8, 128], strides = [1, 1, 1]} : vector<10x10x128xbf16> to vector<8x8x128xbf16>
    %70 = vector.extract_strided_slice %22 {offsets = [1, 2, 0], sizes = [8, 8, 128], strides = [1, 1, 1]} : vector<10x10x128xbf16> to vector<8x8x128xbf16>
    %71 = vector.extract_strided_slice %22 {offsets = [2, 0, 0], sizes = [8, 8, 128], strides = [1, 1, 1]} : vector<10x10x128xbf16> to vector<8x8x128xbf16>
    %72 = vector.extract_strided_slice %22 {offsets = [2, 1, 0], sizes = [8, 8, 128], strides = [1, 1, 1]} : vector<10x10x128xbf16> to vector<8x8x128xbf16>
    %73 = vector.extract_strided_slice %22 {offsets = [2, 2, 0], sizes = [8, 8, 128], strides = [1, 1, 1]} : vector<10x10x128xbf16> to vector<8x8x128xbf16>
    %74 = tpu.concatenate %65, %66, %67, %68, %69, %70, %71, %72, %73 in 2 : vector<8x8x128xbf16>, vector<8x8x128xbf16>, vector<8x8x128xbf16>, vector<8x8x128xbf16>, vector<8x8x128xbf16>, vector<8x8x128xbf16>, vector<8x8x128xbf16>, vector<8x8x128xbf16>, vector<8x8x128xbf16> -> vector<8x8x1152xbf16>
    %75 = vector.shape_cast %74 : vector<8x8x1152xbf16> to vector<64x1152xbf16>
    %c0_35 = arith.constant 0 : index
    %c0_36 = arith.constant 0 : index
    %c0_37 = arith.constant 0 : index
    %76 = vector.load %arg5[%c0_35, %c0_36, %c0_37] : memref<3x1152x128xbf16, #tpu.memory_space<vmem>>, vector<1x1152x128xbf16>
    %77 = vector.shape_cast %76 : vector<1x1152x128xbf16> to vector<1152x128xbf16>
    %cst_38 = arith.constant dense<0.000000e+00> : vector<64x128xf32>
    %78 = tpu.matmul %75, %77, %cst_38 {dimension_numbers = #tpu.dot_dimension_numbers<[1], [0], [0], [1], [0, 0, 1, 1], [], []>} : vector<64x1152xbf16>, vector<1152x128xbf16>, vector<64x128xf32> -> vector<64x128xf32>
    %79 = arith.addf %64, %78 : vector<64x128xf32>
    %80 = vector.extract_strided_slice %40 {offsets = [0, 0, 0], sizes = [8, 8, 128], strides = [1, 1, 1]} : vector<10x10x128xbf16> to vector<8x8x128xbf16>
    %81 = vector.extract_strided_slice %40 {offsets = [0, 1, 0], sizes = [8, 8, 128], strides = [1, 1, 1]} : vector<10x10x128xbf16> to vector<8x8x128xbf16>
    %82 = vector.extract_strided_slice %40 {offsets = [0, 2, 0], sizes = [8, 8, 128], strides = [1, 1, 1]} : vector<10x10x128xbf16> to vector<8x8x128xbf16>
    %83 = vector.extract_strided_slice %40 {offsets = [1, 0, 0], sizes = [8, 8, 128], strides = [1, 1, 1]} : vector<10x10x128xbf16> to vector<8x8x128xbf16>
    %84 = vector.extract_strided_slice %40 {offsets = [1, 1, 0], sizes = [8, 8, 128], strides = [1, 1, 1]} : vector<10x10x128xbf16> to vector<8x8x128xbf16>
    %85 = vector.extract_strided_slice %40 {offsets = [1, 2, 0], sizes = [8, 8, 128], strides = [1, 1, 1]} : vector<10x10x128xbf16> to vector<8x8x128xbf16>
    %86 = vector.extract_strided_slice %40 {offsets = [2, 0, 0], sizes = [8, 8, 128], strides = [1, 1, 1]} : vector<10x10x128xbf16> to vector<8x8x128xbf16>
    %87 = vector.extract_strided_slice %40 {offsets = [2, 1, 0], sizes = [8, 8, 128], strides = [1, 1, 1]} : vector<10x10x128xbf16> to vector<8x8x128xbf16>
    %88 = vector.extract_strided_slice %40 {offsets = [2, 2, 0], sizes = [8, 8, 128], strides = [1, 1, 1]} : vector<10x10x128xbf16> to vector<8x8x128xbf16>
    %89 = tpu.concatenate %80, %81, %82, %83, %84, %85, %86, %87, %88 in 2 : vector<8x8x128xbf16>, vector<8x8x128xbf16>, vector<8x8x128xbf16>, vector<8x8x128xbf16>, vector<8x8x128xbf16>, vector<8x8x128xbf16>, vector<8x8x128xbf16>, vector<8x8x128xbf16>, vector<8x8x128xbf16> -> vector<8x8x1152xbf16>
    %90 = vector.shape_cast %89 : vector<8x8x1152xbf16> to vector<64x1152xbf16>
    %c1 = arith.constant 1 : index
    %c0_39 = arith.constant 0 : index
    %c0_40 = arith.constant 0 : index
    %91 = vector.load %arg5[%c1, %c0_39, %c0_40] : memref<3x1152x128xbf16, #tpu.memory_space<vmem>>, vector<1x1152x128xbf16>
    %92 = vector.shape_cast %91 : vector<1x1152x128xbf16> to vector<1152x128xbf16>
    %cst_41 = arith.constant dense<0.000000e+00> : vector<64x128xf32>
    %93 = tpu.matmul %90, %92, %cst_41 {dimension_numbers = #tpu.dot_dimension_numbers<[1], [0], [0], [1], [0, 0, 1, 1], [], []>} : vector<64x1152xbf16>, vector<1152x128xbf16>, vector<64x128xf32> -> vector<64x128xf32>
    %94 = arith.addf %79, %93 : vector<64x128xf32>
    %95 = vector.extract_strided_slice %63 {offsets = [0, 0, 0], sizes = [8, 8, 128], strides = [1, 1, 1]} : vector<10x10x128xbf16> to vector<8x8x128xbf16>
    %96 = vector.extract_strided_slice %63 {offsets = [0, 1, 0], sizes = [8, 8, 128], strides = [1, 1, 1]} : vector<10x10x128xbf16> to vector<8x8x128xbf16>
    %97 = vector.extract_strided_slice %63 {offsets = [0, 2, 0], sizes = [8, 8, 128], strides = [1, 1, 1]} : vector<10x10x128xbf16> to vector<8x8x128xbf16>
    %98 = vector.extract_strided_slice %63 {offsets = [1, 0, 0], sizes = [8, 8, 128], strides = [1, 1, 1]} : vector<10x10x128xbf16> to vector<8x8x128xbf16>
    %99 = vector.extract_strided_slice %63 {offsets = [1, 1, 0], sizes = [8, 8, 128], strides = [1, 1, 1]} : vector<10x10x128xbf16> to vector<8x8x128xbf16>
    %100 = vector.extract_strided_slice %63 {offsets = [1, 2, 0], sizes = [8, 8, 128], strides = [1, 1, 1]} : vector<10x10x128xbf16> to vector<8x8x128xbf16>
    %101 = vector.extract_strided_slice %63 {offsets = [2, 0, 0], sizes = [8, 8, 128], strides = [1, 1, 1]} : vector<10x10x128xbf16> to vector<8x8x128xbf16>
    %102 = vector.extract_strided_slice %63 {offsets = [2, 1, 0], sizes = [8, 8, 128], strides = [1, 1, 1]} : vector<10x10x128xbf16> to vector<8x8x128xbf16>
    %103 = vector.extract_strided_slice %63 {offsets = [2, 2, 0], sizes = [8, 8, 128], strides = [1, 1, 1]} : vector<10x10x128xbf16> to vector<8x8x128xbf16>
    %104 = tpu.concatenate %95, %96, %97, %98, %99, %100, %101, %102, %103 in 2 : vector<8x8x128xbf16>, vector<8x8x128xbf16>, vector<8x8x128xbf16>, vector<8x8x128xbf16>, vector<8x8x128xbf16>, vector<8x8x128xbf16>, vector<8x8x128xbf16>, vector<8x8x128xbf16>, vector<8x8x128xbf16> -> vector<8x8x1152xbf16>
    %105 = vector.shape_cast %104 : vector<8x8x1152xbf16> to vector<64x1152xbf16>
    %c2 = arith.constant 2 : index
    %c0_42 = arith.constant 0 : index
    %c0_43 = arith.constant 0 : index
    %106 = vector.load %arg5[%c2, %c0_42, %c0_43] : memref<3x1152x128xbf16, #tpu.memory_space<vmem>>, vector<1x1152x128xbf16>
    %107 = vector.shape_cast %106 : vector<1x1152x128xbf16> to vector<1152x128xbf16>
    %cst_44 = arith.constant dense<0.000000e+00> : vector<64x128xf32>
    %108 = tpu.matmul %105, %107, %cst_44 {dimension_numbers = #tpu.dot_dimension_numbers<[1], [0], [0], [1], [0, 0, 1, 1], [], []>} : vector<64x1152xbf16>, vector<1152x128xbf16>, vector<64x128xf32> -> vector<64x128xf32>
    %109 = arith.addf %94, %108 : vector<64x128xf32>
    %110 = arith.truncf %109 : vector<64x128xf32> to vector<64x128xbf16>
    %111 = vector.shape_cast %110 : vector<64x128xbf16> to vector<8x8x128xbf16>
    %c0_45 = arith.constant 0 : index
    %c0_46 = arith.constant 0 : index
    %c0_47 = arith.constant 0 : index
    %c0_48 = arith.constant 0 : index
    %c0_49 = arith.constant 0 : index
    %112 = vector.load %arg8[%c0_45, %c0_46, %c0_47, %c0_48, %c0_49] : memref<1x1x8x8x128xbf16, #tpu.memory_space<vmem>>, vector<1x1x8x8x128xbf16>
    %113 = vector.shape_cast %112 : vector<1x1x8x8x128xbf16> to vector<8x8x128xbf16>
    %114 = vector.shape_cast %111 : vector<8x8x128xbf16> to vector<1x1x8x8x128xbf16>
    tpu.vector_store %arg8[%c0_45, %c0_46, %c0_47, %c0_48, %c0_49], %114 {strides = array<i32>} : memref<1x1x8x8x128xbf16, #tpu.memory_space<vmem>>, vector<1x1x8x8x128xbf16>,
    %cst_50 = arith.constant dense<0.000000e+00> : vector<128xf32>
    %115 = vector.multi_reduction <add>, %109, %cst_50 [0] : vector<64x128xf32> to vector<128xf32>
    %116 = vector.shape_cast %115 : vector<128xf32> to vector<1x128xf32>
    %c0_51 = arith.constant 0 : index
    %c0_52 = arith.constant 0 : index
    %c0_53 = arith.constant 0 : index
    %c0_54 = arith.constant 0 : index
    %117 = vector.load %arg9[%c0_51, %c0_52, %c0_53, %c0_54] : memref<1x1x1x128xf32, #tpu.memory_space<vmem>>, vector<1x1x1x128xf32>
    %118 = vector.shape_cast %117 : vector<1x1x1x128xf32> to vector<1x128xf32>
    %119 = vector.shape_cast %116 : vector<1x128xf32> to vector<1x1x1x128xf32>
    tpu.vector_store %arg9[%c0_51, %c0_52, %c0_53, %c0_54], %119 {strides = array<i32>} : memref<1x1x1x128xf32, #tpu.memory_space<vmem>>, vector<1x1x1x128xf32>,
    %120 = arith.mulf %109, %109 : vector<64x128xf32>
    %cst_55 = arith.constant dense<0.000000e+00> : vector<128xf32>
    %121 = vector.multi_reduction <add>, %120, %cst_55 [0] : vector<64x128xf32> to vector<128xf32>
    %122 = vector.shape_cast %121 : vector<128xf32> to vector<1x128xf32>
    %c0_56 = arith.constant 0 : index
    %c0_57 = arith.constant 0 : index
    %c0_58 = arith.constant 0 : index
    %c0_59 = arith.constant 0 : index
    %123 = vector.load %arg10[%c0_56, %c0_57, %c0_58, %c0_59] : memref<1x1x1x128xf32, #tpu.memory_space<vmem>>, vector<1x1x1x128xf32>
    %124 = vector.shape_cast %123 : vector<1x1x1x128xf32> to vector<1x128xf32>
    %125 = vector.shape_cast %122 : vector<1x128xf32> to vector<1x1x1x128xf32>
    tpu.vector_store %arg10[%c0_56, %c0_57, %c0_58, %c0_59], %125 {strides = array<i32>} : memref<1x1x1x128xf32, #tpu.memory_space<vmem>>, vector<1x1x1x128xf32>,
    return
  }
  func.func @transform_0(%arg0: i32, %arg1: i32) -> (i32, i32, i32, i32, i32) {
    %c1_i32 = arith.constant 1 : i32
    %0 = arith.subi %arg1, %c1_i32 : i32
    %c0_i32 = arith.constant 0 : i32
    %1 = arith.maxsi %0, %c0_i32 : i32
    %c0_i32_0 = arith.constant 0 : i32
    %c0_i32_1 = arith.constant 0 : i32
    %c0_i32_2 = arith.constant 0 : i32
    %c0_i32_3 = arith.constant 0 : i32
    return %arg0, %1, %c0_i32_0, %c0_i32_1, %c0_i32_2 : i32, i32, i32, i32, i32
  }
  func.func @transform_1(%arg0: i32, %arg1: i32) -> (i32, i32, i32, i32, i32) {
    %c0_i32 = arith.constant 0 : i32
    %c0_i32_0 = arith.constant 0 : i32
    %c0_i32_1 = arith.constant 0 : i32
    %c0_i32_2 = arith.constant 0 : i32
    return %arg0, %arg1, %c0_i32, %c0_i32_0, %c0_i32_1 : i32, i32, i32, i32, i32
  }
  func.func @transform_2(%arg0: i32, %arg1: i32) -> (i32, i32, i32, i32, i32) {
    %c1_i32 = arith.constant 1 : i32
    %0 = arith.addi %arg1, %c1_i32 : i32
    %c7_i32 = arith.constant 7 : i32
    %1 = arith.minsi %0, %c7_i32 : i32
    %c0_i32 = arith.constant 0 : i32
    %c0_i32_0 = arith.constant 0 : i32
    %c0_i32_1 = arith.constant 0 : i32
    %c0_i32_2 = arith.constant 0 : i32
    return %arg0, %1, %c0_i32, %c0_i32_0, %c0_i32_1 : i32, i32, i32, i32, i32
  }
  func.func @transform_3(%arg0: i32, %arg1: i32) -> (i32, i32, i32) {
    %c0_i32 = arith.constant 0 : i32
    %c0_i32_0 = arith.constant 0 : i32
    %c0_i32_1 = arith.constant 0 : i32
    %c0_i32_2 = arith.constant 0 : i32
    return %c0_i32, %c0_i32_0, %c0_i32_1 : i32, i32, i32
  }
  func.func @transform_4(%arg0: i32, %arg1: i32) -> (i32, i32) {
    %c0_i32 = arith.constant 0 : i32
    %c0_i32_0 = arith.constant 0 : i32
    %c0_i32_1 = arith.constant 0 : i32
    return %c0_i32, %c0_i32_0 : i32, i32
  }
  func.func @transform_5(%arg0: i32, %arg1: i32) -> (i32, i32) {
    %c0_i32 = arith.constant 0 : i32
    %c0_i32_0 = arith.constant 0 : i32
    %c0_i32_1 = arith.constant 0 : i32
    return %c0_i32, %c0_i32_0 : i32, i32
  }
  func.func @transform_6(%arg0: i32, %arg1: i32) -> (i32, i32, i32, i32, i32) {
    %c0_i32 = arith.constant 0 : i32
    %c0_i32_0 = arith.constant 0 : i32
    %c0_i32_1 = arith.constant 0 : i32
    %c0_i32_2 = arith.constant 0 : i32
    return %arg0, %arg1, %c0_i32, %c0_i32_0, %c0_i32_1 : i32, i32, i32, i32, i32
  }
  func.func @transform_7(%arg0: i32, %arg1: i32) -> (i32, i32, i32, i32) {
    %c0_i32 = arith.constant 0 : i32
    %c0_i32_0 = arith.constant 0 : i32
    %c0_i32_1 = arith.constant 0 : i32
    return %arg0, %arg1, %c0_i32, %c0_i32_0 : i32, i32, i32, i32
  }
  func.func @transform_8(%arg0: i32, %arg1: i32) -> (i32, i32, i32, i32) {
    %c0_i32 = arith.constant 0 : i32
    %c0_i32_0 = arith.constant 0 : i32
    %c0_i32_1 = arith.constant 0 : i32
    return %arg0, %arg1, %c0_i32, %c0_i32_0 : i32, i32, i32, i32
  }
}

module attributes {stable_mosaic.version = 11 : i64} {
  func.func @_bn_relu_kernel(%arg0: i32, %arg1: memref<1024x128xbf16, #tpu.memory_space<vmem>>, %arg2: memref<1x128xf32, #tpu.memory_space<vmem>>, %arg3: memref<1x128xf32, #tpu.memory_space<vmem>>, %arg4: memref<1024x128xf32, #tpu.memory_space<vmem>>) attributes {dimension_semantics = [#tpu.dimension_semantics<parallel>], iteration_bounds = array<i64: 1>, scalar_prefetch = 0 : i64, scratch_operands = 0 : i64, tpu.core_type = #tpu.core_type<tc>, window_params = [{transform_indices = @transform_0, window_bounds = array<i64: 1024, 128>}, {pipeline_mode = #tpu.pipeline_mode<synchronous>, transform_indices = @transform_1, window_bounds = array<i64: 1, 128>}, {pipeline_mode = #tpu.pipeline_mode<synchronous>, transform_indices = @transform_2, window_bounds = array<i64: 1, 128>}, {transform_indices = @transform_3, window_bounds = array<i64: 1024, 128>}]} {
    %c0 = arith.constant 0 : index
    %c0_0 = arith.constant 0 : index
    %0 = vector.load %arg1[%c0, %c0_0] : memref<1024x128xbf16, #tpu.memory_space<vmem>>, vector<1024x128xbf16>
    %1 = arith.extf %0 : vector<1024x128xbf16> to vector<1024x128xf32>
    %c0_1 = arith.constant 0 : index
    %c0_2 = arith.constant 0 : index
    %2 = vector.load %arg2[%c0_1, %c0_2] : memref<1x128xf32, #tpu.memory_space<vmem>>, vector<1x128xf32>
    %3 = vector.broadcast %2 : vector<1x128xf32> to vector<1024x128xf32>
    %4 = arith.mulf %1, %3 : vector<1024x128xf32>
    %c0_3 = arith.constant 0 : index
    %c0_4 = arith.constant 0 : index
    %5 = vector.load %arg3[%c0_3, %c0_4] : memref<1x128xf32, #tpu.memory_space<vmem>>, vector<1x128xf32>
    %6 = vector.broadcast %5 : vector<1x128xf32> to vector<1024x128xf32>
    %7 = arith.addf %4, %6 : vector<1024x128xf32>
    %cst = arith.constant 0.000000e+00 : f32
    %8 = vector.broadcast %cst : f32 to vector<1024x128xf32>
    %9 = arith.maximumf %7, %8 : vector<1024x128xf32>
    %c0_5 = arith.constant 0 : index
    %c0_6 = arith.constant 0 : index
    %10 = vector.load %arg4[%c0_5, %c0_6] : memref<1024x128xf32, #tpu.memory_space<vmem>>, vector<1024x128xf32>
    tpu.vector_store %arg4[%c0_5, %c0_6], %9 {strides = array<i32>} : memref<1024x128xf32, #tpu.memory_space<vmem>>, vector<1024x128xf32>,
    return
  }
  func.func @transform_0(%arg0: i32) -> (i32, i32) {
    %c0_i32 = arith.constant 0 : i32
    %c0_i32_0 = arith.constant 0 : i32
    return %arg0, %c0_i32 : i32, i32
  }
  func.func @transform_1(%arg0: i32) -> (i32, i32) {
    %c0_i32 = arith.constant 0 : i32
    %c0_i32_0 = arith.constant 0 : i32
    %c0_i32_1 = arith.constant 0 : i32
    return %c0_i32, %c0_i32_0 : i32, i32
  }
  func.func @transform_2(%arg0: i32) -> (i32, i32) {
    %c0_i32 = arith.constant 0 : i32
    %c0_i32_0 = arith.constant 0 : i32
    %c0_i32_1 = arith.constant 0 : i32
    return %c0_i32, %c0_i32_0 : i32, i32
  }
  func.func @transform_3(%arg0: i32) -> (i32, i32) {
    %c0_i32 = arith.constant 0 : i32
    %c0_i32_0 = arith.constant 0 : i32
    return %arg0, %c0_i32 : i32, i32
  }
}

</mosaic_0001>

<bundles_post_ra>
// kernel: double_conv_forward.5
= control target key start
LH: loop header
LB: loop body
LE: loop exit
PB: predicated region body
PF: predicated region fallthrough
CT: control target
= control target key end

     0   :  { %s1995_s0 = inlined_call_operand.vmem [shape: bf16[1024,128], index: 0, kind: input, shape index: {}]   ;;  %s1996_s1 = inlined_call_operand.vmem [shape: f32[1,128], index: 1, kind: input, shape index: {}]   ;;  %s1997_s2 = inlined_call_operand.vmem [shape: f32[1,128], index: 2, kind: input, shape index: {}]   ;;  %s1998_s3 = inlined_call_operand.vmem [shape: f32[1024,128], index: 3, kind: output, shape index: {}]  }
   0x1   :  { %v803_v0 = vld [vmem:[%s1995_s0] sm:$0xff]   ;;  %v1058_v4 = vld [vmem:[%s1995_s0 + $0x8] sm:$0xff]   ;;  %v1059_v5 = vld [vmem:[%s1995_s0 + $0x10] sm:$0xff]  }
   0x2   :  { %v1149_v1 = vld [vmem:[%s1996_s1] ss:$0 sm:$0xff]  ;;  %v804_v2 = vunpack.c.l.bf16 %v803_v0  ;;  %v805_v3 = vunpack.c.h.bf16 %v803_v0  ;;  %v1060_v6 = vld [vmem:[%s1995_s0 + $0x18] sm:$0xff]   ;;  %v808_v8 = vunpack.c.l.bf16 %v1058_v4  ;;  %v809_v9 = vunpack.c.h.bf16 %v1058_v4  ;;  %v1062_v33 = vld [vmem:[%s1995_s0 + $0x28] sm:$0xff]  }
   0x3   :  { %v1163_v7 = vld [vmem:[%s1997_s2] ss:$0 sm:$0xff]  ;;  %v812_v10 = vunpack.c.l.bf16 %v1059_v5  ;;  %v813_v11 = vunpack.c.h.bf16 %v1059_v5  ;;  %v816_v14 = vunpack.c.l.bf16 %v1060_v6  ;;  %v817_v15 = vunpack.c.h.bf16 %v1060_v6  ;;  %v1063_v34 = vld [vmem:[%s1995_s0 + $0x30] sm:$0xff]   ;;  %v1064_v39 = vld [vmem:[%s1995_s0 + $0x38] sm:$0xff]  }
   0x4   :  { %v277_v12 = vmul.f32 %v804_v2, %v1149_v1  ;;  %v278_v13 = vmul.f32 %v805_v3, %v1149_v1  ;;  %v279_v16 = vmul.f32 %v808_v8, %v1149_v1  ;;  %v280_v17 = vmul.f32 %v809_v9, %v1149_v1  ;;  %v1061_v28 = vld [vmem:[%s1995_s0 + $0x20] sm:$0xff]   ;;  %v1066_v6 = vld [vmem:[%s1995_s0 + $0x48] sm:$0xff]   ;;  %v1067_v8 = vld [vmem:[%s1995_s0 + $0x50] sm:$0xff]  }
   0x5   :  { %v281_v18 = vmul.f32 %v812_v10, %v1149_v1  ;;  %v282_v19 = vmul.f32 %v813_v11, %v1149_v1  ;;  %v283_v22 = vmul.f32 %v816_v14, %v1149_v1  ;;  %v284_v23 = vmul.f32 %v817_v15, %v1149_v1  ;;  %v1065_v0 = vld [vmem:[%s1995_s0 + $0x40] sm:$0xff]  }
   0x6   :  { %v412_v20 = vadd.f32 %v1163_v7, %v277_v12  ;;  %v413_v21 = vadd.f32 %v1163_v7, %v278_v13  ;;  %v414_v24 = vadd.f32 %v1163_v7, %v279_v16  ;;  %v415_v25 = vadd.f32 %v1163_v7, %v280_v17  ;;  %v1068_v13 = vld [vmem:[%s1995_s0 + $0x58] sm:$0xff]  }
   0x7   :  { %v416_v26 = vadd.f32 %v1163_v7, %v281_v18  ;;  %v417_v27 = vadd.f32 %v1163_v7, %v282_v19  ;;  %v418_v31 = vadd.f32 %v1163_v7, %v283_v22  ;;  %v419_v32 = vadd.f32 %v1163_v7, %v284_v23 }
   0x8   :  { %v540_v29 = vmax.f32 %v412_v20, 0.0  ;;  %v541_v30 = vmax.f32 %v413_v21, 0.0  ;;  %v542_v35 = vmax.f32 %v414_v24, 0.0  ;;  %v543_v36 = vmax.f32 %v415_v25, 0.0 }
   0x9   :  { %v544_v37 = vmax.f32 %v416_v26, 0.0  ;;  %v545_v38 = vmax.f32 %v417_v27, 0.0  ;;  %v546_v40 = vmax.f32 %v418_v31, 0.0  ;;  %v547_v41 = vmax.f32 %v419_v32, 0.0 }
   0xa   :  { %668 = vst [vmem:[%s1998_s3] sm:$0xff] %v540_v29  ;;  %669 = vst [vmem:[%s1998_s3 + $0x8] sm:$0xff] %v541_v30  ;;  %v820_v42 = vunpack.c.l.bf16 %v1061_v28  ;;  %v821_v43 = vunpack.c.h.bf16 %v1061_v28  ;;  %v824_v44 = vunpack.c.l.bf16 %v1062_v33  ;;  %v825_v45 = vunpack.c.h.bf16 %v1062_v33 }
   0xb   :  { %670 = vst [vmem:[%s1998_s3 + $0x10] sm:$0xff] %v542_v35  ;;  %671 = vst [vmem:[%s1998_s3 + $0x18] sm:$0xff] %v543_v36  ;;  %v828_v46 = vunpack.c.l.bf16 %v1063_v34  ;;  %v829_v47 = vunpack.c.h.bf16 %v1063_v34  ;;  %v832_v50 = vunpack.c.l.bf16 %v1064_v39  ;;  %v833_v51 = vunpack.c.h.bf16 %v1064_v39 }
   0xc   :  { %672 = vst [vmem:[%s1998_s3 + $0x20] sm:$0xff] %v544_v37  ;;  %673 = vst [vmem:[%s1998_s3 + $0x28] sm:$0xff] %v545_v38  ;;  %v285_v48 = vmul.f32 %v820_v42, %v1149_v1  ;;  %v286_v49 = vmul.f32 %v821_v43, %v1149_v1  ;;  %v287_v52 = vmul.f32 %v824_v44, %v1149_v1  ;;  %v836_v16 = vunpack.c.l.bf16 %v1065_v0  ;;  %v1069_v38 = vld [vmem:[%s1995_s0 + $0x60] sm:$0xff]   ;;  %v1070_v43 = vld [vmem:[%s1995_s0 + $0x68] sm:$0xff]  }
   0xd   :  { %674 = vst [vmem:[%s1998_s3 + $0x30] sm:$0xff] %v546_v40  ;;  %675 = vst [vmem:[%s1998_s3 + $0x38] sm:$0xff] %v547_v41  ;;  %v288_v53 = vmul.f32 %v825_v45, %v1149_v1  ;;  %v289_v54 = vmul.f32 %v828_v46, %v1149_v1  ;;  %v290_v55 = vmul.f32 %v829_v47, %v1149_v1  ;;  %v837_v17 = vunpack.c.h.bf16 %v1065_v0  ;;  %v1071_v44 = vld [vmem:[%s1995_s0 + $0x70] sm:$0xff]  }
   0xe   :  { %v420_v56 = vadd.f32 %v1163_v7, %v285_v48  ;;  %v421_v57 = vadd.f32 %v1163_v7, %v286_v49  ;;  %v291_v58 = vmul.f32 %v832_v50, %v1149_v1  ;;  %v292_v59 = vmul.f32 %v833_v51, %v1149_v1  ;;  %v1072_v49 = vld [vmem:[%s1995_s0 + $0x78] sm:$0xff]  }
   0xf   :  { %v422_v60 = vadd.f32 %v1163_v7, %v287_v52  ;;  %v423_v61 = vadd.f32 %v1163_v7, %v288_v53  ;;  %v424_v62 = vadd.f32 %v1163_v7, %v289_v54  ;;  %v425_v63 = vadd.f32 %v1163_v7, %v290_v55 }
  0x10   :  { %v548_v2 = vmax.f32 %v420_v56, 0.0  ;;  %v549_v3 = vmax.f32 %v421_v57, 0.0  ;;  %v426_v4 = vadd.f32 %v1163_v7, %v291_v58  ;;  %v427_v5 = vadd.f32 %v1163_v7, %v292_v59 }
  0x11   :  { %v550_v9 = vmax.f32 %v422_v60, 0.0  ;;  %v551_v10 = vmax.f32 %v423_v61, 0.0  ;;  %v552_v11 = vmax.f32 %v424_v62, 0.0  ;;  %v553_v12 = vmax.f32 %v425_v63, 0.0 }
  0x12   :  { %676 = vst [vmem:[%s1998_s3 + $0x40] sm:$0xff] %v548_v2  ;;  %677 = vst [vmem:[%s1998_s3 + $0x48] sm:$0xff] %v549_v3  ;;  %v554_v14 = vmax.f32 %v426_v4, 0.0  ;;  %v555_v15 = vmax.f32 %v427_v5, 0.0  ;;  %v840_v18 = vunpack.c.l.bf16 %v1066_v6  ;;  %v841_v19 = vunpack.c.h.bf16 %v1066_v6 }
  0x13   :  { %678 = vst [vmem:[%s1998_s3 + $0x50] sm:$0xff] %v550_v9  ;;  %679 = vst [vmem:[%s1998_s3 + $0x58] sm:$0xff] %v551_v10  ;;  %v844_v20 = vunpack.c.l.bf16 %v1067_v8  ;;  %v845_v21 = vunpack.c.h.bf16 %v1067_v8  ;;  %v293_v22 = vmul.f32 %v836_v16, %v1149_v1  ;;  %v294_v23 = vmul.f32 %v837_v17, %v1149_v1  ;;  %v1074_v17 = vld [vmem:[%s1995_s0 + $0x88] sm:$0xff]  }
  0x14   :  { %680 = vst [vmem:[%s1998_s3 + $0x60] sm:$0xff] %v552_v11  ;;  %681 = vst [vmem:[%s1998_s3 + $0x68] sm:$0xff] %v553_v12  ;;  %v848_v24 = vunpack.c.l.bf16 %v1068_v13  ;;  %v849_v25 = vunpack.c.h.bf16 %v1068_v13  ;;  %v295_v26 = vmul.f32 %v840_v18, %v1149_v1  ;;  %v296_v27 = vmul.f32 %v841_v19, %v1149_v1  ;;  %v1073_v12 = vld [vmem:[%s1995_s0 + $0x80] sm:$0xff]   ;;  %v1075_v18 = vld [vmem:[%s1995_s0 + $0x90] sm:$0xff]  }
  0x15   :  { %682 = vst [vmem:[%s1998_s3 + $0x70] sm:$0xff] %v554_v14  ;;  %683 = vst [vmem:[%s1998_s3 + $0x78] sm:$0xff] %v555_v15  ;;  %v297_v28 = vmul.f32 %v844_v20, %v1149_v1  ;;  %v298_v29 = vmul.f32 %v845_v21, %v1149_v1  ;;  %v428_v30 = vadd.f32 %v1163_v7, %v293_v22  ;;  %v852_v52 = vunpack.c.l.bf16 %v1069_v38 }
  0x16   :  { %v429_v31 = vadd.f32 %v1163_v7, %v294_v23  ;;  %v299_v32 = vmul.f32 %v848_v24, %v1149_v1  ;;  %v300_v33 = vmul.f32 %v849_v25, %v1149_v1  ;;  %v430_v34 = vadd.f32 %v1163_v7, %v295_v26  ;;  %v1076_v23 = vld [vmem:[%s1995_s0 + $0x98] sm:$0xff]  }
  0x17   :  { %v431_v35 = vadd.f32 %v1163_v7, %v296_v27  ;;  %v432_v36 = vadd.f32 %v1163_v7, %v297_v28  ;;  %v433_v37 = vadd.f32 %v1163_v7, %v298_v29  ;;  %v556_v39 = vmax.f32 %v428_v30, 0.0 }
  0x18   :  { %v557_v40 = vmax.f32 %v429_v31, 0.0  ;;  %v434_v41 = vadd.f32 %v1163_v7, %v299_v32  ;;  %v435_v42 = vadd.f32 %v1163_v7, %v300_v33  ;;  %v558_v45 = vmax.f32 %v430_v34, 0.0 }
  0x19   :  { %v559_v46 = vmax.f32 %v431_v35, 0.0  ;;  %v560_v47 = vmax.f32 %v432_v36, 0.0  ;;  %v561_v48 = vmax.f32 %v433_v37, 0.0  ;;  %684 = vst [vmem:[%s1998_s3 + $0x80] sm:$0xff] %v556_v39  ;;  %v853_v53 = vunpack.c.h.bf16 %v1069_v38 }
  0x1a   :  { %685 = vst [vmem:[%s1998_s3 + $0x88] sm:$0xff] %v557_v40  ;;  %v562_v50 = vmax.f32 %v434_v41, 0.0  ;;  %v563_v51 = vmax.f32 %v435_v42, 0.0  ;;  %686 = vst [vmem:[%s1998_s3 + $0x90] sm:$0xff] %v558_v45  ;;  %v856_v54 = vunpack.c.l.bf16 %v1070_v43  ;;  %v857_v55 = vunpack.c.h.bf16 %v1070_v43 }
  0x1b   :  { %687 = vst [vmem:[%s1998_s3 + $0x98] sm:$0xff] %v559_v46  ;;  %688 = vst [vmem:[%s1998_s3 + $0xa0] sm:$0xff] %v560_v47  ;;  %v860_v56 = vunpack.c.l.bf16 %v1071_v44  ;;  %v861_v57 = vunpack.c.h.bf16 %v1071_v44  ;;  %v301_v58 = vmul.f32 %v852_v52, %v1149_v1  ;;  %v302_v59 = vmul.f32 %v853_v53, %v1149_v1  ;;  %v1078_v53 = vld [vmem:[%s1995_s0 + $0xa8] sm:$0xff]  }
  0x1c   :  { %689 = vst [vmem:[%s1998_s3 + $0xa8] sm:$0xff] %v561_v48  ;;  %690 = vst [vmem:[%s1998_s3 + $0xb0] sm:$0xff] %v562_v50  ;;  %v864_v60 = vunpack.c.l.bf16 %v1072_v49  ;;  %v865_v61 = vunpack.c.h.bf16 %v1072_v49  ;;  %v303_v62 = vmul.f32 %v856_v54, %v1149_v1  ;;  %v304_v63 = vmul.f32 %v857_v55, %v1149_v1  ;;  %v1077_v48 = vld [vmem:[%s1995_s0 + $0xa0] sm:$0xff]   ;;  %v1079_v54 = vld [vmem:[%s1995_s0 + $0xb0] sm:$0xff]  }
  0x1d   :  { %691 = vst [vmem:[%s1998_s3 + $0xb8] sm:$0xff] %v563_v51  ;;  %v305_v0 = vmul.f32 %v860_v56, %v1149_v1  ;;  %v306_v2 = vmul.f32 %v861_v57, %v1149_v1  ;;  %v436_v3 = vadd.f32 %v1163_v7, %v301_v58  ;;  %v437_v4 = vadd.f32 %v1163_v7, %v302_v59  ;;  %v1080_v59 = vld [vmem:[%s1995_s0 + $0xb8] sm:$0xff]  }
  0x1e   :  { %v307_v5 = vmul.f32 %v864_v60, %v1149_v1  ;;  %v308_v6 = vmul.f32 %v865_v61, %v1149_v1  ;;  %v438_v8 = vadd.f32 %v1163_v7, %v303_v62  ;;  %v439_v9 = vadd.f32 %v1163_v7, %v304_v63 }
  0x1f   :  { %v440_v10 = vadd.f32 %v1163_v7, %v305_v0  ;;  %v441_v11 = vadd.f32 %v1163_v7, %v306_v2  ;;  %v564_v13 = vmax.f32 %v436_v3, 0.0  ;;  %v565_v14 = vmax.f32 %v437_v4, 0.0 }
  0x20   :  { %v442_v15 = vadd.f32 %v1163_v7, %v307_v5  ;;  %v443_v16 = vadd.f32 %v1163_v7, %v308_v6  ;;  %v566_v19 = vmax.f32 %v438_v8, 0.0  ;;  %v567_v20 = vmax.f32 %v439_v9, 0.0 }
  0x21   :  { %v568_v21 = vmax.f32 %v440_v10, 0.0  ;;  %v569_v22 = vmax.f32 %v441_v11, 0.0  ;;  %692 = vst [vmem:[%s1998_s3 + $0xc0] sm:$0xff] %v564_v13  ;;  %693 = vst [vmem:[%s1998_s3 + $0xc8] sm:$0xff] %v565_v14  ;;  %v868_v26 = vunpack.c.l.bf16 %v1073_v12  ;;  %v869_v27 = vunpack.c.h.bf16 %v1073_v12 }
  0x22   :  { %v570_v24 = vmax.f32 %v442_v15, 0.0  ;;  %v571_v25 = vmax.f32 %v443_v16, 0.0  ;;  %694 = vst [vmem:[%s1998_s3 + $0xd0] sm:$0xff] %v566_v19  ;;  %695 = vst [vmem:[%s1998_s3 + $0xd8] sm:$0xff] %v567_v20  ;;  %v872_v28 = vunpack.c.l.bf16 %v1074_v17  ;;  %v873_v29 = vunpack.c.h.bf16 %v1074_v17 }
  0x23   :  { %696 = vst [vmem:[%s1998_s3 + $0xe0] sm:$0xff] %v568_v21  ;;  %697 = vst [vmem:[%s1998_s3 + $0xe8] sm:$0xff] %v569_v22  ;;  %v876_v30 = vunpack.c.l.bf16 %v1075_v18  ;;  %v877_v31 = vunpack.c.h.bf16 %v1075_v18  ;;  %v309_v32 = vmul.f32 %v868_v26, %v1149_v1  ;;  %v310_v33 = vmul.f32 %v869_v27, %v1149_v1  ;;  %v1081_v22 = vld [vmem:[%s1995_s0 + $0xc0] sm:$0xff]   ;;  %v1082_v27 = vld [vmem:[%s1995_s0 + $0xc8] sm:$0xff]  }
  0x24   :  { %698 = vst [vmem:[%s1998_s3 + $0xf0] sm:$0xff] %v570_v24  ;;  %699 = vst [vmem:[%s1998_s3 + $0xf8] sm:$0xff] %v571_v25  ;;  %v880_v34 = vunpack.c.l.bf16 %v1076_v23  ;;  %v881_v35 = vunpack.c.h.bf16 %v1076_v23  ;;  %v311_v36 = vmul.f32 %v872_v28, %v1149_v1  ;;  %v312_v37 = vmul.f32 %v873_v29, %v1149_v1  ;;  %v1083_v28 = vld [vmem:[%s1995_s0 + $0xd0] sm:$0xff]  }
  0x25   :  { %v313_v38 = vmul.f32 %v876_v30, %v1149_v1  ;;  %v314_v39 = vmul.f32 %v877_v31, %v1149_v1  ;;  %v444_v40 = vadd.f32 %v1163_v7, %v309_v32  ;;  %v445_v41 = vadd.f32 %v1163_v7, %v310_v33  ;;  %v1084_v33 = vld [vmem:[%s1995_s0 + $0xd8] sm:$0xff]  }
  0x26   :  { %v315_v42 = vmul.f32 %v880_v34, %v1149_v1  ;;  %v316_v43 = vmul.f32 %v881_v35, %v1149_v1  ;;  %v446_v44 = vadd.f32 %v1163_v7, %v311_v36  ;;  %v447_v45 = vadd.f32 %v1163_v7, %v312_v37 }
  0x27   :  { %v448_v46 = vadd.f32 %v1163_v7, %v313_v38  ;;  %v449_v47 = vadd.f32 %v1163_v7, %v314_v39  ;;  %v572_v49 = vmax.f32 %v444_v40, 0.0  ;;  %v573_v50 = vmax.f32 %v445_v41, 0.0 }
  0x28   :  { %v450_v51 = vadd.f32 %v1163_v7, %v315_v42  ;;  %v451_v52 = vadd.f32 %v1163_v7, %v316_v43  ;;  %v574_v55 = vmax.f32 %v446_v44, 0.0  ;;  %v575_v56 = vmax.f32 %v447_v45, 0.0 }
  0x29   :  { %v576_v57 = vmax.f32 %v448_v46, 0.0  ;;  %v577_v58 = vmax.f32 %v449_v47, 0.0  ;;  %700 = vst [vmem:[%s1998_s3 + $0x100] sm:$0xff] %v572_v49  ;;  %701 = vst [vmem:[%s1998_s3 + $0x108] sm:$0xff] %v573_v50  ;;  %v884_v62 = vunpack.c.l.bf16 %v1077_v48  ;;  %v885_v63 = vunpack.c.h.bf16 %v1077_v48 }
  0x2a   :  { %v578_v60 = vmax.f32 %v450_v51, 0.0  ;;  %v579_v61 = vmax.f32 %v451_v52, 0.0  ;;  %702 = vst [vmem:[%s1998_s3 + $0x110] sm:$0xff] %v574_v55  ;;  %703 = vst [vmem:[%s1998_s3 + $0x118] sm:$0xff] %v575_v56  ;;  %v888_v0 = vunpack.c.l.bf16 %v1078_v53  ;;  %v889_v2 = vunpack.c.h.bf16 %v1078_v53 }
  0x2b   :  { %704 = vst [vmem:[%s1998_s3 + $0x120] sm:$0xff] %v576_v57  ;;  %705 = vst [vmem:[%s1998_s3 + $0x128] sm:$0xff] %v577_v58  ;;  %v892_v3 = vunpack.c.l.bf16 %v1079_v54  ;;  %v893_v4 = vunpack.c.h.bf16 %v1079_v54  ;;  %v317_v5 = vmul.f32 %v884_v62, %v1149_v1  ;;  %v318_v6 = vmul.f32 %v885_v63, %v1149_v1  ;;  %v1085_v58 = vld [vmem:[%s1995_s0 + $0xe0] sm:$0xff]   ;;  %v1086_v63 = vld [vmem:[%s1995_s0 + $0xe8] sm:$0xff]  }
  0x2c   :  { %706 = vst [vmem:[%s1998_s3 + $0x130] sm:$0xff] %v578_v60  ;;  %707 = vst [vmem:[%s1998_s3 + $0x138] sm:$0xff] %v579_v61  ;;  %v896_v8 = vunpack.c.l.bf16 %v1080_v59  ;;  %v897_v9 = vunpack.c.h.bf16 %v1080_v59  ;;  %v319_v10 = vmul.f32 %v888_v0, %v1149_v1  ;;  %v320_v11 = vmul.f32 %v889_v2, %v1149_v1  ;;  %v1087_v0 = vld [vmem:[%s1995_s0 + $0xf0] sm:$0xff]  }
  0x2d   :  { %v321_v12 = vmul.f32 %v892_v3, %v1149_v1  ;;  %v322_v13 = vmul.f32 %v893_v4, %v1149_v1  ;;  %v452_v14 = vadd.f32 %v1163_v7, %v317_v5  ;;  %v453_v15 = vadd.f32 %v1163_v7, %v318_v6  ;;  %v1088_v6 = vld [vmem:[%s1995_s0 + $0xf8] sm:$0xff]  }
  0x2e   :  { %v323_v16 = vmul.f32 %v896_v8, %v1149_v1  ;;  %v324_v17 = vmul.f32 %v897_v9, %v1149_v1  ;;  %v454_v18 = vadd.f32 %v1163_v7, %v319_v10  ;;  %v455_v19 = vadd.f32 %v1163_v7, %v320_v11 }
  0x2f   :  { %v456_v20 = vadd.f32 %v1163_v7, %v321_v12  ;;  %v457_v21 = vadd.f32 %v1163_v7, %v322_v13  ;;  %v580_v23 = vmax.f32 %v452_v14, 0.0  ;;  %v581_v24 = vmax.f32 %v453_v15, 0.0 }
  0x30   :  { %v458_v25 = vadd.f32 %v1163_v7, %v323_v16  ;;  %v459_v26 = vadd.f32 %v1163_v7, %v324_v17  ;;  %v582_v29 = vmax.f32 %v454_v18, 0.0  ;;  %v583_v30 = vmax.f32 %v455_v19, 0.0 }
  0x31   :  { %v584_v31 = vmax.f32 %v456_v20, 0.0  ;;  %v585_v32 = vmax.f32 %v457_v21, 0.0  ;;  %708 = vst [vmem:[%s1998_s3 + $0x140] sm:$0xff] %v580_v23  ;;  %709 = vst [vmem:[%s1998_s3 + $0x148] sm:$0xff] %v581_v24  ;;  %v900_v36 = vunpack.c.l.bf16 %v1081_v22  ;;  %v901_v37 = vunpack.c.h.bf16 %v1081_v22 }
  0x32   :  { %v586_v34 = vmax.f32 %v458_v25, 0.0  ;;  %v587_v35 = vmax.f32 %v459_v26, 0.0  ;;  %710 = vst [vmem:[%s1998_s3 + $0x150] sm:$0xff] %v582_v29  ;;  %711 = vst [vmem:[%s1998_s3 + $0x158] sm:$0xff] %v583_v30  ;;  %v904_v38 = vunpack.c.l.bf16 %v1082_v27  ;;  %v905_v39 = vunpack.c.h.bf16 %v1082_v27 }
  0x33   :  { %712 = vst [vmem:[%s1998_s3 + $0x160] sm:$0xff] %v584_v31  ;;  %713 = vst [vmem:[%s1998_s3 + $0x168] sm:$0xff] %v585_v32  ;;  %v908_v40 = vunpack.c.l.bf16 %v1083_v28  ;;  %v909_v41 = vunpack.c.h.bf16 %v1083_v28  ;;  %v325_v42 = vmul.f32 %v900_v36, %v1149_v1  ;;  %v326_v43 = vmul.f32 %v901_v37, %v1149_v1  ;;  %v1089_v32 = vld [vmem:[%s1995_s0 + $0x100] sm:$0xff]   ;;  %v1090_v37 = vld [vmem:[%s1995_s0 + $0x108] sm:$0xff]  }
  0x34   :  { %714 = vst [vmem:[%s1998_s3 + $0x170] sm:$0xff] %v586_v34  ;;  %715 = vst [vmem:[%s1998_s3 + $0x178] sm:$0xff] %v587_v35  ;;  %v912_v44 = vunpack.c.l.bf16 %v1084_v33  ;;  %v913_v45 = vunpack.c.h.bf16 %v1084_v33  ;;  %v327_v46 = vmul.f32 %v904_v38, %v1149_v1  ;;  %v328_v47 = vmul.f32 %v905_v39, %v1149_v1  ;;  %v1091_v38 = vld [vmem:[%s1995_s0 + $0x110] sm:$0xff]  }
  0x35   :  { %v329_v48 = vmul.f32 %v908_v40, %v1149_v1  ;;  %v330_v49 = vmul.f32 %v909_v41, %v1149_v1  ;;  %v460_v50 = vadd.f32 %v1163_v7, %v325_v42  ;;  %v461_v51 = vadd.f32 %v1163_v7, %v326_v43  ;;  %v1092_v43 = vld [vmem:[%s1995_s0 + $0x118] sm:$0xff]  }
  0x36   :  { %v331_v52 = vmul.f32 %v912_v44, %v1149_v1  ;;  %v332_v53 = vmul.f32 %v913_v45, %v1149_v1  ;;  %v462_v54 = vadd.f32 %v1163_v7, %v327_v46  ;;  %v463_v55 = vadd.f32 %v1163_v7, %v328_v47 }
  0x37   :  { %v464_v56 = vadd.f32 %v1163_v7, %v329_v48  ;;  %v465_v57 = vadd.f32 %v1163_v7, %v330_v49  ;;  %v588_v59 = vmax.f32 %v460_v50, 0.0  ;;  %v589_v60 = vmax.f32 %v461_v51, 0.0 }
  0x38   :  { %v466_v61 = vadd.f32 %v1163_v7, %v331_v52  ;;  %v467_v62 = vadd.f32 %v1163_v7, %v332_v53  ;;  %v590_v2 = vmax.f32 %v462_v54, 0.0  ;;  %v591_v3 = vmax.f32 %v463_v55, 0.0 }
  0x39   :  { %v592_v4 = vmax.f32 %v464_v56, 0.0  ;;  %v593_v5 = vmax.f32 %v465_v57, 0.0  ;;  %716 = vst [vmem:[%s1998_s3 + $0x180] sm:$0xff] %v588_v59  ;;  %717 = vst [vmem:[%s1998_s3 + $0x188] sm:$0xff] %v589_v60  ;;  %v916_v10 = vunpack.c.l.bf16 %v1085_v58  ;;  %v917_v11 = vunpack.c.h.bf16 %v1085_v58 }
  0x3a   :  { %v594_v8 = vmax.f32 %v466_v61, 0.0  ;;  %v595_v9 = vmax.f32 %v467_v62, 0.0  ;;  %718 = vst [vmem:[%s1998_s3 + $0x190] sm:$0xff] %v590_v2  ;;  %719 = vst [vmem:[%s1998_s3 + $0x198] sm:$0xff] %v591_v3  ;;  %v920_v12 = vunpack.c.l.bf16 %v1086_v63  ;;  %v921_v13 = vunpack.c.h.bf16 %v1086_v63 }
  0x3b   :  { %720 = vst [vmem:[%s1998_s3 + $0x1a0] sm:$0xff] %v592_v4  ;;  %721 = vst [vmem:[%s1998_s3 + $0x1a8] sm:$0xff] %v593_v5  ;;  %v924_v14 = vunpack.c.l.bf16 %v1087_v0  ;;  %v925_v15 = vunpack.c.h.bf16 %v1087_v0  ;;  %v333_v16 = vmul.f32 %v916_v10, %v1149_v1  ;;  %v334_v17 = vmul.f32 %v917_v11, %v1149_v1  ;;  %v1093_v5 = vld [vmem:[%s1995_s0 + $0x120] sm:$0xff]   ;;  %v1094_v11 = vld [vmem:[%s1995_s0 + $0x128] sm:$0xff]  }
  0x3c   :  { %722 = vst [vmem:[%s1998_s3 + $0x1b0] sm:$0xff] %v594_v8  ;;  %723 = vst [vmem:[%s1998_s3 + $0x1b8] sm:$0xff] %v595_v9  ;;  %v928_v18 = vunpack.c.l.bf16 %v1088_v6  ;;  %v929_v19 = vunpack.c.h.bf16 %v1088_v6  ;;  %v335_v20 = vmul.f32 %v920_v12, %v1149_v1  ;;  %v336_v21 = vmul.f32 %v921_v13, %v1149_v1  ;;  %v1095_v12 = vld [vmem:[%s1995_s0 + $0x130] sm:$0xff]  }
  0x3d   :  { %v337_v22 = vmul.f32 %v924_v14, %v1149_v1  ;;  %v338_v23 = vmul.f32 %v925_v15, %v1149_v1  ;;  %v468_v24 = vadd.f32 %v1163_v7, %v333_v16  ;;  %v469_v25 = vadd.f32 %v1163_v7, %v334_v17  ;;  %v1096_v17 = vld [vmem:[%s1995_s0 + $0x138] sm:$0xff]  }
  0x3e   :  { %v339_v26 = vmul.f32 %v928_v18, %v1149_v1  ;;  %v340_v27 = vmul.f32 %v929_v19, %v1149_v1  ;;  %v470_v28 = vadd.f32 %v1163_v7, %v335_v20  ;;  %v471_v29 = vadd.f32 %v1163_v7, %v336_v21 }
  0x3f   :  { %v472_v30 = vadd.f32 %v1163_v7, %v337_v22  ;;  %v473_v31 = vadd.f32 %v1163_v7, %v338_v23  ;;  %v596_v33 = vmax.f32 %v468_v24, 0.0  ;;  %v597_v34 = vmax.f32 %v469_v25, 0.0 }
  0x40   :  { %v474_v35 = vadd.f32 %v1163_v7, %v339_v26  ;;  %v475_v36 = vadd.f32 %v1163_v7, %v340_v27  ;;  %v598_v39 = vmax.f32 %v470_v28, 0.0  ;;  %v599_v40 = vmax.f32 %v471_v29, 0.0 }
  0x41   :  { %v600_v41 = vmax.f32 %v472_v30, 0.0  ;;  %v601_v42 = vmax.f32 %v473_v31, 0.0  ;;  %724 = vst [vmem:[%s1998_s3 + $0x1c0] sm:$0xff] %v596_v33  ;;  %725 = vst [vmem:[%s1998_s3 + $0x1c8] sm:$0xff] %v597_v34  ;;  %v932_v46 = vunpack.c.l.bf16 %v1089_v32  ;;  %v933_v47 = vunpack.c.h.bf16 %v1089_v32 }
  0x42   :  { %v602_v44 = vmax.f32 %v474_v35, 0.0  ;;  %v603_v45 = vmax.f32 %v475_v36, 0.0  ;;  %726 = vst [vmem:[%s1998_s3 + $0x1d0] sm:$0xff] %v598_v39  ;;  %727 = vst [vmem:[%s1998_s3 + $0x1d8] sm:$0xff] %v599_v40  ;;  %v936_v48 = vunpack.c.l.bf16 %v1090_v37  ;;  %v937_v49 = vunpack.c.h.bf16 %v1090_v37 }
  0x43   :  { %728 = vst [vmem:[%s1998_s3 + $0x1e0] sm:$0xff] %v600_v41  ;;  %729 = vst [vmem:[%s1998_s3 + $0x1e8] sm:$0xff] %v601_v42  ;;  %v940_v50 = vunpack.c.l.bf16 %v1091_v38  ;;  %v941_v51 = vunpack.c.h.bf16 %v1091_v38  ;;  %v341_v52 = vmul.f32 %v932_v46, %v1149_v1  ;;  %v342_v53 = vmul.f32 %v933_v47, %v1149_v1  ;;  %v1097_v42 = vld [vmem:[%s1995_s0 + $0x140] sm:$0xff]   ;;  %v1098_v47 = vld [vmem:[%s1995_s0 + $0x148] sm:$0xff]  }
  0x44   :  { %730 = vst [vmem:[%s1998_s3 + $0x1f0] sm:$0xff] %v602_v44  ;;  %731 = vst [vmem:[%s1998_s3 + $0x1f8] sm:$0xff] %v603_v45  ;;  %v944_v54 = vunpack.c.l.bf16 %v1092_v43  ;;  %v945_v55 = vunpack.c.h.bf16 %v1092_v43  ;;  %v343_v56 = vmul.f32 %v936_v48, %v1149_v1  ;;  %v344_v57 = vmul.f32 %v937_v49, %v1149_v1  ;;  %v1099_v48 = vld [vmem:[%s1995_s0 + $0x150] sm:$0xff]  }
  0x45   :  { %v345_v58 = vmul.f32 %v940_v50, %v1149_v1  ;;  %v346_v59 = vmul.f32 %v941_v51, %v1149_v1  ;;  %v476_v60 = vadd.f32 %v1163_v7, %v341_v52  ;;  %v477_v61 = vadd.f32 %v1163_v7, %v342_v53  ;;  %v1100_v53 = vld [vmem:[%s1995_s0 + $0x158] sm:$0xff]  }
  0x46   :  { %v347_v62 = vmul.f32 %v944_v54, %v1149_v1  ;;  %v348_v63 = vmul.f32 %v945_v55, %v1149_v1  ;;  %v478_v0 = vadd.f32 %v1163_v7, %v343_v56  ;;  %v479_v2 = vadd.f32 %v1163_v7, %v344_v57 }
  0x47   :  { %v480_v3 = vadd.f32 %v1163_v7, %v345_v58  ;;  %v481_v4 = vadd.f32 %v1163_v7, %v346_v59  ;;  %v604_v6 = vmax.f32 %v476_v60, 0.0  ;;  %v605_v8 = vmax.f32 %v477_v61, 0.0 }
  0x48   :  { %v482_v9 = vadd.f32 %v1163_v7, %v347_v62  ;;  %v483_v10 = vadd.f32 %v1163_v7, %v348_v63  ;;  %v606_v13 = vmax.f32 %v478_v0, 0.0  ;;  %v607_v14 = vmax.f32 %v479_v2, 0.0 }
  0x49   :  { %v608_v15 = vmax.f32 %v480_v3, 0.0  ;;  %v609_v16 = vmax.f32 %v481_v4, 0.0  ;;  %732 = vst [vmem:[%s1998_s3 + $0x200] sm:$0xff] %v604_v6  ;;  %733 = vst [vmem:[%s1998_s3 + $0x208] sm:$0xff] %v605_v8  ;;  %v948_v20 = vunpack.c.l.bf16 %v1093_v5  ;;  %v949_v21 = vunpack.c.h.bf16 %v1093_v5 }
  0x4a   :  { %v610_v18 = vmax.f32 %v482_v9, 0.0  ;;  %v611_v19 = vmax.f32 %v483_v10, 0.0  ;;  %734 = vst [vmem:[%s1998_s3 + $0x210] sm:$0xff] %v606_v13  ;;  %735 = vst [vmem:[%s1998_s3 + $0x218] sm:$0xff] %v607_v14  ;;  %v952_v22 = vunpack.c.l.bf16 %v1094_v11  ;;  %v953_v23 = vunpack.c.h.bf16 %v1094_v11 }
  0x4b   :  { %736 = vst [vmem:[%s1998_s3 + $0x220] sm:$0xff] %v608_v15  ;;  %737 = vst [vmem:[%s1998_s3 + $0x228] sm:$0xff] %v609_v16  ;;  %v956_v24 = vunpack.c.l.bf16 %v1095_v12  ;;  %v957_v25 = vunpack.c.h.bf16 %v1095_v12  ;;  %v349_v26 = vmul.f32 %v948_v20, %v1149_v1  ;;  %v350_v27 = vmul.f32 %v949_v21, %v1149_v1  ;;  %v1101_v16 = vld [vmem:[%s1995_s0 + $0x160] sm:$0xff]   ;;  %v1102_v21 = vld [vmem:[%s1995_s0 + $0x168] sm:$0xff]  }
  0x4c   :  { %738 = vst [vmem:[%s1998_s3 + $0x230] sm:$0xff] %v610_v18  ;;  %739 = vst [vmem:[%s1998_s3 + $0x238] sm:$0xff] %v611_v19  ;;  %v960_v28 = vunpack.c.l.bf16 %v1096_v17  ;;  %v961_v29 = vunpack.c.h.bf16 %v1096_v17  ;;  %v351_v30 = vmul.f32 %v952_v22, %v1149_v1  ;;  %v352_v31 = vmul.f32 %v953_v23, %v1149_v1  ;;  %v1103_v22 = vld [vmem:[%s1995_s0 + $0x170] sm:$0xff]  }
  0x4d   :  { %v353_v32 = vmul.f32 %v956_v24, %v1149_v1  ;;  %v354_v33 = vmul.f32 %v957_v25, %v1149_v1  ;;  %v484_v34 = vadd.f32 %v1163_v7, %v349_v26  ;;  %v485_v35 = vadd.f32 %v1163_v7, %v350_v27  ;;  %v1104_v27 = vld [vmem:[%s1995_s0 + $0x178] sm:$0xff]  }
  0x4e   :  { %v355_v36 = vmul.f32 %v960_v28, %v1149_v1  ;;  %v356_v37 = vmul.f32 %v961_v29, %v1149_v1  ;;  %v486_v38 = vadd.f32 %v1163_v7, %v351_v30  ;;  %v487_v39 = vadd.f32 %v1163_v7, %v352_v31 }
  0x4f   :  { %v488_v40 = vadd.f32 %v1163_v7, %v353_v32  ;;  %v489_v41 = vadd.f32 %v1163_v7, %v354_v33  ;;  %v612_v43 = vmax.f32 %v484_v34, 0.0  ;;  %v613_v44 = vmax.f32 %v485_v35, 0.0 }
  0x50   :  { %v490_v45 = vadd.f32 %v1163_v7, %v355_v36  ;;  %v491_v46 = vadd.f32 %v1163_v7, %v356_v37  ;;  %v614_v49 = vmax.f32 %v486_v38, 0.0  ;;  %v615_v50 = vmax.f32 %v487_v39, 0.0 }
  0x51   :  { %v616_v51 = vmax.f32 %v488_v40, 0.0  ;;  %v617_v52 = vmax.f32 %v489_v41, 0.0  ;;  %740 = vst [vmem:[%s1998_s3 + $0x240] sm:$0xff] %v612_v43  ;;  %741 = vst [vmem:[%s1998_s3 + $0x248] sm:$0xff] %v613_v44  ;;  %v964_v56 = vunpack.c.l.bf16 %v1097_v42  ;;  %v965_v57 = vunpack.c.h.bf16 %v1097_v42 }
  0x52   :  { %v618_v54 = vmax.f32 %v490_v45, 0.0  ;;  %v619_v55 = vmax.f32 %v491_v46, 0.0  ;;  %742 = vst [vmem:[%s1998_s3 + $0x250] sm:$0xff] %v614_v49  ;;  %743 = vst [vmem:[%s1998_s3 + $0x258] sm:$0xff] %v615_v50  ;;  %v968_v58 = vunpack.c.l.bf16 %v1098_v47  ;;  %v969_v59 = vunpack.c.h.bf16 %v1098_v47 }
  0x53   :  { %744 = vst [vmem:[%s1998_s3 + $0x260] sm:$0xff] %v616_v51  ;;  %745 = vst [vmem:[%s1998_s3 + $0x268] sm:$0xff] %v617_v52  ;;  %v972_v60 = vunpack.c.l.bf16 %v1099_v48  ;;  %v973_v61 = vunpack.c.h.bf16 %v1099_v48  ;;  %v357_v62 = vmul.f32 %v964_v56, %v1149_v1  ;;  %v358_v63 = vmul.f32 %v965_v57, %v1149_v1  ;;  %v1105_v52 = vld [vmem:[%s1995_s0 + $0x180] sm:$0xff]   ;;  %v1107_v57 = vld [vmem:[%s1995_s0 + $0x190] sm:$0xff]  }
  0x54   :  { %746 = vst [vmem:[%s1998_s3 + $0x270] sm:$0xff] %v618_v54  ;;  %747 = vst [vmem:[%s1998_s3 + $0x278] sm:$0xff] %v619_v55  ;;  %v976_v0 = vunpack.c.l.bf16 %v1100_v53  ;;  %v977_v2 = vunpack.c.h.bf16 %v1100_v53  ;;  %v359_v3 = vmul.f32 %v968_v58, %v1149_v1  ;;  %v360_v4 = vmul.f32 %v969_v59, %v1149_v1 }
  0x55   :  { %v361_v5 = vmul.f32 %v972_v60, %v1149_v1  ;;  %v362_v6 = vmul.f32 %v973_v61, %v1149_v1  ;;  %v492_v8 = vadd.f32 %v1163_v7, %v357_v62  ;;  %v493_v9 = vadd.f32 %v1163_v7, %v358_v63  ;;  %v1108_v62 = vld [vmem:[%s1995_s0 + $0x198] sm:$0xff]  }
  0x56   :  { %v363_v10 = vmul.f32 %v976_v0, %v1149_v1  ;;  %v364_v11 = vmul.f32 %v977_v2, %v1149_v1  ;;  %v494_v12 = vadd.f32 %v1163_v7, %v359_v3  ;;  %v495_v13 = vadd.f32 %v1163_v7, %v360_v4 }
  0x57   :  { %v496_v14 = vadd.f32 %v1163_v7, %v361_v5  ;;  %v497_v15 = vadd.f32 %v1163_v7, %v362_v6  ;;  %v620_v17 = vmax.f32 %v492_v8, 0.0  ;;  %v621_v18 = vmax.f32 %v493_v9, 0.0  ;;  %v1792_v8 = vld [vmem:[%s1996_s1] ss:$0 sm:$0xff] }
  0x58   :  { %v498_v19 = vadd.f32 %v1163_v7, %v363_v10  ;;  %v499_v20 = vadd.f32 %v1163_v7, %v364_v11  ;;  %v622_v23 = vmax.f32 %v494_v12, 0.0  ;;  %v623_v24 = vmax.f32 %v495_v13, 0.0 }
  0x59   :  { %v624_v25 = vmax.f32 %v496_v14, 0.0  ;;  %v625_v26 = vmax.f32 %v497_v15, 0.0  ;;  %748 = vst [vmem:[%s1998_s3 + $0x280] sm:$0xff] %v620_v17  ;;  %749 = vst [vmem:[%s1998_s3 + $0x288] sm:$0xff] %v621_v18  ;;  %v980_v30 = vunpack.c.l.bf16 %v1101_v16  ;;  %v981_v31 = vunpack.c.h.bf16 %v1101_v16  ;;  %v1803_v17 = vld [vmem:[%s1997_s2] ss:$0 sm:$0xff] }
  0x5a   :  { %v626_v28 = vmax.f32 %v498_v19, 0.0  ;;  %v627_v29 = vmax.f32 %v499_v20, 0.0  ;;  %750 = vst [vmem:[%s1998_s3 + $0x290] sm:$0xff] %v622_v23  ;;  %751 = vst [vmem:[%s1998_s3 + $0x298] sm:$0xff] %v623_v24  ;;  %v984_v32 = vunpack.c.l.bf16 %v1102_v21  ;;  %v985_v33 = vunpack.c.h.bf16 %v1102_v21 }
  0x5b   :  { %752 = vst [vmem:[%s1998_s3 + $0x2a0] sm:$0xff] %v624_v25  ;;  %753 = vst [vmem:[%s1998_s3 + $0x2a8] sm:$0xff] %v625_v26  ;;  %v988_v34 = vunpack.c.l.bf16 %v1103_v22  ;;  %v989_v35 = vunpack.c.h.bf16 %v1103_v22  ;;  %v365_v36 = vmul.f32 %v980_v30, %v1149_v1  ;;  %v366_v37 = vmul.f32 %v981_v31, %v1149_v1  ;;  %v1109_v26 = vld [vmem:[%s1995_s0 + $0x1a0] sm:$0xff]   ;;  %v1110_v31 = vld [vmem:[%s1995_s0 + $0x1a8] sm:$0xff]  }
  0x5c   :  { %754 = vst [vmem:[%s1998_s3 + $0x2b0] sm:$0xff] %v626_v28  ;;  %755 = vst [vmem:[%s1998_s3 + $0x2b8] sm:$0xff] %v627_v29  ;;  %v992_v38 = vunpack.c.l.bf16 %v1104_v27  ;;  %v993_v39 = vunpack.c.h.bf16 %v1104_v27  ;;  %v367_v40 = vmul.f32 %v984_v32, %v1149_v1  ;;  %v368_v41 = vmul.f32 %v985_v33, %v1149_v1  ;;  %v1111_v32 = vld [vmem:[%s1995_s0 + $0x1b0] sm:$0xff]  }
  0x5d   :  { %v369_v42 = vmul.f32 %v988_v34, %v1149_v1  ;;  %v370_v43 = vmul.f32 %v989_v35, %v1149_v1  ;;  %v500_v44 = vadd.f32 %v1163_v7, %v365_v36  ;;  %v501_v45 = vadd.f32 %v1163_v7, %v366_v37  ;;  %v1112_v37 = vld [vmem:[%s1995_s0 + $0x1b8] sm:$0xff]  }
  0x5e   :  { %v371_v46 = vmul.f32 %v992_v38, %v1149_v1  ;;  %v372_v47 = vmul.f32 %v993_v39, %v1149_v1  ;;  %v502_v48 = vadd.f32 %v1163_v7, %v367_v40  ;;  %v503_v49 = vadd.f32 %v1163_v7, %v368_v41  ;;  %v1106_v1 = vld [vmem:[%s1995_s0 + $0x188] sm:$0xff]  }
  0x5f   :  { %v504_v50 = vadd.f32 %v1163_v7, %v369_v42  ;;  %v505_v51 = vadd.f32 %v1163_v7, %v370_v43  ;;  %v628_v53 = vmax.f32 %v500_v44, 0.0  ;;  %v629_v54 = vmax.f32 %v501_v45, 0.0 }
  0x60   :  { %v506_v55 = vadd.f32 %v1163_v7, %v371_v46  ;;  %v507_v56 = vadd.f32 %v1163_v7, %v372_v47  ;;  %v630_v58 = vmax.f32 %v502_v48, 0.0  ;;  %v631_v59 = vmax.f32 %v503_v49, 0.0 }
  0x61   :  { %v632_v60 = vmax.f32 %v504_v50, 0.0  ;;  %v633_v61 = vmax.f32 %v505_v51, 0.0  ;;  %756 = vst [vmem:[%s1998_s3 + $0x2c0] sm:$0xff] %v628_v53  ;;  %757 = vst [vmem:[%s1998_s3 + $0x2c8] sm:$0xff] %v629_v54  ;;  %v996_v0 = vunpack.c.l.bf16 %v1105_v52  ;;  %v997_v2 = vunpack.c.h.bf16 %v1105_v52 }
  0x62   :  { %v634_v7 = vmax.f32 %v506_v55, 0.0  ;;  %v635_v63 = vmax.f32 %v507_v56, 0.0  ;;  %758 = vst [vmem:[%s1998_s3 + $0x2d0] sm:$0xff] %v630_v58  ;;  %759 = vst [vmem:[%s1998_s3 + $0x2d8] sm:$0xff] %v631_v59  ;;  %v1000_v3 = vunpack.c.l.bf16 %v1106_v1  ;;  %v1001_v4 = vunpack.c.h.bf16 %v1106_v1 }
  0x63   :  { %760 = vst [vmem:[%s1998_s3 + $0x2e0] sm:$0xff] %v632_v60  ;;  %761 = vst [vmem:[%s1998_s3 + $0x2e8] sm:$0xff] %v633_v61  ;;  %v1004_v5 = vunpack.c.l.bf16 %v1107_v57  ;;  %v1005_v6 = vunpack.c.h.bf16 %v1107_v57  ;;  %v373_v9 = vmul.f32 %v1792_v8, %v996_v0  ;;  %v374_v10 = vmul.f32 %v1792_v8, %v997_v2  ;;  %v1113_v61 = vld [vmem:[%s1995_s0 + $0x1c0] sm:$0xff]   ;;  %v1114_v2 = vld [vmem:[%s1995_s0 + $0x1c8] sm:$0xff]  }
  0x64   :  { %762 = vst [vmem:[%s1998_s3 + $0x2f0] sm:$0xff] %v634_v7  ;;  %763 = vst [vmem:[%s1998_s3 + $0x2f8] sm:$0xff] %v635_v63  ;;  %v1008_v11 = vunpack.c.l.bf16 %v1108_v62  ;;  %v1009_v12 = vunpack.c.h.bf16 %v1108_v62  ;;  %v375_v13 = vmul.f32 %v1792_v8, %v1000_v3  ;;  %v376_v14 = vmul.f32 %v1792_v8, %v1001_v4  ;;  %v1115_v3 = vld [vmem:[%s1995_s0 + $0x1d0] sm:$0xff]  }
  0x65   :  { %v377_v15 = vmul.f32 %v1792_v8, %v1004_v5  ;;  %v378_v16 = vmul.f32 %v1792_v8, %v1005_v6  ;;  %v508_v18 = vadd.f32 %v1803_v17, %v373_v9  ;;  %v509_v19 = vadd.f32 %v1803_v17, %v374_v10  ;;  %v1116_v10 = vld [vmem:[%s1995_s0 + $0x1d8] sm:$0xff]  }
  0x66   :  { %v379_v20 = vmul.f32 %v1792_v8, %v1008_v11  ;;  %v380_v21 = vmul.f32 %v1792_v8, %v1009_v12  ;;  %v510_v22 = vadd.f32 %v1803_v17, %v375_v13  ;;  %v511_v23 = vadd.f32 %v1803_v17, %v376_v14 }
  0x67   :  { %v512_v24 = vadd.f32 %v1803_v17, %v377_v15  ;;  %v513_v25 = vadd.f32 %v1803_v17, %v378_v16  ;;  %v636_v27 = vmax.f32 %v508_v18, 0.0  ;;  %v637_v28 = vmax.f32 %v509_v19, 0.0 }
  0x68   :  { %v514_v29 = vadd.f32 %v1803_v17, %v379_v20  ;;  %v515_v30 = vadd.f32 %v1803_v17, %v380_v21  ;;  %v638_v33 = vmax.f32 %v510_v22, 0.0  ;;  %v639_v34 = vmax.f32 %v511_v23, 0.0 }
  0x69   :  { %v640_v35 = vmax.f32 %v512_v24, 0.0  ;;  %v641_v36 = vmax.f32 %v513_v25, 0.0  ;;  %764 = vst [vmem:[%s1998_s3 + $0x300] sm:$0xff] %v636_v27  ;;  %765 = vst [vmem:[%s1998_s3 + $0x308] sm:$0xff] %v637_v28  ;;  %v1012_v40 = vunpack.c.l.bf16 %v1109_v26  ;;  %v1013_v41 = vunpack.c.h.bf16 %v1109_v26 }
  0x6a   :  { %v642_v38 = vmax.f32 %v514_v29, 0.0  ;;  %v643_v39 = vmax.f32 %v515_v30, 0.0  ;;  %766 = vst [vmem:[%s1998_s3 + $0x310] sm:$0xff] %v638_v33  ;;  %767 = vst [vmem:[%s1998_s3 + $0x318] sm:$0xff] %v639_v34  ;;  %v1016_v42 = vunpack.c.l.bf16 %v1110_v31  ;;  %v1017_v43 = vunpack.c.h.bf16 %v1110_v31 }
  0x6b   :  { %768 = vst [vmem:[%s1998_s3 + $0x320] sm:$0xff] %v640_v35  ;;  %769 = vst [vmem:[%s1998_s3 + $0x328] sm:$0xff] %v641_v36  ;;  %v1020_v44 = vunpack.c.l.bf16 %v1111_v32  ;;  %v1021_v45 = vunpack.c.h.bf16 %v1111_v32  ;;  %v381_v46 = vmul.f32 %v1792_v8, %v1012_v40  ;;  %v382_v47 = vmul.f32 %v1792_v8, %v1013_v41  ;;  %v1117_v36 = vld [vmem:[%s1995_s0 + $0x1e0] sm:$0xff]   ;;  %v1118_v41 = vld [vmem:[%s1995_s0 + $0x1e8] sm:$0xff]  }
  0x6c   :  { %770 = vst [vmem:[%s1998_s3 + $0x330] sm:$0xff] %v642_v38  ;;  %771 = vst [vmem:[%s1998_s3 + $0x338] sm:$0xff] %v643_v39  ;;  %v1024_v48 = vunpack.c.l.bf16 %v1112_v37  ;;  %v1025_v49 = vunpack.c.h.bf16 %v1112_v37  ;;  %v383_v50 = vmul.f32 %v1792_v8, %v1016_v42  ;;  %v384_v51 = vmul.f32 %v1792_v8, %v1017_v43  ;;  %v1119_v42 = vld [vmem:[%s1995_s0 + $0x1f0] sm:$0xff]  }
  0x6d   :  { %v385_v52 = vmul.f32 %v1792_v8, %v1020_v44  ;;  %v386_v53 = vmul.f32 %v1792_v8, %v1021_v45  ;;  %v516_v54 = vadd.f32 %v1803_v17, %v381_v46  ;;  %v517_v55 = vadd.f32 %v1803_v17, %v382_v47  ;;  %v1120_v47 = vld [vmem:[%s1995_s0 + $0x1f8] sm:$0xff]  }
  0x6e   :  { %v387_v56 = vmul.f32 %v1792_v8, %v1024_v48  ;;  %v388_v1 = vmul.f32 %v1792_v8, %v1025_v49  ;;  %v518_v57 = vadd.f32 %v1803_v17, %v383_v50  ;;  %v519_v58 = vadd.f32 %v1803_v17, %v384_v51 }
  0x6f   :  { %v520_v59 = vadd.f32 %v1803_v17, %v385_v52  ;;  %v521_v60 = vadd.f32 %v1803_v17, %v386_v53  ;;  %v644_v62 = vmax.f32 %v516_v54, 0.0  ;;  %v645_v7 = vmax.f32 %v517_v55, 0.0 }
  0x70   :  { %v522_v63 = vadd.f32 %v1803_v17, %v387_v56  ;;  %v523_v0 = vadd.f32 %v1803_v17, %v388_v1  ;;  %v646_v4 = vmax.f32 %v518_v57, 0.0  ;;  %v647_v5 = vmax.f32 %v519_v58, 0.0 }
  0x71   :  { %v648_v6 = vmax.f32 %v520_v59, 0.0  ;;  %v649_v9 = vmax.f32 %v521_v60, 0.0  ;;  %772 = vst [vmem:[%s1998_s3 + $0x340] sm:$0xff] %v644_v62  ;;  %773 = vst [vmem:[%s1998_s3 + $0x348] sm:$0xff] %v645_v7  ;;  %v1028_v13 = vunpack.c.l.bf16 %v1113_v61  ;;  %v1029_v14 = vunpack.c.h.bf16 %v1113_v61 }
  0x72   :  { %v650_v11 = vmax.f32 %v522_v63, 0.0  ;;  %v651_v12 = vmax.f32 %v523_v0, 0.0  ;;  %774 = vst [vmem:[%s1998_s3 + $0x350] sm:$0xff] %v646_v4  ;;  %775 = vst [vmem:[%s1998_s3 + $0x358] sm:$0xff] %v647_v5  ;;  %v1032_v15 = vunpack.c.l.bf16 %v1114_v2  ;;  %v1033_v16 = vunpack.c.h.bf16 %v1114_v2 }
  0x73   :  { %776 = vst [vmem:[%s1998_s3 + $0x360] sm:$0xff] %v648_v6  ;;  %777 = vst [vmem:[%s1998_s3 + $0x368] sm:$0xff] %v649_v9  ;;  %v1036_v18 = vunpack.c.l.bf16 %v1115_v3  ;;  %v1037_v19 = vunpack.c.h.bf16 %v1115_v3  ;;  %v389_v20 = vmul.f32 %v1792_v8, %v1028_v13  ;;  %v390_v21 = vmul.f32 %v1792_v8, %v1029_v14 }
  0x74   :  { %778 = vst [vmem:[%s1998_s3 + $0x370] sm:$0xff] %v650_v11  ;;  %779 = vst [vmem:[%s1998_s3 + $0x378] sm:$0xff] %v651_v12  ;;  %v1040_v22 = vunpack.c.l.bf16 %v1116_v10  ;;  %v1041_v23 = vunpack.c.h.bf16 %v1116_v10  ;;  %v391_v24 = vmul.f32 %v1792_v8, %v1032_v15  ;;  %v392_v25 = vmul.f32 %v1792_v8, %v1033_v16 }
  0x75   :  { %v393_v26 = vmul.f32 %v1792_v8, %v1036_v18  ;;  %v394_v27 = vmul.f32 %v1792_v8, %v1037_v19  ;;  %v524_v28 = vadd.f32 %v1803_v17, %v389_v20  ;;  %v525_v29 = vadd.f32 %v1803_v17, %v390_v21 }
  0x76   :  { %v395_v30 = vmul.f32 %v1792_v8, %v1040_v22  ;;  %v396_v31 = vmul.f32 %v1792_v8, %v1041_v23  ;;  %v526_v32 = vadd.f32 %v1803_v17, %v391_v24  ;;  %v527_v33 = vadd.f32 %v1803_v17, %v392_v25 }
  0x77   :  { %v528_v34 = vadd.f32 %v1803_v17, %v393_v26  ;;  %v529_v35 = vadd.f32 %v1803_v17, %v394_v27  ;;  %v652_v37 = vmax.f32 %v524_v28, 0.0  ;;  %v653_v38 = vmax.f32 %v525_v29, 0.0 }
  0x78   :  { %v530_v39 = vadd.f32 %v1803_v17, %v395_v30  ;;  %v531_v40 = vadd.f32 %v1803_v17, %v396_v31  ;;  %v654_v43 = vmax.f32 %v526_v32, 0.0  ;;  %v655_v44 = vmax.f32 %v527_v33, 0.0 }
  0x79   :  { %v656_v45 = vmax.f32 %v528_v34, 0.0  ;;  %v657_v46 = vmax.f32 %v529_v35, 0.0  ;;  %780 = vst [vmem:[%s1998_s3 + $0x380] sm:$0xff] %v652_v37  ;;  %781 = vst [vmem:[%s1998_s3 + $0x388] sm:$0xff] %v653_v38  ;;  %v1044_v50 = vunpack.c.l.bf16 %v1117_v36  ;;  %v1045_v51 = vunpack.c.h.bf16 %v1117_v36 }
  0x7a   :  { %v658_v48 = vmax.f32 %v530_v39, 0.0  ;;  %v659_v49 = vmax.f32 %v531_v40, 0.0  ;;  %782 = vst [vmem:[%s1998_s3 + $0x390] sm:$0xff] %v654_v43  ;;  %783 = vst [vmem:[%s1998_s3 + $0x398] sm:$0xff] %v655_v44  ;;  %v1048_v52 = vunpack.c.l.bf16 %v1118_v41  ;;  %v1049_v53 = vunpack.c.h.bf16 %v1118_v41 }
  0x7b   :  { %784 = vst [vmem:[%s1998_s3 + $0x3a0] sm:$0xff] %v656_v45  ;;  %785 = vst [vmem:[%s1998_s3 + $0x3a8] sm:$0xff] %v657_v46  ;;  %v1052_v54 = vunpack.c.l.bf16 %v1119_v42  ;;  %v1053_v55 = vunpack.c.h.bf16 %v1119_v42  ;;  %v397_v56 = vmul.f32 %v1792_v8, %v1044_v50  ;;  %v398_v1 = vmul.f32 %v1792_v8, %v1045_v51 }
  0x7c   :  { %786 = vst [vmem:[%s1998_s3 + $0x3b0] sm:$0xff] %v658_v48  ;;  %787 = vst [vmem:[%s1998_s3 + $0x3b8] sm:$0xff] %v659_v49  ;;  %v1056_v57 = vunpack.c.l.bf16 %v1120_v47  ;;  %v1057_v58 = vunpack.c.h.bf16 %v1120_v47  ;;  %v399_v59 = vmul.f32 %v1792_v8, %v1048_v52  ;;  %v400_v60 = vmul.f32 %v1792_v8, %v1049_v53 }
  0x7d   :  { %v401_v61 = vmul.f32 %v1792_v8, %v1052_v54  ;;  %v402_v62 = vmul.f32 %v1792_v8, %v1053_v55  ;;  %v532_v7 = vadd.f32 %v1803_v17, %v397_v56  ;;  %v533_v63 = vadd.f32 %v1803_v17, %v398_v1 }
  0x7e   :  { %v403_v0 = vmul.f32 %v1792_v8, %v1056_v57  ;;  %v404_v2 = vmul.f32 %v1792_v8, %v1057_v58  ;;  %v534_v3 = vadd.f32 %v1803_v17, %v399_v59  ;;  %v535_v4 = vadd.f32 %v1803_v17, %v400_v60 }
  0x7f   :  { %v536_v5 = vadd.f32 %v1803_v17, %v401_v61  ;;  %v537_v6 = vadd.f32 %v1803_v17, %v402_v62  ;;  %v660_v9 = vmax.f32 %v532_v7, 0.0  ;;  %v661_v10 = vmax.f32 %v533_v63, 0.0 }
  0x80   :  { %v538_v11 = vadd.f32 %v1803_v17, %v403_v0  ;;  %v539_v12 = vadd.f32 %v1803_v17, %v404_v2  ;;  %v662_v13 = vmax.f32 %v534_v3, 0.0  ;;  %v663_v14 = vmax.f32 %v535_v4, 0.0 }
  0x81   :  { %v664_v15 = vmax.f32 %v536_v5, 0.0  ;;  %v665_v16 = vmax.f32 %v537_v6, 0.0  ;;  %788 = vst [vmem:[%s1998_s3 + $0x3c0] sm:$0xff] %v660_v9  ;;  %789 = vst [vmem:[%s1998_s3 + $0x3c8] sm:$0xff] %v661_v10 }
  0x82   :  { %v666_v8 = vmax.f32 %v538_v11, 0.0  ;;  %v667_v18 = vmax.f32 %v539_v12, 0.0  ;;  %790 = vst [vmem:[%s1998_s3 + $0x3d0] sm:$0xff] %v662_v13  ;;  %791 = vst [vmem:[%s1998_s3 + $0x3d8] sm:$0xff] %v663_v14 }
  0x83   :  { %792 = vst [vmem:[%s1998_s3 + $0x3e0] sm:$0xff] %v664_v15  ;;  %793 = vst [vmem:[%s1998_s3 + $0x3e8] sm:$0xff] %v665_v16 }
  0x84   :  { %794 = vst [vmem:[%s1998_s3 + $0x3f0] sm:$0xff] %v666_v8  ;;  %795 = vst [vmem:[%s1998_s3 + $0x3f8] sm:$0xff] %v667_v18 }

// kernel: double_conv_forward.3
= control target key start
LH: loop header
LB: loop body
LE: loop exit
PB: predicated region body
PF: predicated region fallthrough
CT: control target
= control target key end

     0   :  { %s2811_s27 = smov 0   ;;  %s2813_s28 = smov 0   ;;  %s4195_s0 = inlined_call_operand.vmem [shape: bf16[2,8,8,8,4], index: 0, kind: input, shape index: {}, may-alias: {0,1,2}]   ;;  %s4196_s1 = inlined_call_operand.vmem [shape: bf16[2,8,8,8,4], index: 1, kind: input, shape index: {}, may-alias: {0,1,2}]   ;;  %s4197_s2 = inlined_call_operand.vmem [shape: bf16[2,8,8,8,4], index: 2, kind: input, shape index: {}, may-alias: {0,1,2}]   ;;  %s4198_s3 = inlined_call_operand.vmem [shape: bf16[3,36,128], index: 3, kind: input, shape index: {}]   ;;  %s4199_s4 = inlined_call_operand.vmem [shape: f32[1,4], index: 4, kind: input, shape index: {}, may-alias: {4,5}]   ;;  %s4200_s5 = inlined_call_operand.vmem [shape: f32[1,4], index: 5, kind: input, shape index: {}, may-alias: {4,5}]   ;;  %s4201_s6 = inlined_call_operand.vmem [shape: bf16[2,8,8,8,128], index: 6, kind: output, shape index: {0}]   ;;  %s4202_s7 = inlined_call_operand.vmem [shape: f32[2,8,1,128], index: 7, kind: output, shape index: {1}]   ;;  %s4203_s8 = inlined_call_operand.vmem [shape: f32[2,8,1,128], index: 8, kind: output, shape index: {2}]  }
   0x1   :  { %s2815_s29 = smov 0   ;;  %s2817_s30 = smov 0  }
   0x2   :  { %s2819_s4 = smov 0  }
   0x3 LB: > { %s28_s5 = sadd.s32 1, %s2747_s29  ;;  %s31_s9 = sadd.s32 1, %s2751_s30  ;;  %s2755_s4 = sphi %s2819_s4, %s19_s4   ;;  %s2751_s30 = sphi %s2817_s30, %s4292_s30   ;;  %s2747_s29 = sphi %s2815_s29, %s4291_s29   ;;  %s2743_s28 = sphi %s2813_s28, %s4290_s28   ;;  %s2739_s27 = sphi %s2811_s27, %s4289_s27  }
   0x4   : > { %p29_p0 = scmp.ge.s32.totalorder %s28_s5, 8  ;;  %p2460_p1 = scmp.ge.s32.totalorder %s2755_s4, 1 }
   0x5   : > { %p347_p2 = scmp.lt.s32.totalorder %s2755_s4, 17 }
   0x6   : > { %s4294_s5 = smov (%p29_p0, %s28_s5), 0  ;;  %s4296_s9 = smov (!%p29_p0, %s31_s9), %s2751_s30 }
   0x7   : > { %p348_p3 = pnand %p2460_p1, %p347_p2  ;;  %p33_p4 = scmp.ge.s32.totalorder %s4296_s9, 2 }
   0x9   : > { %s4298_s9 = smov (%p33_p4, %s4296_s9), 0  ;;  %351 = sbr.rel (%p348_p3) target bundleno = 763 (0x2fb), region = 44 }
  0x10   : > { %vm595_vm0 = vcmask 1040384   ;;  %vm596_vm1 = vsmask.f32 256  ;;  %vm607_vm2 = vcmask 1044480   ;;  %v2757_v0 = vmov 0   ;;  %s2461_s10 = sadd.s32 4294967295, %s2739_s27 }
  0x11   : > { %v526_v1 = vrot.slane %v2757_v0, 7  ;;  %vm2845_vm3 = vmand %vm595_vm0, %vm596_vm1  ;;  %vm608_vm4 = vsmask.f32 4352  ;;  %p428_p5 = scmp.gt.s32.totalorder %s2461_s10, 0  ;;  %p430_p6 = scmp.lt.s32.totalorder %s2743_s28, 1  ;;  %vm1535_vm6 = vcmask 1041408  }
  0x12   : > { %vm2850_vm5 = vmand %vm607_vm2, %vm608_vm4  ;;  %p2462_p7 = scmp.lt.s32.totalorder %s2461_s10, 7  ;;  %s2758_s11 = smov 8   ;;  %vm1029_vm7 = vcmask 31744   ;;  %vm1046_vm8 = vcmask 64512   ;;  %vm1063_vm9 = vcmask 97280   ;;  %vm1080_vm10 = vcmask 130048  }
  0x13   : > { %v598_v4 = vsel %vm2845_vm3, 0, %v526_v1  ;;  %s4300_s10 = smov (!%p428_p5, %s2461_s10), 0  ;;  %s4302_s28 = smov (!%p430_p6, %s2743_s28), 1  ;;  %vm1097_vm11 = vcmask 162816   ;;  %vm1114_vm12 = vcmask 195584   ;;  %vm1131_vm13 = vcmask 228352  }
  0x14   : > { %v2859_v5 = vsel %vm2850_vm5, %v598_v4, 0  ;;  %s4304_s10 = smov (!%p2462_p7, %s4300_s10), 7  ;;  %p498_p8 = scmp.gt.s32.totalorder %s2739_s27, 0  ;;  %vm1148_vm14 = vcmask 261120   ;;  %vm1522_vm15 = vcmask 293888  }
  0x15   : > { %v4207_v6 = vrot.slane %v2859_v5, 1  ;;  %v821_v7 = vshrl.u32 %v2859_v5, 16  ;;  %v823_v8 = vshll.u32 %v2859_v5, 16  ;;  %s2467_s12 = sshll.u32 %s4304_s10, 3  ;;  %s2874_s13 = sshll.u32 %s4302_s28, 6 }
  0x16   : > { %s4204_s14 = smov 4   ;;  %s436_s16 = sadd.s32 %s2874_s13, %s2467_s12 }
  0x17   : > { %908 = vrot.lane.b32.xlu0 %v4207_v6, %s2758_s11  ;;  %v825_v9 = vrot.slane %v823_v8, 1  ;;  %s499_s15 = scalar_select %p498_p8, 1, 0 }
  0x18   : > { %s2469_s18 = sshll.u32 %s436_s16, 2  ;;  %p444_p10 = scmp.lt.s32.totalorder %s2739_s27, 7 }
  0x19   : > { %v2871_v10 = vor.u32 %v825_v9, %v821_v7  ;;  %s500_s17 = scvt.s32.f32 %s499_s15  ;;  %s438_s24 = scalar_lea.vmem %s4195_s0, %s2469_s18 }
  0x1a   : > { %v491_v11 = vld [vmem:[%s438_s24 + $0x4] sm:$0xf]  ;;  %v490_v12 = vld [vmem:[%s438_s24] sm:$0xf]  ;;  %v493_v13 = vld [vmem:[%s438_s24 + $0xc] sm:$0xf] }
  0x1b   : > { %876 = vrot.lane.b32.xlu0 %v2871_v10, %s4204_s14  ;;  %s503_s19 = sshrl.u32 %s500_s17, 16  ;;  %p502_p9 = scmp.ne.f32.partialorder %s500_s17, %s500_s17  ;;  %v492_v14 = vld [vmem:[%s438_s24 + $0x8] sm:$0xf]  ;;  %v495_v15 = vld [vmem:[%s438_s24 + $0x14] sm:$0xf] }
  0x1c   : > { %s504_s20 = sand.u32 1, %s503_s19  ;;  %v494_v16 = vld [vmem:[%s438_s24 + $0x10] sm:$0xf]  ;;  %v496_v17 = vld [vmem:[%s438_s24 + $0x18] sm:$0xf]  ;;  %s4228_s15 = smov 4  }
  0x1d   : > { %s505_s21 = sadd.s32 32767, %s504_s20  ;;  %v497_v18 = vld [vmem:[%s438_s24 + $0x1c] sm:$0xf]  ;;  %s2761_s19 = smov 16  }
  0x1e   : > { %s506_s25 = sadd.s32 %s505_s21, %s500_s17  ;;  %s2762_s24 = smov 20  }
  0x1f   : > { %s507_s26 = sand.u32 4294901760, %s506_s25  ;;  %s2763_s25 = smov 24  }
  0x20   : > { %s4306_s26 = smov (%p502_p9, %s507_s26), 2143289344  ;;  %s451_s22 = sadd.s32 1, %s2739_s27 }
  0x21   : > { %s510_s10 = sshrl.u32 %s4306_s26, 16  ;;  %p3203_p11 = scmp.lt.s32.totalorder %s451_s22, 7 }
  0x22   : > { %s511_s14 = sshll.u32 %s510_s10, 16 }
  0x23   : > { %s512_s12 = sor.u32 %s511_s14, %s510_s10  ;;  %s2760_s14 = smov 12  }
  0x24   : > { %v513_v19 = vstv %s512_s12  ;;  %s2994_s16 = scalar_select %p444_p10, %s2739_s27, 7 }
  0x25   : > { %v516_v20 = vmul.bf16 %v513_v19, %v491_v11  ;;  %v515_v21 = vmul.bf16 %v513_v19, %v490_v12  ;;  %v518_v22 = vmul.bf16 %v513_v19, %v493_v13  ;;  %v517_v23 = vmul.bf16 %v513_v19, %v492_v14  ;;  %s2764_s12 = smov 28   ;;  %s2765_s10 = smov 32  }
  0x26   : > { %v520_v24 = vmul.bf16 %v513_v19, %v495_v15  ;;  %v519_v25 = vmul.bf16 %v513_v19, %v494_v16  ;;  %v521_v26 = vmul.bf16 %v513_v19, %v496_v17  ;;  %v2882_v27 = vmul.bf16 %v513_v19, %v497_v18  ;;  %s2470_s17 = sshll.u32 %s2994_s16, 3  ;;  %s4308_s22 = smov (!%p3203_p11, %s451_s22), 7 }
  0x27   : > { %v538_v28 = vshrl.u32 %v516_v20, 16  ;;  %v541_v29 = vshll.u32 %v516_v20, 16  ;;  %v531_v30 = vshrl.u32 %v515_v21, 16  ;;  %v534_v31 = vshll.u32 %v515_v21, 16  ;;  %s3011_s18 = sadd.s32 %s2470_s17, %s2874_s13  ;;  %s4310_s22 = smov (!%p3203_p11, %s4308_s22), 7 }
  0x28   : > { %v552_v32 = vshrl.u32 %v518_v22, 16  ;;  %v555_v33 = vshll.u32 %v518_v22, 16  ;;  %v545_v34 = vshrl.u32 %v517_v23, 16  ;;  %v548_v35 = vshll.u32 %v517_v23, 16  ;;  %s4206_s20 = sshll.u32 %s3011_s18, 2 }
  0x29   : > { %v540_v36 = vrot.slane %v538_v28, 7  ;;  %v533_v37 = vrot.slane %v531_v30, 7  ;;  %v566_v38 = vshrl.u32 %v520_v24, 16  ;;  %v569_v39 = vshll.u32 %v520_v24, 16  ;;  %s3026_s23 = scalar_lea.vmem %s4196_s1, %s4206_s20 }
  0x2a   : > { %v554_v40 = vrot.slane %v552_v32, 7  ;;  %v547_v41 = vrot.slane %v545_v34, 7  ;;  %v559_v42 = vshrl.u32 %v519_v25, 16  ;;  %v562_v43 = vshll.u32 %v519_v25, 16  ;;  %s716_s17 = scalar_select %p444_p10, 1, 0 }
  0x2b   : > { %v543_v44 = vor.u32 %v541_v29, %v540_v36  ;;  %v536_v45 = vor.u32 %v534_v31, %v533_v37  ;;  %v568_v46 = vrot.slane %v566_v38, 7  ;;  %v573_v47 = vshrl.u32 %v521_v26, 16 }
  0x2c   : > { %v557_v48 = vor.u32 %v555_v33, %v554_v40  ;;  %v550_v49 = vor.u32 %v548_v35, %v547_v41  ;;  %v561_v50 = vrot.slane %v559_v42, 7  ;;  %v576_v51 = vshll.u32 %v521_v26, 16  ;;  %s3181_s21 = scvt.s32.f32 %s716_s17 }
  0x2d   : > { %v600_v52 = vsel %vm2845_vm3, 0, %v543_v44  ;;  %v599_v53 = vsel %vm2845_vm3, 0, %v536_v45  ;;  %v571_v54 = vor.u32 %v569_v39, %v568_v46  ;;  %v575_v55 = vrot.slane %v573_v47, 7  ;;  %v619_v47 = vld [vmem:[%s3026_s23] sm:$0xf] }
  0x2e   : > { %v2890_v56 = vsel %vm2850_vm5, %v600_v52, 0  ;;  %v2894_v57 = vsel %vm2850_vm5, %v599_v53, 0  ;;  %v602_v58 = vsel %vm2845_vm3, 0, %v557_v48  ;;  %v601_v59 = vsel %vm2845_vm3, 0, %v550_v49  ;;  %v621_v49 = vld [vmem:[%s3026_s23 + $0x8] sm:$0xf]  ;;  %p719_p12 = scmp.ne.f32.partialorder %s3181_s21, %s3181_s21 }
  0x2f   : > { %927 = vrot.lane.b32.xlu1 %v2890_v56, %s2760_s14  ;;  %925 = vrot.lane.b32.xlu0 %v2894_v57, %s2760_s14  ;;  %v2905_v60 = vrot.slane %v2890_v56, 1  ;;  %v901_v61 = vrot.slane %v2894_v57, 1  ;;  %v2910_v62 = vsel %vm2850_vm5, %v602_v58, 0  ;;  %v2914_v63 = vsel %vm2850_vm5, %v601_v59, 0  ;;  %v620_v53 = vld [vmem:[%s3026_s23 + $0x4] sm:$0xf] }
  0x30   : > { %v604_v0 = vsel %vm2845_vm3, 0, %v571_v54  ;;  %v564_v1 = vor.u32 %v562_v43, %v561_v50  ;;  %v578_v4 = vor.u32 %v576_v51, %v575_v55  ;;  %v2926_v8 = vrot.slane %v2910_v62, 1  ;;  %s720_s26 = sshrl.u32 %s3181_s21, 16 }
  0x31   : > { %v2929_v9 = vrot.slane %v2914_v63, 1  ;;  %v2933_v11 = vsel %vm2850_vm5, %v604_v0, 0  ;;  %v830_v12 = vshll.u32 %v2894_v57, 16  ;;  %v828_v16 = vshrl.u32 %v2894_v57, 16  ;;  %s721_s27 = sand.u32 1, %s720_s26 }
  0x32   : > { %v603_v7 = vsel %vm2845_vm3, 0, %v564_v1  ;;  %v605_v14 = vsel %vm2845_vm3, 0, %v578_v4  ;;  %v2943_v15 = vrot.slane %v2933_v11, 1  ;;  %v837_v17 = vshll.u32 %v2890_v56, 16  ;;  %s722_s20 = sadd.s32 32767, %s721_s27 }
  0x33   : > { %912 = vrot.lane.b32.xlu0 %v2905_v60, %s2758_s11  ;;  %910 = vrot.lane.b32.xlu1 %v901_v61, %s2758_s11  ;;  %v2938_v13 = vsel %vm2850_vm5, %v603_v7, 0  ;;  %v2956_v19 = vsel %vm2850_vm5, %v605_v14, 0  ;;  %v832_v20 = vrot.slane %v830_v12, 1  ;;  %v851_v21 = vshll.u32 %v2910_v62, 16  ;;  %v2709_v12 = vld [vmem:[%s4198_s3 + $0x8] sm:$0xff]   ;;  %s723_s26 = sadd.s32 %s722_s20, %s3181_s21  ;;  %s2476_s20 = sshll.u32 %s4310_s22, 3 }
  0x34   : > { %v2952_v18 = vrot.slane %v2938_v13, 1  ;;  %v2960_v22 = vrot.slane %v2956_v19, 1  ;;  %v835_v23 = vshrl.u32 %v2890_v56, 16  ;;  %v839_v24 = vrot.slane %v837_v17, 1  ;;  %s724_s27 = sand.u32 4294901760, %s723_s26  ;;  %s460_s21 = sadd.s32 %s2476_s20, %s2874_s13 }
  0x35   : > { %v849_v25 = vshrl.u32 %v2910_v62, 16  ;;  %v833_v26 = vor.u32 %v832_v20, %v828_v16  ;;  %v853_v28 = vrot.slane %v851_v21, 1  ;;  %v844_v29 = vshll.u32 %v2914_v63, 16  ;;  %v2710_v21 = vld [vmem:[%s4198_s3 + $0x10] ss:$0 sps:$4 sm:$0x33]  }
  0x36   : > { %v865_v30 = vshll.u32 %v2933_v11, 16  ;;  %v2970_v31 = vor.u32 %v839_v24, %v835_v23  ;;  %v842_v32 = vshrl.u32 %v2914_v63, 16  ;;  %v863_v33 = vshrl.u32 %v2933_v11, 16  ;;  %s4312_s27 = smov (%p719_p12, %s724_s27), 2143289344  ;;  %s2478_s22 = sshll.u32 %s460_s21, 2 }
  0x37   : > { %916 = vrot.lane.b32.xlu0 %v2926_v8, %s2758_s11  ;;  %914 = vrot.lane.b32.xlu1 %v2929_v9, %s2758_s11  ;;  %v2977_v34 = vor.u32 %v853_v28, %v849_v25  ;;  %v846_v35 = vrot.slane %v844_v29, 1  ;;  %v858_v37 = vshll.u32 %v2938_v13, 16  ;;  %v856_v38 = vshrl.u32 %v2938_v13, 16  ;;  %s727_s17 = sshrl.u32 %s4312_s27, 16  ;;  %s3268_s20 = scalar_lea.vmem %s4197_s2, %s2478_s22 }
  0x38   : > { %v867_v36 = vrot.slane %v865_v30, 1  ;;  %v872_v42 = vshll.u32 %v2956_v19, 16  ;;  %v870_v44 = vshrl.u32 %v2956_v19, 16  ;;  %v628_v48 = vshrl.u32 %v619_v47, 16  ;;  %s728_s26 = sshll.u32 %s727_s17, 16 }
  0x39   : > { %v2986_v39 = vor.u32 %v846_v35, %v842_v32  ;;  %v860_v41 = vrot.slane %v858_v37, 1  ;;  %v631_v51 = vshll.u32 %v619_v47, 16  ;;  %v642_v52 = vshrl.u32 %v621_v49, 16  ;;  %s729_s21 = sor.u32 %s728_s26, %s727_s17 }
  0x3a   : > { %v2988_v40 = vor.u32 %v867_v36, %v863_v33  ;;  %v874_v45 = vrot.slane %v872_v42, 1  ;;  %v630_v50 = vrot.slane %v628_v48, 7  ;;  %v645_v58 = vshll.u32 %v621_v49, 16  ;;  %v622_v42 = vld [vmem:[%s3026_s23 + $0xc] sm:$0xf] }
  0x3b   : > { %920 = vrot.lane.b32.xlu0 %v2943_v15, %s2758_s11  ;;  %918 = vrot.lane.b32.xlu1 %v2952_v18, %s2758_s11  ;;  %v3000_v43 = vor.u32 %v860_v41, %v856_v38  ;;  %v644_v55 = vrot.slane %v642_v52, 7  ;;  %v635_v59 = vshrl.u32 %v620_v53, 16  ;;  %v638_v7 = vshll.u32 %v620_v53, 16 }
  0x3c   : > { %v3008_v46 = vor.u32 %v874_v45, %v870_v44  ;;  %v633_v54 = vor.u32 %v631_v51, %v630_v50  ;;  %v1652_v25 = vsel %vm1535_vm6, %v2710_v21, 0  ;;  %v580_v38 = vshrl.u32 %v2882_v27, 16 }
  0x3d   : > { %v647_v1 = vor.u32 %v645_v58, %v644_v55  ;;  %v637_v4 = vrot.slane %v635_v59, 7  ;;  %v583_v41 = vshll.u32 %v2882_v27, 16  ;;  %v649_v47 = vshrl.u32 %v622_v42, 16 }
  0x3e   : > { %v691_v0 = vsel %vm2845_vm3, 0, %v633_v54  ;;  %v652_v49 = vshll.u32 %v622_v42, 16 }
  0x3f   : > { %922 = vrot.lane.b32.xlu1 %v2960_v22, %s2758_s11  ;;  %878 = vrot.lane.b32.xlu0 %v833_v26, %s4228_s15  ;;  %v3062_v14 = vsel %vm2850_vm5, %v691_v0, 0  ;;  %v693_v16 = vsel %vm2845_vm3, 0, %v647_v1  ;;  %v640_v17 = vor.u32 %v638_v7, %v637_v4  ;;  %v651_v48 = vrot.slane %v649_v47, 7 }
  0x40   : > { %4229 = vst [vmem:[#allocation2_spill] sm:$0xff] %v3062_v14  ;;  %v1173_v20 = vshll.u32 %v3062_v14, 16  ;;  %v3076_v23 = vsel %vm2850_vm5, %v693_v16, 0 }
  0x41   : > { %4230 = vst [vmem:[#allocation3_spill] sm:$0xff] %v3076_v23  ;;  %v692_v24 = vsel %vm2845_vm3, 0, %v640_v17  ;;  %v1187_v29 = vshll.u32 %v3076_v23, 16  ;;  %v1185_v32 = vshrl.u32 %v3076_v23, 16  ;;  %v3129_v44 = vrot.slane %v3076_v23, 1 }
  0x42   : > { %v1175_v28 = vrot.slane %v1173_v20, 1  ;;  %v3090_v30 = vsel %vm2850_vm5, %v692_v24, 0  ;;  %v654_v51 = vor.u32 %v652_v49, %v651_v48  ;;  %v707_v48 = vld [vmem:[%s3268_s20] sm:$0xf]  ;;  %v3275_v49 = vstv %s729_s21 }
  0x43   : > { %880 = vrot.lane.b32.xlu1 %v2970_v31, %s4228_s15  ;;  %884 = vrot.lane.b32.xlu0 %v2977_v34, %s4228_s15  ;;  %4231 = vst [vmem:[#allocation4_spill] sm:$0xff] %v3090_v30  ;;  %v1189_v33 = vrot.slane %v1187_v29, 1  ;;  %v1178_v35 = vshrl.u32 %v3090_v30, 16  ;;  %v3116_v37 = vrot.slane %v3090_v30, 1 }
  0x44   : > { %v694_v53 = vsel %vm2845_vm3, 0, %v654_v51 }
  0x45   : > { %v3159_v54 = vsel %vm2850_vm5, %v694_v53, 0 }
  0x46   : > { %4232 = vst [vmem:[#allocation5_spill] sm:$0xff] %v3159_v54  ;;  %v1194_v0 = vshll.u32 %v3159_v54, 16  ;;  %v1192_v7 = vshrl.u32 %v3159_v54, 16 }
  0x47   : > { %882 = vrot.lane.b32.xlu1 %v2986_v39, %s4228_s15  ;;  %888 = vrot.lane.b32.xlu0 %v2988_v40, %s4228_s15 }
  0x4b   : > { %886 = vrot.lane.b32.xlu1 %v3000_v43, %s4228_s15  ;;  %929 = vrot.lane.b32.xlu0 %v2914_v63, %s2760_s14 }
  0x4f   : > { %890 = vrot.lane.b32.xlu1 %v3008_v46, %s4228_s15  ;;  %948 = vrot.lane.b32.xlu0 %v833_v26, %s2761_s19  ;;  %v1171_v26 = vshrl.u32 %v3062_v14, 16 }
  0x53   : > { %931 = vrot.lane.b32.xlu1 %v2910_v62, %s2760_s14  ;;  %952 = vrot.lane.b32.xlu0 %v2986_v39, %s2761_s19 }
  0x57   : > { %950 = vrot.lane.b32.xlu1 %v2970_v31, %s2761_s19  ;;  %965 = vrot.lane.b32.xlu0 %v901_v61, %s2762_s24  ;;  %v2708_v61 = vld [vmem:[%s4198_s3] sm:$0xff]  }
  0x58   : > { %2605 = vmatprep.subr.bf16.mxu0 %v2708_v61 }
  0x59   : > { %2606 = vmatpush3.bf16.msra.mxu0 %v2708_v61 }
  0x5a   : > { %2607 = vmatprep.subr.bf16.mxu0 %v2709_v12 }
  0x5b   : > { %954 = vrot.lane.b32.xlu1 %v2977_v34, %s2761_s19  ;;  %969 = vrot.lane.b32.xlu0 %v2929_v9, %s2762_s24 }
  0x5d   : > { %2608 = vmatpush3.bf16.msra.mxu0 %v2709_v12 }
  0x5e   : > { %2656 = vmatprep.subr.msk.bf16.mxu0 %vm1535_vm6, %v2710_v21 }
  0x5f   : > { %967 = vrot.lane.b32.xlu1 %v2905_v60, %s2762_s24  ;;  %981 = vrot.lane.b32.xlu0 %v2890_v56, %s2763_s25 }
  0x61   : > { %2610 = vmatpush3.bf16.msra.mxu0 %v1652_v25 }
  0x63   : > { %971 = vrot.lane.b32.xlu1 %v2926_v8, %s2762_s24  ;;  %985 = vrot.lane.b32.xlu0 %v2910_v62, %s2763_s25 }
  0x67   : > { %983 = vrot.lane.b32.xlu1 %v2914_v63, %s2763_s25  ;;  %997 = vrot.lane.b32.xlu0 %v2970_v31, %s2764_s12  ;;  %v1176_v31 = vor.u32 %v1175_v28, %v1171_v26 }
  0x6b   : > { %987 = vrot.lane.b32.xlu1 %v2938_v13, %s2763_s25  ;;  %1001 = vrot.lane.b32.xlu0 %v2977_v34, %s2764_s12  ;;  %v3101_v34 = vor.u32 %v1189_v33, %v1185_v32  ;;  %v623_v33 = vld [vmem:[%s3026_s23 + $0x10] sm:$0xf] }
  0x6c   : > { %v659_v42 = vshll.u32 %v623_v33, 16 }
  0x6f   : > { %999 = vrot.lane.b32.xlu1 %v2986_v39, %s2764_s12  ;;  %1013 = vrot.lane.b32.xlu0 %v2905_v60, %s2765_s10  ;;  %v1180_v60 = vshll.u32 %v3090_v30, 16  ;;  %v582_v39 = vrot.slane %v580_v38, 7 }
  0x71   : > { %v1182_v36 = vrot.slane %v1180_v60, 1  ;;  %v585_v45 = vor.u32 %v583_v41, %v582_v39  ;;  %v3246_v60 = vrot.slane %v3159_v54, 1 }
  0x73   : > { %1003 = vrot.lane.b32.xlu1 %v3000_v43, %s2764_s12  ;;  %1017 = vrot.lane.b32.xlu0 %v2926_v8, %s2765_s10  ;;  %v3108_v8 = vor.u32 %v1182_v36, %v1178_v35  ;;  %v606_v27 = vsel %vm2845_vm3, 0, %v585_v45 }
  0x74   : > { %v3143_v50 = vsel %vm2850_vm5, %v606_v27, 0 }
  0x75   : > { %v942_v58 = vshrl.u32 %v3143_v50, 16  ;;  %v4208_v26 = vrot.slane %v3143_v50, 1 }
  0x77   : > { %1015 = vrot.lane.b32.xlu1 %v2929_v9, %s2765_s10  ;;  %1219 = vrot.lane.b32.xlu0 %v1176_v31, %s4228_s15  ;;  %v1240_v9 = vrot.slane %v3062_v14, 1 }
  0x7b   : > { %1019 = vrot.lane.b32.xlu1 %v2952_v18, %s2765_s10  ;;  %1223 = vrot.lane.b32.xlu0 %v3101_v34, %s4228_s15 }
  0x7f   : > { %1221 = vrot.lane.b32.xlu1 %v3108_v8, %s4228_s15  ;;  %933 = vrot.lane.b32.xlu0 %v2938_v13, %s2760_s14 }
  0x83   : > { %1247 = vrot.lane.b32.xlu1 %v1240_v9, %s2758_s11  ;;  %1249 = vrot.lane.b32.xlu0 %v3116_v37, %s2758_s11 }
  0x87   : > { %935 = vrot.lane.b32.xlu1 %v2933_v11, %s2760_s14  ;;  %1262 = vrot.lane.b32.xlu0 %v3062_v14, %s2760_s14 }
  0x89   : > { %v3149_v52 = vpop.permute.xlu0 %908 }
  0x8b   : > { %1251 = vrot.lane.b32.xlu1 %v3129_v44, %s2758_s11  ;;  %937 = vrot.lane.b32.xlu0 %v2956_v19, %s2760_s14 }
  0x8d   : > { %v3165_v55 = vpop.permute.xlu0 %876 }
  0x8f   : > { %1264 = vrot.lane.b32.xlu1 %v3090_v30, %s2760_s14  ;;  %956 = vrot.lane.b32.xlu0 %v3000_v43, %s2761_s19  ;;  %v944_v43 = vshll.u32 %v3143_v50, 16 }
  0x91   : > { %v946_v59 = vrot.slane %v944_v43, 1  ;;  %v732_v43 = vmul.bf16 %v3275_v49, %v707_v48 }
  0x93   : > { %939 = vrot.lane.b32.xlu1 %v3143_v50, %s2760_s14  ;;  %1266 = vrot.lane.b32.xlu0 %v3076_v23, %s2760_s14  ;;  %v3174_v61 = vor.u32 %v946_v59, %v942_v58  ;;  %v625_v58 = vld [vmem:[%s3026_s23 + $0x18] sm:$0xf]  ;;  %v744_v48 = vshll.u32 %v732_v43, 16 }
  0x97   : > { %958 = vrot.lane.b32.xlu1 %v2988_v40, %s2761_s19  ;;  %1285 = vrot.lane.b32.xlu0 %v1176_v31, %s2761_s19 }
  0x9b   : > { %1268 = vrot.lane.b32.xlu1 %v3159_v54, %s2760_s14  ;;  %960 = vrot.lane.b32.xlu0 %v3008_v46, %s2761_s19 }
  0x9f   : > { %1287 = vrot.lane.b32.xlu1 %v3108_v8, %s2761_s19  ;;  %973 = vrot.lane.b32.xlu0 %v2952_v18, %s2762_s24  ;;  %v1196_v18 = vrot.slane %v1194_v0, 1 }
  0xa1   : > { %v3177_v1 = vpop.permute.xlu1 %927  ;;  %v3179_v4 = vpop.permute.xlu0 %925  ;;  %v3197_v17 = vor.u32 %v1196_v18, %v1192_v7  ;;  %v741_v18 = vshrl.u32 %v732_v43, 16 }
  0xa3   : > { %962 = vrot.lane.b32.xlu1 %v3174_v61, %s2761_s19  ;;  %1289 = vrot.lane.b32.xlu0 %v3101_v34, %s2761_s19 }
  0xa5   : > { %v3188_v12 = vpop.permute.xlu0 %912  ;;  %v3190_v16 = vpop.permute.xlu1 %910 }
  0xa7   : > { %975 = vrot.lane.b32.xlu1 %v2943_v15, %s2762_s24  ;;  %1302 = vrot.lane.b32.xlu0 %v1240_v9, %s2762_s24  ;;  %v656_v9 = vshrl.u32 %v623_v33, 16  ;;  %v624_v33 = vld [vmem:[%s3026_s23 + $0x14] sm:$0xf] }
  0xa9   : > { %v3199_v20 = vpop.permute.xlu0 %916  ;;  %v3201_v21 = vpop.permute.xlu1 %914  ;;  %v658_v41 = vrot.slane %v656_v9, 7  ;;  %v670_v9 = vshrl.u32 %v625_v58, 16 }
  0xab   : > { %1291 = vrot.lane.b32.xlu1 %v3197_v17, %s2761_s19  ;;  %977 = vrot.lane.b32.xlu0 %v2960_v22, %s2762_s24  ;;  %v661_v27 = vor.u32 %v659_v42, %v658_v41  ;;  %v709_v41 = vld [vmem:[%s3268_s20 + $0x8] sm:$0xf]  ;;  %v672_v6 = vrot.slane %v670_v9, 7 }
  0xad   : > { %v3211_v24 = vpop.permute.xlu0 %920  ;;  %v3213_v25 = vpop.permute.xlu1 %918  ;;  %v695_v53 = vsel %vm2845_vm3, 0, %v661_v27  ;;  %v743_v27 = vrot.slane %v741_v18, 7 }
  0xae   : > { %4234 = vst [vmem:[#allocation6_spill] sm:$0xff] %v3211_v24  ;;  %v3295_v59 = vsel %vm2850_vm5, %v695_v53, 0  ;;  %v734_v53 = vmul.bf16 %v3275_v49, %v709_v41  ;;  %v708_v24 = vld [vmem:[%s3268_s20 + $0x4] sm:$0xf] }
  0xaf   : > { %1304 = vrot.lane.b32.xlu1 %v3116_v37, %s2762_s24  ;;  %989 = vrot.lane.b32.xlu0 %v2933_v11, %s2763_s25  ;;  %4236 = vst [vmem:[#allocation8_spill] sm:$0xff] %v3295_v59  ;;  %v746_v18 = vor.u32 %v744_v48, %v743_v27  ;;  %v733_v9 = vmul.bf16 %v3275_v49, %v708_v24 }
  0xb0   : > { %v755_v43 = vshrl.u32 %v734_v53, 16 }
  0xb1   : > { %v3225_v28 = vpop.permute.xlu1 %922  ;;  %v3227_v29 = vpop.permute.xlu0 %878 }
  0xb2   : > { %4235 = vst [vmem:[#allocation7_spill] sm:$0xff] %v3225_v28 }
  0xb3   : > { %979 = vrot.lane.b32.xlu1 %v4208_v26, %s2762_s24  ;;  %1306 = vrot.lane.b32.xlu0 %v3129_v44, %s2762_s24  ;;  %v673_v26 = vshll.u32 %v625_v58, 16  ;;  %v2711_v58 = vld [vmem:[%s4198_s3 + $0x14] sm:$0xff]  }
  0xb4   : > { %2591 = vmatprep.subr.bf16.mxu1 %v2711_v58 }
  0xb5   : > { %v3236_v31 = vpop.permute.xlu1 %880  ;;  %v3238_v32 = vpop.permute.xlu0 %884  ;;  %v675_v41 = vor.u32 %v673_v26, %v672_v6  ;;  %v804_v6 = vsel %vm2845_vm3, 0, %v746_v18  ;;  %v758_v26 = vshll.u32 %v734_v53, 16  ;;  %2592 = vmatpush3.bf16.msra.mxu1 %v2711_v58  ;;  %v2713_v58 = vld [vmem:[%s4198_s3 + $0x24] ss:$0 sps:$4 sm:$0x33]  }
  0xb6   : > { %v3350_v24 = vsel %vm2850_vm5, %v804_v6, 0 }
  0xb7   : > { %991 = vrot.lane.b32.xlu1 %v2956_v19, %s2763_s25  ;;  %1318 = vrot.lane.b32.xlu0 %v3090_v30, %s2763_s25  ;;  %v666_v30 = vshll.u32 %v624_v33, 16  ;;  %v697_v48 = vsel %vm2845_vm3, 0, %v675_v41  ;;  %4237 = vst [vmem:[#allocation9_spill] sm:$0xff] %v3350_v24  ;;  %v4239_v41 = vrot.slane %v3143_v50, 1 }
  0xb9   : > { %v3248_v35 = vpop.permute.xlu1 %882  ;;  %v3250_v36 = vpop.permute.xlu0 %888 }
  0xbb   : > { %1308 = vrot.lane.b32.xlu1 %v3246_v60, %s2762_s24  ;;  %993 = vrot.lane.b32.xlu0 %v3143_v50, %s2763_s25 }
  0xbd   : > { %v3257_v38 = vpop.permute.xlu1 %886  ;;  %v3259_v39 = vpop.permute.xlu0 %929 }
  0xbf   : > { %1320 = vrot.lane.b32.xlu1 %v3076_v23, %s2763_s25  ;;  %1005 = vrot.lane.b32.xlu0 %v2988_v40, %s2764_s12 }
  0xc1   : > { %v3270_v45 = vpop.permute.xlu1 %890  ;;  %v3272_v47 = vpop.permute.xlu0 %948 }
  0xc3   : > { %995 = vrot.lane.b32.xlu1 %v2859_v5, %s2763_s25  ;;  %1322 = vrot.lane.b32.xlu0 %v3159_v54, %s2763_s25 }
  0xc5   : > { %v3281_v40 = vpop.permute.xlu1 %931  ;;  %v3283_v51 = vpop.permute.xlu0 %952 }
  0xc7   : > { %1007 = vrot.lane.b32.xlu1 %v3008_v46, %s2764_s12  ;;  %1332 = vrot.lane.b32.xlu0 %v3108_v8, %s2764_s12  ;;  %v663_v46 = vshrl.u32 %v624_v33, 16 }
  0xc9   : > { %v3297_v0 = vpop.permute.xlu1 %950  ;;  %v3299_v7 = vpop.permute.xlu0 %965  ;;  %v665_v54 = vrot.slane %v663_v46, 7 }
  0xcb   : > { %1324 = vrot.lane.b32.xlu1 %v3295_v59, %s2763_s25  ;;  %1009 = vrot.lane.b32.xlu0 %v3174_v61, %s2764_s12  ;;  %v1201_v61 = vshll.u32 %v3295_v59, 16  ;;  %v668_v33 = vor.u32 %v666_v30, %v665_v54  ;;  %v2712_v54 = vld [vmem:[%s4198_s3 + $0x1c] sm:$0xff]  }
  0xcc   : > { %2593 = vmatprep.subr.bf16.mxu1 %v2712_v54 }
  0xcd   : > { %v3307_v8 = vpop.permute.xlu1 %954  ;;  %v3309_v42 = vpop.permute.xlu0 %969  ;;  %v696_v53 = vsel %vm2845_vm3, 0, %v668_v33  ;;  %2594 = vmatpush3.bf16.msra.mxu1 %v2712_v54  ;;  %v1537_v54 = vsel %vm1535_vm6, %v2713_v58, 0 }
  0xce   : > { %2655 = vmatprep.subr.msk.bf16.mxu1 %vm1535_vm6, %v2713_v58 }
  0xcf   : > { %1334 = vrot.lane.b32.xlu1 %v3101_v34, %s2764_s12  ;;  %1021 = vrot.lane.b32.xlu0 %v2943_v15, %s2765_s10  ;;  %v1199_v15 = vshrl.u32 %v3295_v59, 16  ;;  %v1203_v34 = vrot.slane %v1201_v61, 1  ;;  %v748_v61 = vshrl.u32 %v733_v9, 16 }
  0xd1   : > { %v3317_v23 = vpop.permute.xlu1 %967  ;;  %v3319_v28 = vpop.permute.xlu0 %981  ;;  %v3343_v30 = vor.u32 %v1203_v34, %v1199_v15  ;;  %v1722_v15 = vshll.u32 %v3350_v24, 16  ;;  %v3370_v34 = vsel %vm2850_vm5, %v696_v53, 0  ;;  %v750_v6 = vrot.slane %v748_v61, 7  ;;  %2596 = vmatpush3.bf16.msra.mxu1 %v1537_v54 }
  0xd2   : > { %4240 = vst [vmem:[#allocation11_spill] sm:$0xff] %v3370_v34  ;;  %v1208_v53 = vshll.u32 %v3370_v34, 16  ;;  %v1031_v61 = vsel %vm1029_vm7, %v2859_v5, %v3165_v55 }
  0xd3   : > { %1011 = vrot.lane.b32.xlu1 %v2871_v10, %s2764_s12  ;;  %1336 = vrot.lane.b32.xlu0 %v3197_v17, %s2764_s12  ;;  %v757_v10 = vrot.slane %v755_v43, 7 }
  0xd5   : > { %v3331_v46 = vpop.permute.xlu1 %971  ;;  %v3333_v27 = vpop.permute.xlu0 %985  ;;  %v760_v43 = vor.u32 %v758_v26, %v757_v10  ;;  %v751_v10 = vshll.u32 %v733_v9, 16  ;;  %v1033_v9 = vsel %vm1029_vm7, %v2894_v57, %v3227_v29 }
  0xd6   : > { %v1050_v29 = vsel %vm1046_vm8, %v1033_v9, %v3190_v16  ;;  %v1037_v9 = vsel %vm1029_vm7, %v2914_v63, %v3248_v35 }
  0xd7   : > { %1023 = vrot.lane.b32.xlu1 %v2960_v22, %s2765_s10  ;;  %1346 = vrot.lane.b32.xlu0 %v3116_v37, %s2765_s10  ;;  %v3360_v37 = vsel %vm2850_vm5, %v697_v48, 0  ;;  %v806_v50 = vsel %vm2845_vm3, 0, %v760_v43  ;;  %v1720_v43 = vshrl.u32 %v3350_v24, 16  ;;  %v753_v55 = vor.u32 %v751_v10, %v750_v6 }
  0xd8   : > { %4238 = vst [vmem:[#allocation10_spill] sm:$0xff] %v3360_v37  ;;  %v1215_v33 = vshll.u32 %v3360_v37, 16  ;;  %v1213_v58 = vshrl.u32 %v3360_v37, 16  ;;  %v3399_v14 = vsel %vm2850_vm5, %v806_v50, 0  ;;  %v4242_v6 = vrot.slane %v2859_v5, 1 }
  0xd9   : > { %v3354_v18 = vpop.permute.xlu1 %983  ;;  %v3356_v22 = vpop.permute.xlu0 %997  ;;  %4241 = vst [vmem:[#allocation12_spill] sm:$0xff] %v3399_v14  ;;  %v3417_v50 = vrot.slane %v3295_v59, 1 }
  0xda   : > { %v1217_v54 = vrot.slane %v1215_v33, 1  ;;  %v1210_v33 = vrot.slane %v1208_v53, 1  ;;  %v805_v53 = vsel %vm2845_vm3, 0, %v753_v55 }
  0xdb   : > { %1338 = vrot.lane.b32.xlu1 %v3343_v30, %s2764_s12  ;;  %1025 = vrot.lane.b32.xlu0 %v4239_v41, %s2765_s10  ;;  %v1724_v41 = vrot.slane %v1722_v15, 1  ;;  %v1206_v15 = vshrl.u32 %v3370_v34, 16 }
  0xdc   : > { %v3419_v16 = vor.u32 %v1217_v54, %v1213_v58 }
  0xdd   : > { %v3376_v26 = vpop.permute.xlu1 %987  ;;  %v3378_v48 = vpop.permute.xlu0 %1001  ;;  %v3413_v10 = vor.u32 %v1724_v41, %v1720_v43  ;;  %v1067_v43 = vsel %vm1063_vm9, %v1050_v29, %v3177_v1 }
  0xde   : > { %v1084_v55 = vsel %vm1080_vm10, %v1067_v43, %v3297_v0 }
  0xdf   : > { %1348 = vrot.lane.b32.xlu1 %v3129_v44, %s2765_s10  ;;  %1225 = vrot.lane.b32.xlu0 %v3197_v17, %s4228_s15  ;;  %v3403_v17 = vsel %vm1046_vm8, %v1031_v61, %v3149_v52  ;;  %v1736_v52 = vshll.u32 %v3399_v14, 16  ;;  %v1035_v61 = vsel %vm1029_vm7, %v2890_v56, %v3236_v31  ;;  %v1101_v63 = vsel %vm1097_vm11, %v1084_v55, %v3317_v23 }
  0xe0   : > { %v1065_v5 = vsel %vm1063_vm9, %v3403_v17, %v3179_v4  ;;  %v3438_v4 = vor.u32 %v1210_v33, %v1206_v15  ;;  %v3451_v31 = vsel %vm2850_vm5, %v805_v53, 0  ;;  %v1052_v35 = vsel %vm1046_vm8, %v1035_v61, %v3188_v12 }
  0xe1   : > { %v1000_v57 = vpop.permute.xlu1 %999  ;;  %v1014_v44 = vpop.permute.xlu0 %1013  ;;  %v1082_v54 = vsel %vm1080_vm10, %v1065_v5, %v3272_v47  ;;  %v1738_v1 = vrot.slane %v1736_v52, 1  ;;  %4243 = vst [vmem:[#allocation13_spill] sm:$0xff] %v3451_v31  ;;  %v1054_v47 = vsel %vm1046_vm8, %v1037_v9, %v3201_v21  ;;  %v1118_v0 = vsel %vm1114_vm12, %v1101_v63, %v3354_v18 }
  0xe2   : > { %v1099_v56 = vsel %vm1097_vm11, %v1082_v54, %v3299_v7  ;;  %v1069_v7 = vsel %vm1063_vm9, %v1052_v35, %v3259_v39  ;;  %v1071_v29 = vsel %vm1063_vm9, %v1054_v47, %v3281_v40  ;;  %v1135_v12 = vsel %vm1131_vm13, %v1118_v0, %v1000_v57  ;;  %v626_v35 = vld [vmem:[%s3026_s23 + $0x1c] sm:$0xf] }
  0xe3   : > { %1027 = vrot.lane.b32.xlu1 %v4242_v6, %s2765_s10  ;;  %1350 = vrot.lane.b32.xlu0 %v3246_v60, %s2765_s10  ;;  %v1734_v6 = vshrl.u32 %v3399_v14, 16  ;;  %v1116_v23 = vsel %vm1114_vm12, %v1099_v56, %v3319_v28  ;;  %v1086_v21 = vsel %vm1080_vm10, %v1069_v7, %v3283_v51  ;;  %v1088_v28 = vsel %vm1080_vm10, %v1071_v29, %v3307_v8 }
  0xe4   : > { %v1133_v15 = vsel %vm1131_vm13, %v1116_v23, %v3356_v22  ;;  %v1103_v40 = vsel %vm1097_vm11, %v1086_v21, %v3309_v42  ;;  %v1105_v22 = vsel %vm1097_vm11, %v1088_v28, %v3331_v46  ;;  %v1729_v57 = vshll.u32 %v3451_v31, 16 }
  0xe5   : > { %v1004_v41 = vpop.permute.xlu1 %1003  ;;  %v1018_v58 = vpop.permute.xlu0 %1017  ;;  %v1150_v18 = vsel %vm1148_vm14, %v1133_v15, %v1014_v44  ;;  %v1120_v8 = vsel %vm1114_vm12, %v1103_v40, %v3333_v27  ;;  %v1122_v44 = vsel %vm1114_vm12, %v1105_v22, %v3376_v26  ;;  %v3501_v27 = vor.u32 %v1738_v1, %v1734_v6  ;;  %v710_v15 = vld [vmem:[%s3268_s20 + $0xc] sm:$0xf] }
  0xe6   : > { %v1137_v42 = vsel %vm1131_vm13, %v1120_v8, %v3378_v48  ;;  %v1139_v46 = vsel %vm1131_vm13, %v1122_v44, %v1004_v41  ;;  %v1727_v26 = vshrl.u32 %v3451_v31, 16  ;;  %v1731_v48 = vrot.slane %v1729_v57, 1 }
  0xe7   : > { %1227 = vrot.lane.b32.xlu1 %v3343_v30, %s4228_s15  ;;  %1768 = vrot.lane.b32.xlu0 %v3413_v10, %s4228_s15  ;;  %v1154_v61 = vsel %vm1148_vm14, %v1137_v42, %v1018_v58  ;;  %v3516_v55 = vrot.slane %v3370_v34, 1  ;;  %v3538_v47 = vrot.slane %v3360_v37, 1  ;;  %v3541_v23 = vrot.slane %v3451_v31, 1 }
  0xe8   : > { %v3513_v54 = vor.u32 %v1731_v48, %v1727_v26  ;;  %v677_v29 = vshrl.u32 %v626_v35, 16  ;;  %v680_v28 = vshll.u32 %v626_v35, 16 }
  0xe9   : > { %v1016_v33 = vpop.permute.xlu1 %1015  ;;  %v3468_v52 = vpop.permute.xlu0 %1219 }
  0xea   : > { %v1152_v39 = vsel %vm1148_vm14, %v1135_v12, %v1016_v33  ;;  %v679_v21 = vrot.slane %v677_v29, 7 }
  0xeb   : > { %1352 = vrot.lane.b32.xlu1 %v3417_v50, %s2765_s10  ;;  %1231 = vrot.lane.b32.xlu0 %v3419_v16, %s4228_s15  ;;  %v2500_v51 = vcombine.low %v1150_v18, %v1152_v39  ;;  %v735_v18 = vmul.bf16 %v3275_v49, %v710_v15  ;;  %v3562_v39 = vrot.slane %v3399_v14, 1 }
  0xed   : > { %v1020_v53 = vpop.permute.xlu1 %1019  ;;  %2611 = vmatprep.mubr.msk.bf16.mxu0 %vm1522_vm15, %v2500_v51  ;;  %v3493_v5 = vpop.permute.xlu0 %1223  ;;  %4248 = vst [vmem:[#allocation18_spill] sm:$0xff] %v3562_v39  ;;  %v682_v51 = vor.u32 %v680_v28, %v679_v21  ;;  %v762_v57 = vshrl.u32 %v735_v18, 16 }
  0xee   : > { %4244 = vst [vmem:[#allocation14_spill] sm:$0xff] %v3493_v5  ;;  %v1156_v9 = vsel %vm1148_vm14, %v1139_v46, %v1020_v53  ;;  %v765_v53 = vshll.u32 %v735_v18, 16  ;;  %v712_v5 = vld [vmem:[%s3268_s20 + $0x14] sm:$0xf] }
  0xef   : > { %v2501_v43 = vcombine.low %v1154_v61, %v1156_v9  ;;  %1229 = vrot.lane.b32.xlu1 %v3438_v4, %s4228_s15  ;;  %1255 = vrot.lane.b32.xlu0 %v3417_v50, %s2758_s11  ;;  %v698_v42 = vsel %vm2845_vm3, 0, %v682_v51  ;;  %v764_v46 = vrot.slane %v762_v57, 7 }
  0xf0   : > { %v3584_v61 = vsel %vm2850_vm5, %v698_v42, 0 }
  0xf1   : > { %v3504_v41 = vpop.permute.xlu1 %1221  ;;  %2612 = vmatmul.mubr.msk.bf16.vlgmr.msra.gmra.mrb[0].mxu0 %vm1522_vm15, %v2501_v43  ;;  %v3507_v58 = vpop.permute.xlu0 %933  ;;  %v767_v26 = vor.u32 %v765_v53, %v764_v46  ;;  %v1281_v29 = vshll.u32 %v3584_v61, 16  ;;  %v1279_v18 = vshrl.u32 %v3584_v61, 16 }
  0xf2   : > { %4245 = vst [vmem:[#allocation15_spill] sm:$0xff] %v3504_v41  ;;  %v713_v41 = vld [vmem:[%s3268_s20 + $0x18] sm:$0xf] }
  0xf3   : > { %1253 = vrot.lane.b32.xlu1 %v3246_v60, %s2758_s11  ;;  %1772 = vrot.lane.b32.xlu0 %v3501_v27, %s4228_s15  ;;  %v4213_v60 = vrot.slane %v3350_v24, 1  ;;  %v1283_v51 = vrot.slane %v1281_v29, 1 }
  0xf5   : > { %v3518_v6 = vpop.permute.xlu1 %1247  ;;  %v3520_v56 = vpop.permute.xlu0 %1249  ;;  %v3626_v42 = vor.u32 %v1283_v51, %v1279_v18  ;;  %v4253_v18 = vrot.slane %v3350_v24, 1 }
  0xf6   : > { %4246 = vst [vmem:[#allocation16_spill] sm:$0xff] %v3520_v56 }
  0xf7   : > { %1770 = vrot.lane.b32.xlu1 %v3513_v54, %s4228_s15  ;;  %1257 = vrot.lane.b32.xlu0 %v3516_v55, %s2758_s11 }
  0xf9   : > { %v3527_v63 = vpop.permute.xlu1 %935  ;;  %v3529_v1 = vpop.permute.xlu0 %1262 }
  0xfb   : > { %1796 = vrot.lane.b32.xlu1 %v4213_v60, %s2758_s11  ;;  %1270 = vrot.lane.b32.xlu0 %v3295_v59, %s2760_s14 }
  0xfd   : > { %v3543_v0 = vpop.permute.xlu1 %1251  ;;  %v3545_v7 = vpop.permute.xlu0 %937 }
  0xfe   : > { %4247 = vst [vmem:[#allocation17_spill] sm:$0xff] %v3543_v0 }
  0xff   : > { %1259 = vrot.lane.b32.xlu1 %v3538_v47, %s2758_s11  ;;  %1798 = vrot.lane.b32.xlu0 %v3541_v23, %s2758_s11 }
 0x101   : > { %v3552_v12 = vpop.permute.xlu1 %1264  ;;  %v3554_v33 = vpop.permute.xlu0 %956 }
 0x103   : > { %1272 = vrot.lane.b32.xlu1 %v3370_v34, %s2760_s14  ;;  %1811 = vrot.lane.b32.xlu0 %v3350_v24, %s2760_s14 }
 0x105   : > { %v3564_v40 = vpop.permute.xlu1 %939  ;;  %v3566_v22 = vpop.permute.xlu0 %1266 }
 0x106   : > { %4249 = vst [vmem:[#allocation19_spill] sm:$0xff] %v3566_v22 }
 0x107   : > { %1800 = vrot.lane.b32.xlu1 %v3562_v39, %s2758_s11  ;;  %1274 = vrot.lane.b32.xlu0 %v3360_v37, %s2760_s14 }
 0x109   : > { %v3572_v8 = vpop.permute.xlu1 %958  ;;  %v3574_v44 = vpop.permute.xlu0 %1285 }
 0x10b   : > { %1813 = vrot.lane.b32.xlu1 %v3451_v31, %s2760_s14  ;;  %1293 = vrot.lane.b32.xlu0 %v3343_v30, %s2761_s19  ;;  %v807_v30 = vsel %vm2845_vm3, 0, %v767_v26 }
 0x10c   : > { %v3607_v15 = vsel %vm2850_vm5, %v807_v30, 0 }
 0x10d   : > { %v3586_v9 = vpop.permute.xlu1 %1268  ;;  %v3588_v43 = vpop.permute.xlu0 %960  ;;  %v1743_v46 = vshll.u32 %v3607_v15, 16  ;;  %v1741_v30 = vshrl.u32 %v3607_v15, 16 }
 0x10e   : > { %4250 = vst [vmem:[#allocation20_spill] sm:$0xff] %v3586_v9 }
 0x10f   : > { %1276 = vrot.lane.b32.xlu1 %v3584_v61, %s2760_s14  ;;  %1815 = vrot.lane.b32.xlu0 %v3399_v14, %s2760_s14  ;;  %v1745_v29 = vrot.slane %v1743_v46, 1 }
 0x111   : > { %v3594_v48 = vpop.permute.xlu1 %1287  ;;  %v3596_v35 = vpop.permute.xlu0 %973  ;;  %v3647_v51 = vor.u32 %v1745_v29, %v1741_v30  ;;  %v4217_v30 = vrot.slane %v3584_v61, 1 }
 0x113   : > { %1295 = vrot.lane.b32.xlu1 %v3438_v4, %s2761_s19  ;;  %1834 = vrot.lane.b32.xlu0 %v3413_v10, %s2761_s19 }
 0x115   : > { %v3609_v21 = vpop.permute.xlu1 %962  ;;  %v3611_v28 = vpop.permute.xlu0 %1289 }
 0x116   : > { %4251 = vst [vmem:[#allocation21_spill] sm:$0xff] %v3611_v28  ;;  %v711_v28 = vld [vmem:[%s3268_s20 + $0x10] sm:$0xf] }
 0x117   : > { %1817 = vrot.lane.b32.xlu1 %v3607_v15, %s2760_s14  ;;  %1297 = vrot.lane.b32.xlu0 %v3419_v16, %s2761_s19  ;;  %v736_v24 = vmul.bf16 %v3275_v49, %v711_v28 }
 0x119   : > { %v3618_v10 = vpop.permute.xlu1 %975  ;;  %v3620_v57 = vpop.permute.xlu0 %1302 }
 0x11b   : > { %1836 = vrot.lane.b32.xlu1 %v3513_v54, %s2761_s19  ;;  %1310 = vrot.lane.b32.xlu0 %v3417_v50, %s2762_s24 }
 0x11d   : > { %v3629_v53 = vpop.permute.xlu1 %1291  ;;  %v3631_v26 = vpop.permute.xlu0 %977 }
 0x11e   : > { %4252 = vst [vmem:[#allocation22_spill] sm:$0xff] %v3629_v53 }
 0x11f   : > { %1299 = vrot.lane.b32.xlu1 %v3626_v42, %s2761_s19  ;;  %1838 = vrot.lane.b32.xlu0 %v3501_v27, %s2761_s19 }
 0x121   : > { %v3638_v60 = vpop.permute.xlu1 %1304  ;;  %v3640_v50 = vpop.permute.xlu0 %989 }
 0x123   : > { %1312 = vrot.lane.b32.xlu1 %v3516_v55, %s2762_s24  ;;  %1851 = vrot.lane.b32.xlu0 %v4253_v18, %s2762_s24 }
 0x125   : > { %v3649_v59 = vpop.permute.xlu1 %979  ;;  %v3651_v53 = vpop.permute.xlu0 %1306 }
 0x126   : > { %4254 = vst [vmem:[#allocation23_spill] sm:$0xff] %v3651_v53  ;;  %v769_v53 = vshrl.u32 %v736_v24, 16 }
 0x127   : > { %1840 = vrot.lane.b32.xlu1 %v3647_v51, %s2761_s19  ;;  %1314 = vrot.lane.b32.xlu0 %v3538_v47, %s2762_s24 }
 0x128   : > { %v771_v0 = vrot.slane %v769_v53, 7 }
 0x129   : > { %v3658_v46 = vpop.permute.xlu1 %991  ;;  %v3660_v9 = vpop.permute.xlu0 %1318 }
 0x12b   : > { %1853 = vrot.lane.b32.xlu1 %v3541_v23, %s2762_s24  ;;  %1326 = vrot.lane.b32.xlu0 %v3370_v34, %s2763_s25  ;;  %v772_v34 = vshll.u32 %v736_v24, 16 }
 0x12d   : > { %v3668_v29 = vpop.permute.xlu1 %1308  ;;  %v3670_v18 = vpop.permute.xlu0 %993 }
 0x12e   : > { %4255 = vst [vmem:[#allocation24_spill] sm:$0xff] %v3668_v29  ;;  %v3684_v29 = vrot.slane %v3607_v15, 1 }
 0x12f   : > { %1316 = vrot.lane.b32.xlu1 %v4217_v30, %s2762_s24  ;;  %1855 = vrot.lane.b32.xlu0 %v3562_v39, %s2762_s24  ;;  %v774_v39 = vor.u32 %v772_v34, %v771_v0 }
 0x130   : > { %4256 = vst [vmem:[#allocation25_spill] sm:$0xff] %v3684_v29 }
 0x131   : > { %v3677_v28 = vpop.permute.xlu1 %1320  ;;  %v1006_v22 = vpop.permute.xlu0 %1005 }
 0x133   : > { %1328 = vrot.lane.b32.xlu1 %v3360_v37, %s2763_s25  ;;  %1867 = vrot.lane.b32.xlu0 %v3451_v31, %s2763_s25  ;;  %v808_v31 = vsel %vm2845_vm3, 0, %v774_v39  ;;  %v738_v37 = vmul.bf16 %v3275_v49, %v713_v41  ;;  %v737_v41 = vmul.bf16 %v3275_v49, %v712_v5 }
 0x134   : > { %v3706_v34 = vsel %vm2850_vm5, %v808_v31, 0  ;;  %v1041_v31 = vsel %vm1029_vm7, %v2938_v13, %v3257_v38 }
 0x135   : > { %v3686_v56 = vpop.permute.xlu1 %995  ;;  %v3688_v30 = vpop.permute.xlu0 %1322 }
 0x136   : > { %4257 = vst [vmem:[#allocation26_spill] sm:$0xff] %v3688_v30  ;;  %v783_v30 = vshrl.u32 %v738_v37, 16 }
 0x137   : > { %1857 = vrot.lane.b32.xlu1 %v3684_v29, %s2762_s24  ;;  %1330 = vrot.lane.b32.xlu0 %v3584_v61, %s2763_s25 }
 0x139   : > { %v1008_v24 = vpop.permute.xlu1 %1007  ;;  %v3695_v53 = vpop.permute.xlu0 %1332 }
 0x13b   : > { %1869 = vrot.lane.b32.xlu1 %v3399_v14, %s2763_s25  ;;  %1342 = vrot.lane.b32.xlu0 %v3419_v16, %s2764_s12  ;;  %v1039_v16 = vsel %vm1029_vm7, %v2910_v62, %v3238_v32  ;;  %v1058_v62 = vsel %vm1046_vm8, %v1041_v31, %v3213_v25  ;;  %v776_v32 = vshrl.u32 %v737_v41, 16 }
 0x13c   : > { %v1075_v38 = vsel %vm1063_vm9, %v1058_v62, %v3527_v63  ;;  %v1750_v63 = vshll.u32 %v3706_v34, 16 }
 0x13d   : > { %v3708_v0 = vpop.permute.xlu1 %1324  ;;  %v3710_v29 = vpop.permute.xlu0 %1009 }
 0x13e   : > { %4258 = vst [vmem:[#allocation27_spill] sm:$0xff] %v3708_v0  ;;  %4259 = vst [vmem:[#allocation28_spill] sm:$0xff] %v3710_v29  ;;  %v785_v0 = vrot.slane %v783_v30, 7  ;;  %v786_v29 = vshll.u32 %v738_v37, 16 }
 0x13f   : > { %1340 = vrot.lane.b32.xlu1 %v3438_v4, %s2764_s12  ;;  %1873 = vrot.lane.b32.xlu0 %v3706_v34, %s2763_s25  ;;  %v1056_v4 = vsel %vm1046_vm8, %v1039_v16, %v3199_v20  ;;  %v1092_v20 = vsel %vm1080_vm10, %v1075_v38, %v3572_v8 }
 0x140   : > { %v1073_v13 = vsel %vm1063_vm9, %v1056_v4, %v3507_v58  ;;  %v788_v30 = vor.u32 %v786_v29, %v785_v0  ;;  %v1109_v58 = vsel %vm1097_vm11, %v1092_v20, %v3618_v10  ;;  %v778_v10 = vrot.slane %v776_v32, 7 }
 0x141   : > { %v3724_v39 = vpop.permute.xlu1 %1334  ;;  %v1022_v14 = vpop.permute.xlu0 %1021  ;;  %v779_v29 = vshll.u32 %v737_v41, 16  ;;  %v4260_v41 = vld [vmem:[#allocation2_spill] sm:$0xff] }
 0x142   : > { %v810_v31 = vsel %vm2845_vm3, 0, %v788_v30  ;;  %v1361_v4 = vsel %vm1029_vm7, %v4260_v41, %v3468_v52 }
 0x143   : > { %1871 = vrot.lane.b32.xlu1 %v3607_v15, %s2763_s25  ;;  %1883 = vrot.lane.b32.xlu0 %v3501_v27, %s2764_s12  ;;  %v1090_v27 = vsel %vm1080_vm10, %v1073_v13, %v3554_v33  ;;  %v3758_v33 = vld [vmem:[%s4198_s3 + $0x28] sm:$0xff]   ;;  %v781_v52 = vor.u32 %v779_v29, %v778_v10 }
 0x144   : > { %v1107_v25 = vsel %vm1097_vm11, %v1090_v27, %v3596_v35  ;;  %v1126_v35 = vsel %vm1114_vm12, %v1109_v58, %v3658_v46  ;;  %2619 = vmatprep.subr.bf16.mxu0 %v3758_v33  ;;  %2633 = vmatprep.subr.bf16.mxu1 %v3758_v33  ;;  %v1045_v46 = vsel %vm1029_vm7, %v2956_v19, %v3270_v45  ;;  %v1752_v19 = vrot.slane %v1750_v63, 1  ;;  %v4262_v27 = vld [vmem:[#allocation7_spill] sm:$0xff] }
 0x145   : > { %v3738_v37 = vpop.permute.xlu1 %1011  ;;  %v3740_v5 = vpop.permute.xlu0 %1336  ;;  %v1124_v8 = vsel %vm1114_vm12, %v1107_v25, %v3640_v50  ;;  %v1143_v0 = vsel %vm1131_vm13, %v1126_v35, %v1008_v24  ;;  %v1043_v50 = vsel %vm1029_vm7, %v2933_v11, %v3250_v36  ;;  %2620 = vmatpush3.bf16.msra.mxu0 %v3758_v33  ;;  %v1748_v11 = vshrl.u32 %v3706_v34, 16 }
 0x146   : > { %v1375_v36 = vsel %vm1046_vm8, %v1361_v4, %v3518_v6  ;;  %v3796_v45 = vsel %vm2850_vm5, %v810_v31, 0  ;;  %v4261_v6 = vld [vmem:[#allocation6_spill] sm:$0xff]  ;;  %v1062_v20 = vsel %vm1046_vm8, %v1045_v46, %v4262_v27 }
 0x147   : > { %1881 = vrot.lane.b32.xlu1 %v3513_v54, %s2764_s12  ;;  %1354 = vrot.lane.b32.xlu0 %v3516_v55, %s2765_s10  ;;  %v1141_v54 = vsel %vm1131_vm13, %v1124_v8, %v1006_v22  ;;  %v1391_v32 = vsel %vm1063_vm9, %v1375_v36, %v3552_v12  ;;  %v1060_v30 = vsel %vm1046_vm8, %v1043_v50, %v4261_v6  ;;  %v4266_v36 = vld [vmem:[#allocation3_spill] sm:$0xff]  ;;  %v4269_v27 = vld [vmem:[#allocation18_spill] sm:$0xff] }
 0x148   : > { %v1158_v22 = vsel %vm1148_vm14, %v1141_v54, %v1022_v14  ;;  %v3790_v14 = vld [vmem:[%s4198_s3 + $0x30] sm:$0xff]   ;;  %v3824_v63 = vor.u32 %v1752_v19, %v1748_v11  ;;  %v1079_v8 = vsel %vm1063_vm9, %v1062_v20, %v3564_v40  ;;  %v4265_v19 = vld [vmem:[#allocation14_spill] sm:$0xff] }
 0x149   : > { %v1024_v55 = vpop.permute.xlu1 %1023  ;;  %v1347_v16 = vpop.permute.xlu0 %1346  ;;  %2621 = vmatprep.subr.bf16.mxu0 %v3790_v14  ;;  %v4270_v20 = vld [vmem:[#allocation16_spill] sm:$0xff] }
 0x14a   : > { %v1160_v24 = vsel %vm1148_vm14, %v1143_v0, %v1024_v55  ;;  %2622 = vmatpush3.bf16.msra.mxu0 %v3790_v14  ;;  %v714_v55 = vld [vmem:[%s3268_s20 + $0x1c] sm:$0xf] }
 0x14b   : > { %v2502_v62 = vcombine.low %v1158_v22, %v1160_v24  ;;  %1344 = vrot.lane.b32.xlu1 %v3626_v42, %s2764_s12  ;;  %1885 = vrot.lane.b32.xlu0 %v3647_v51, %s2764_s12  ;;  %v1389_v42 = vsel %vm1063_vm9, %v3403_v17, %v3529_v1  ;;  %v1407_v1 = vsel %vm1080_vm10, %v1391_v32, %v3594_v48  ;;  %v3830_v48 = vld [vmem:[%s4198_s3 + $0x38] ss:$0 sps:$4 sm:$0x33]   ;;  %v1762_v24 = vshrl.u32 %v3796_v45, 16  ;;  %v4268_v32 = vld [vmem:[#allocation4_spill] sm:$0xff] }
 0x14c   : > { %v1405_v25 = vsel %vm1080_vm10, %v1389_v42, %v3574_v44  ;;  %v1423_v58 = vsel %vm1097_vm11, %v1407_v1, %v3638_v60  ;;  %v1764_v44 = vshll.u32 %v3796_v45, 16  ;;  %2657 = vmatprep.subr.msk.bf16.mxu0 %vm1535_vm6, %v3830_v48  ;;  %v739_v11 = vmul.bf16 %v3275_v49, %v714_v55  ;;  %v4267_v42 = vld [vmem:[#allocation15_spill] sm:$0xff] }
 0x14d   : > { %v3803_v13 = vpop.permute.xlu1 %1338  ;;  %2615 = vmatprep.mubr.msk.bf16.mxu0 %vm1522_vm15, %v2502_v62  ;;  %v1026_v38 = vpop.permute.xlu0 %1025  ;;  %v1421_v12 = vsel %vm1097_vm11, %v1405_v25, %v3620_v57  ;;  %v1077_v57 = vsel %vm1063_vm9, %v1060_v30, %v3545_v7  ;;  %v1363_v6 = vsel %vm1029_vm7, %v4268_v32, %v4267_v42  ;;  %v4271_v25 = vld [vmem:[#allocation17_spill] sm:$0xff] }
 0x14e   : > { %v1437_v60 = vsel %vm1114_vm12, %v1421_v12, %v3660_v9  ;;  %v3852_v9 = vsel %vm1535_vm6, %v3830_v48, 0  ;;  %v1094_v40 = vsel %vm1080_vm10, %v1077_v57, %v3588_v43  ;;  %v4263_v43 = vrot.slane %v3584_v61, 1  ;;  %v4272_v12 = vld [vmem:[#allocation19_spill] sm:$0xff] }
 0x14f   : > { %1356 = vrot.lane.b32.xlu1 %v3538_v47, %s2765_s10  ;;  %1895 = vrot.lane.b32.xlu0 %v3541_v23, %s2765_s10  ;;  %v1439_v47 = vsel %vm1114_vm12, %v1423_v58, %v3677_v28  ;;  %v809_v23 = vsel %vm2845_vm3, 0, %v781_v52  ;;  %v1452_v35 = vsel %vm1131_vm13, %v1437_v60, %v3695_v53  ;;  %v1096_v28 = vsel %vm1080_vm10, %v1079_v8, %v3609_v21 }
 0x150   : > { %v1454_v10 = vsel %vm1131_vm13, %v1439_v47, %v3724_v39  ;;  %v1467_v53 = vsel %vm1148_vm14, %v1452_v35, %v1347_v16  ;;  %2624 = vmatpush3.bf16.msra.mxu0 %v3852_v9  ;;  %v1111_v54 = vsel %vm1097_vm11, %v1094_v40, %v3631_v26  ;;  %v1113_v0 = vsel %vm1097_vm11, %v1096_v28, %v3649_v59  ;;  %v4264_v59 = vld [vmem:[#allocation28_spill] sm:$0xff]  ;;  %v4275_v35 = vld [vmem:[#allocation22_spill] sm:$0xff]  ;;  %v4276_v28 = vld [vmem:[#allocation23_spill] sm:$0xff] }
 0x151   : > { %v1349_v7 = vpop.permute.xlu1 %1348  ;;  %v3846_v29 = vpop.permute.xlu0 %1225  ;;  %v1128_v16 = vsel %vm1114_vm12, %v1111_v54, %v3670_v18  ;;  %v1130_v31 = vsel %vm1114_vm12, %v1113_v0, %v3686_v56  ;;  %v3877_v26 = vsel %vm2850_vm5, %v809_v23, 0  ;;  %v3887_v18 = vrot.slane %v3706_v34, 1  ;;  %v4274_v23 = vld [vmem:[#allocation21_spill] sm:$0xff] }
 0x152   : > { %v1469_v39 = vsel %vm1148_vm14, %v1454_v10, %v1349_v7  ;;  %v1145_v50 = vsel %vm1131_vm13, %v1128_v16, %v4264_v59  ;;  %v1147_v46 = vsel %vm1131_vm13, %v1130_v31, %v3738_v37  ;;  %v1766_v62 = vrot.slane %v1764_v44, 1  ;;  %v4273_v44 = vld [vmem:[#allocation20_spill] sm:$0xff]  ;;  %v4279_v16 = vld [vmem:[#allocation27_spill] sm:$0xff] }
 0x153   : > { %1887 = vrot.lane.b32.xlu1 %v3824_v63, %s2764_s12  ;;  %1358 = vrot.lane.b32.xlu0 %v4263_v43, %s2765_s10  ;;  %v2489_v21 = vcombine.low %v1467_v53, %v1469_v39  ;;  %v1162_v41 = vsel %vm1148_vm14, %v1145_v50, %v1026_v38  ;;  %v1365_v52 = vsel %vm1029_vm7, %v4266_v36, %v4265_v19  ;;  %v1757_v38 = vshll.u32 %v3877_v26, 16  ;;  %v4277_v39 = vld [vmem:[#allocation24_spill] sm:$0xff] }
 0x154   : > { %v1377_v49 = vsel %vm1046_vm8, %v1363_v6, %v4270_v20  ;;  %v1379_v1 = vsel %vm1046_vm8, %v1365_v52, %v4271_v25  ;;  %v3918_v7 = vor.u32 %v1766_v62, %v1762_v24  ;;  %v1755_v40 = vshrl.u32 %v3877_v26, 16  ;;  %v4280_v62 = vld [vmem:[#allocation25_spill] sm:$0xff]  ;;  %v4281_v52 = vld [vmem:[#allocation8_spill] sm:$0xff] }
 0x155   : > { %v3883_v61 = vpop.permute.xlu1 %1027  ;;  %2597 = vmatprep.mubr.msk.bf16.mxu1 %vm1522_vm15, %v2489_v21  ;;  %v1351_v22 = vpop.permute.xlu0 %1350  ;;  %v1393_v58 = vsel %vm1063_vm9, %v1377_v49, %v4272_v12  ;;  %v1395_v57 = vsel %vm1063_vm9, %v1379_v1, %v4273_v44  ;;  %v1759_v0 = vrot.slane %v1757_v38, 1  ;;  %v790_v43 = vshrl.u32 %v739_v11, 16  ;;  %v4278_v21 = vld [vmem:[#allocation26_spill] sm:$0xff] }
 0x156   : > { %v1164_v4 = vsel %vm1148_vm14, %v1147_v46, %v3883_v61  ;;  %v1409_v8 = vsel %vm1080_vm10, %v1393_v58, %v4274_v23  ;;  %v1411_v10 = vsel %vm1080_vm10, %v1395_v57, %v4275_v35  ;;  %v3955_v6 = vrot.slane %v3796_v45, 1 }
 0x157   : > { %v2503_v30 = vcombine.low %v1162_v41, %v1164_v4  ;;  %1897 = vrot.lane.b32.xlu1 %v4269_v27, %s2765_s10  ;;  %1776 = vrot.lane.b32.xlu0 %v3824_v63, %s4228_s15  ;;  %v1425_v53 = vsel %vm1097_vm11, %v1409_v8, %v4276_v28  ;;  %v1427_v54 = vsel %vm1097_vm11, %v1411_v10, %v4277_v39  ;;  %v792_v36 = vrot.slane %v790_v43, 7  ;;  %v4285_v10 = vld [vmem:[#allocation10_spill] sm:$0xff]  ;;  %v4286_v28 = vld [vmem:[#allocation13_spill] sm:$0xff] }
 0x158   : > { %v1441_v55 = vsel %vm1114_vm12, %v1425_v53, %v4278_v21  ;;  %v1443_v31 = vsel %vm1114_vm12, %v1427_v54, %v4279_v16  ;;  %v3943_v19 = vor.u32 %v1759_v0, %v1755_v40  ;;  %v3968_v49 = vrot.slane %v3877_v26, 1 }
 0x159   : > { %v1228_v60 = vpop.permute.xlu1 %1227  ;;  %2616 = vmatmul.mubr.msk.bf16.gmra.mrb[4].mxu0 %vm1522_vm15, %v2503_v30  ;;  %v1769_v47 = vpop.permute.xlu0 %1768  ;;  %v1456_v59 = vsel %vm1131_vm13, %v1441_v55, %v3740_v5  ;;  %v1458_v50 = vsel %vm1131_vm13, %v1443_v31, %v3803_v13  ;;  %v793_v5 = vshll.u32 %v739_v11, 16  ;;  %v4282_v30 = vld [vmem:[#allocation5_spill] sm:$0xff]  ;;  %v4287_v31 = vld [vmem:[#allocation12_spill] sm:$0xff] }
 0x15a   : > { %v1369_v13 = vsel %vm1029_vm7, %v4281_v52, %v1228_v60  ;;  %v1367_v27 = vsel %vm1029_vm7, %v4282_v30, %v3846_v29  ;;  %v4283_v29 = vld [vmem:[#allocation11_spill] sm:$0xff] }
 0x15b   : > { %1774 = vrot.lane.b32.xlu1 %v3647_v51, %s4228_s15  ;;  %1901 = vrot.lane.b32.xlu0 %v3887_v18, %s2765_s10  ;;  %v1471_v51 = vsel %vm1148_vm14, %v1456_v59, %v1351_v22  ;;  %v795_v11 = vor.u32 %v793_v5, %v792_v36 }
 0x15d   : > { %v1353_v46 = vpop.permute.xlu1 %1352  ;;  %v1232_v24 = vpop.permute.xlu0 %1231  ;;  %v811_v25 = vsel %vm2845_vm3, 0, %v795_v11 }
 0x15e   : > { %v1473_v41 = vsel %vm1148_vm14, %v1458_v50, %v1353_v46  ;;  %v3979_v44 = vsel %vm2850_vm5, %v811_v25, 0  ;;  %v1373_v40 = vsel %vm1029_vm7, %v4285_v10, %v1232_v24 }
 0x15f   : > { %v2490_v4 = vcombine.low %v1471_v51, %v1473_v41  ;;  %1899 = vrot.lane.b32.xlu1 %v4280_v62, %s2765_s10  ;;  %1780 = vrot.lane.b32.xlu0 %v3918_v7, %s4228_s15  ;;  %v1830_v2 = vshll.u32 %v3979_v44, 16 }
 0x161   : > { %v1230_v42 = vpop.permute.xlu1 %1229  ;;  %2598 = vmatmul.mubr.msk.bf16.vlgmr.msra.gmra.mrb[0].mxu1 %vm1522_vm15, %v2490_v4  ;;  %v1256_v22 = vpop.permute.xlu0 %1255  ;;  %v1832_v35 = vrot.slane %v1830_v2, 1 }
 0x162   : > { %v1383_v32 = vsel %vm1046_vm8, %v1369_v13, %v1256_v22  ;;  %2636 = vmatpush3.bf16.msra.mxu1 %v3758_v33  ;;  %v1371_v1 = vsel %vm1029_vm7, %v4283_v29, %v1230_v42 }
 0x163   : > { %1778 = vrot.lane.b32.xlu1 %v3943_v19, %s4228_s15  ;;  %1804 = vrot.lane.b32.xlu0 %v3887_v18, %s2758_s11 }
 0x164   : > { %2634 = vmatprep.subr.bf16.mxu1 %v3790_v14 }
 0x165   : > { %v1254_v38 = vpop.permute.xlu1 %1253  ;;  %v1773_v20 = vpop.permute.xlu0 %1772 }
 0x166   : > { %v1381_v33 = vsel %vm1046_vm8, %v1367_v27, %v1254_v38  ;;  %2637 = vmatpush3.bf16.msra.mxu1 %v3790_v14  ;;  %v1914_v59 = vsel %vm1029_vm7, %v4287_v31, %v1773_v20 }
 0x167   : > { %1802 = vrot.lane.b32.xlu1 %v4280_v62, %s2758_s11  ;;  %1808 = vrot.lane.b32.xlu0 %v3955_v6, %s2758_s11 }
 0x168   : > { %2658 = vmatprep.subr.msk.bf16.mxu1 %vm1535_vm6, %v3830_v48  ;;  %v4284_v48 = vld [vmem:[#allocation9_spill] sm:$0xff] }
 0x169   : > { %v1771_v12 = vpop.permute.xlu1 %1770  ;;  %v1258_v14 = vpop.permute.xlu0 %1257  ;;  %v1910_v57 = vsel %vm1029_vm7, %v4284_v48, %v1769_v47 }
 0x16a   : > { %v1385_v58 = vsel %vm1046_vm8, %v1371_v1, %v1258_v14  ;;  %2638 = vmatpush3.bf16.msra.mxu1 %v3852_v9  ;;  %v1828_v9 = vshrl.u32 %v3979_v44, 16  ;;  %v1912_v47 = vsel %vm1029_vm7, %v4286_v28, %v1771_v12 }
 0x16b   : > { %1806 = vrot.lane.b32.xlu1 %v3968_v49, %s2758_s11  ;;  %1821 = vrot.lane.b32.xlu0 %v3877_v26, %s2760_s14  ;;  %s4288_s11 = sshll.u32 %s3011_s18, 2  ;;  %s2482_s18 = sshll.u32 %s4302_s28, 3 }
 0x16c   : > { %v1833_v43 = vor.u32 %v1832_v35, %v1828_v9 }
 0x16d   : > { %v1797_v60 = vpop.permute.xlu1 %1796  ;;  %v1271_v23 = vpop.permute.xlu0 %1270 }
 0x16e   : > { %v1924_v8 = vsel %vm1046_vm8, %v1910_v57, %v1797_v60  ;;  %v1397_v3 = vsel %vm1063_vm9, %v1381_v33, %v1271_v23 }
 0x16f   : > { %1819 = vrot.lane.b32.xlu1 %v3706_v34, %s2760_s14  ;;  %1825 = vrot.lane.b32.xlu0 %v3979_v44, %s2760_s14 }
 0x171   : > { %v1260_v53 = vpop.permute.xlu1 %1259  ;;  %v1799_v39 = vpop.permute.xlu0 %1798 }
 0x172   : > { %v4001_v54 = vsel %vm1046_vm8, %v1373_v40, %v1260_v53  ;;  %v1926_v0 = vsel %vm1046_vm8, %v1912_v47, %v1799_v39 }
 0x173   : > { %1823 = vrot.lane.b32.xlu1 %v3796_v45, %s2760_s14  ;;  %1844 = vrot.lane.b32.xlu0 %v3943_v19, %s2761_s19 }
 0x175   : > { %v1273_v21 = vpop.permute.xlu1 %1272  ;;  %v1812_v55 = vpop.permute.xlu0 %1811 }
 0x176   : > { %v4009_v16 = vsel %vm1063_vm9, %v1383_v32, %v1273_v21  ;;  %v1938_v42 = vsel %vm1063_vm9, %v3403_v17, %v1812_v55 }
 0x177   : > { %1842 = vrot.lane.b32.xlu1 %v3824_v63, %s2761_s19  ;;  %1848 = vrot.lane.b32.xlu0 %v1833_v43, %s2761_s19  ;;  %v1850_v63 = vrot.slane %v3979_v44, 1 }
 0x179   : > { %v1801_v50 = vpop.permute.xlu1 %1800  ;;  %v1275_v46 = vpop.permute.xlu0 %1274 }
 0x17a   : > { %v1928_v24 = vsel %vm1046_vm8, %v1914_v59, %v1801_v50  ;;  %v4018_v51 = vsel %vm1063_vm9, %v1385_v58, %v1275_v46 }
 0x17b   : > { %1846 = vrot.lane.b32.xlu1 %v3918_v7, %s2761_s19  ;;  %1861 = vrot.lane.b32.xlu0 %v3968_v49, %s2762_s24  ;;  %s4166_s19 = scalar_lea.vmem %s4201_s6, %s4288_s11 }
 0x17d   : > { %v1814_v41 = vpop.permute.xlu1 %1813  ;;  %v1294_v4 = vpop.permute.xlu0 %1293 }
 0x17e   : > { %v4026_v62 = vsel %vm1063_vm9, %v1924_v8, %v1814_v41  ;;  %v1413_v36 = vsel %vm1080_vm10, %v1397_v3, %v1294_v4 }
 0x17f   : > { %1859 = vrot.lane.b32.xlu1 %v3887_v18, %s2762_s24  ;;  %1865 = vrot.lane.b32.xlu0 %v1850_v63, %s2762_s24 }
 0x181   : > { %v1277_v5 = vpop.permute.xlu1 %1276  ;;  %v1816_v52 = vpop.permute.xlu0 %1815 }
 0x182   : > { %v4033_v13 = vsel %vm1063_vm9, %v1926_v0, %v1816_v52  ;;  %v1403_v10 = vsel %vm1063_vm9, %v4001_v54, %v1277_v5 }
 0x183   : > { %1863 = vrot.lane.b32.xlu1 %v3955_v6, %s2762_s24  ;;  %1877 = vrot.lane.b32.xlu0 %v3796_v45, %s2763_s25  ;;  %s480_s24 = sadd.s32 %s2482_s18, %s2994_s16 }
 0x184   : > { %s488_s23 = scalar_lea.vmem %s4203_s8, %s480_s24 }
 0x185   : > { %v1296_v22 = vpop.permute.xlu1 %1295  ;;  %v1835_v32 = vpop.permute.xlu0 %1834 }
 0x186   : > { %v4042_v18 = vsel %vm1080_vm10, %v1938_v42, %v1835_v32  ;;  %v1415_v39 = vsel %vm1080_vm10, %v4009_v16, %v1296_v22 }
 0x187   : > { %1875 = vrot.lane.b32.xlu1 %v3877_v26, %s2763_s25  ;;  %1889 = vrot.lane.b32.xlu0 %v3943_v19, %s2764_s12 }
 0x189   : > { %v1818_v11 = vpop.permute.xlu1 %1817  ;;  %v1298_v30 = vpop.permute.xlu0 %1297 }
 0x18a   : > { %v4049_v27 = vsel %vm1063_vm9, %v1928_v24, %v1818_v11  ;;  %v1417_v16 = vsel %vm1080_vm10, %v4018_v51, %v1298_v30 }
 0x18b   : > { %1879 = vrot.lane.b32.xlu1 %v3979_v44, %s2763_s25  ;;  %1893 = vrot.lane.b32.xlu0 %v1833_v43, %s2764_s12 }
 0x18d   : > { %v1837_v17 = vpop.permute.xlu1 %1836  ;;  %v1311_v38 = vpop.permute.xlu0 %1310 }
 0x18e   : > { %v1429_v0 = vsel %vm1097_vm11, %v1413_v36, %v1311_v38  ;;  %v1956_v51 = vsel %vm1080_vm10, %v4026_v62, %v1837_v17 }
 0x18f   : > { %1891 = vrot.lane.b32.xlu1 %v3918_v7, %s2764_s12  ;;  %1905 = vrot.lane.b32.xlu0 %v3955_v6, %s2765_s10 }
 0x191   : > { %v1300_v20 = vpop.permute.xlu1 %1299  ;;  %v4058_v19 = vpop.permute.xlu0 %1838 }
 0x192   : > { %v1419_v40 = vsel %vm1080_vm10, %v1403_v10, %v1300_v20 }
 0x193   : > { %1903 = vrot.lane.b32.xlu1 %v3968_v49, %s2765_s10 }
 0x195   : > { %v1313_v33 = vpop.permute.xlu1 %1312  ;;  %v1852_v25 = vpop.permute.xlu0 %1851 }
 0x196   : > { %v1431_v43 = vsel %vm1097_vm11, %v1415_v39, %v1313_v33  ;;  %v1970_v30 = vsel %vm1097_vm11, %v4042_v18, %v1852_v25 }
 0x197   : > { %1907 = vrot.lane.b32.xlu1 %v1850_v63, %s2765_s10  ;;  %s481_s10 = scalar_lea.vmem %s4202_s7, %s480_s24 }
 0x199   : > { %v4063_v29 = vpop.permute.xlu1 %1840  ;;  %v1315_v1 = vpop.permute.xlu0 %1314 }
 0x19a   : > { %v1433_v41 = vsel %vm1097_vm11, %v1417_v16, %v1315_v1 }
 0x19d   : > { %v1854_v12 = vpop.permute.xlu1 %1853  ;;  %v1327_v14 = vpop.permute.xlu0 %1326 }
 0x19e   : > { %v1445_v21 = vsel %vm1114_vm12, %v1429_v0, %v1327_v14  ;;  %v1972_v38 = vsel %vm1097_vm11, %v1956_v51, %v1854_v12 }
 0x1a1   : > { %v1317_v58 = vpop.permute.xlu1 %1316  ;;  %v1856_v7 = vpop.permute.xlu0 %1855 }
 0x1a2   : > { %v1435_v28 = vsel %vm1097_vm11, %v1419_v40, %v1317_v58 }
 0x1a3   : > { %v1450_v55 = vsel %vm1114_vm12, %v1435_v28, %v3686_v56 }
 0x1a4   : > { %v1465_v36 = vsel %vm1131_vm13, %v1450_v55, %v3738_v37 }
 0x1a5   : > { %v1329_v44 = vpop.permute.xlu1 %1328  ;;  %v1868_v2 = vpop.permute.xlu0 %1867  ;;  %v1480_v32 = vsel %vm1148_vm14, %v1465_v36, %v3883_v61 }
 0x1a6   : > { %v1447_v54 = vsel %vm1114_vm12, %v1431_v43, %v1329_v44  ;;  %v1986_v33 = vsel %vm1114_vm12, %v1970_v30, %v1868_v2  ;;  %v1958_v2 = vsel %vm1080_vm10, %v4033_v13, %v4058_v19 }
 0x1a9   : > { %v1858_v6 = vpop.permute.xlu1 %1857  ;;  %v1331_v48 = vpop.permute.xlu0 %1330 }
 0x1aa   : > { %v1449_v5 = vsel %vm1114_vm12, %v1433_v41, %v1331_v48 }
 0x1ad   : > { %v1870_v57 = vpop.permute.xlu1 %1869  ;;  %v1343_v60 = vpop.permute.xlu0 %1342 }
 0x1ae   : > { %v1462_v31 = vsel %vm1131_vm13, %v1447_v54, %v1343_v60  ;;  %v1988_v1 = vsel %vm1114_vm12, %v1972_v38, %v1870_v57  ;;  %v1960_v57 = vsel %vm1080_vm10, %v4049_v27, %v4063_v29  ;;  %v1974_v60 = vsel %vm1097_vm11, %v1958_v2, %v1856_v7 }
 0x1b1   : > { %v1341_v23 = vpop.permute.xlu1 %1340  ;;  %v1874_v8 = vpop.permute.xlu0 %1873 }
 0x1b2   : > { %v1460_v59 = vsel %vm1131_vm13, %v1445_v21, %v1341_v23  ;;  %v1976_v23 = vsel %vm1097_vm11, %v1960_v57, %v1858_v6 }
 0x1b5   : > { %v1872_v49 = vpop.permute.xlu1 %1871  ;;  %v1884_v3 = vpop.permute.xlu0 %1883 }
 0x1b6   : > { %v2003_v14 = vsel %vm1131_vm13, %v1988_v1, %v1884_v3  ;;  %v1992_v3 = vsel %vm1114_vm12, %v1976_v23, %v1874_v8 }
 0x1b9   : > { %v1882_v9 = vpop.permute.xlu1 %1881  ;;  %v1355_v35 = vpop.permute.xlu0 %1354 }
 0x1ba   : > { %v1475_v24 = vsel %vm1148_vm14, %v1460_v59, %v1355_v35  ;;  %v2001_v58 = vsel %vm1131_vm13, %v1986_v33, %v1882_v9  ;;  %v1990_v9 = vsel %vm1114_vm12, %v1974_v60, %v1872_v49 }
 0x1bd   : > { %v1345_v47 = vpop.permute.xlu1 %1344  ;;  %v1886_v53 = vpop.permute.xlu0 %1885 }
 0x1be   : > { %v1464_v52 = vsel %vm1131_vm13, %v1449_v5, %v1345_v47  ;;  %v2005_v35 = vsel %vm1131_vm13, %v1990_v9, %v1886_v53 }
 0x1c1   : > { %v1357_v50 = vpop.permute.xlu1 %1356  ;;  %v1896_v46 = vpop.permute.xlu0 %1895 }
 0x1c2   : > { %v1477_v63 = vsel %vm1148_vm14, %v1462_v31, %v1357_v50  ;;  %v2016_v44 = vsel %vm1148_vm14, %v2001_v58, %v1896_v46 }
 0x1c3   : > { %v2491_v4 = vcombine.low %v1475_v24, %v1477_v63 }
 0x1c5   : > { %v1888_v42 = vpop.permute.xlu1 %1887  ;;  %2601 = vmatprep.mubr.msk.bf16.mxu1 %vm1522_vm15, %v2491_v4  ;;  %v1359_v22 = vpop.permute.xlu0 %1358 }
 0x1c6   : > { %v1479_v11 = vsel %vm1148_vm14, %v1464_v52, %v1359_v22  ;;  %v2007_v10 = vsel %vm1131_vm13, %v1992_v3, %v1888_v42 }
 0x1c7   : > { %v2492_v20 = vcombine.low %v1479_v11, %v1480_v32 }
 0x1c9   : > { %v1898_v62 = vpop.permute.xlu1 %1897  ;;  %2602 = vmatmul.mubr.msk.bf16.gmra.mrb[4].mxu1 %vm1522_vm15, %v2492_v20  ;;  %v1777_v17 = vpop.permute.xlu0 %1776 }
 0x1ca   : > { %v2018_v48 = vsel %vm1148_vm14, %v2003_v14, %v1898_v62  ;;  %v1918_v4 = vsel %vm1029_vm7, %v3706_v34, %v1777_v17 }
 0x1cb   : > { %v2516_v18 = vcombine.low %v2016_v44, %v2018_v48 }
 0x1cd   : > { %v1775_v25 = vpop.permute.xlu1 %1774  ;;  %2625 = vmatprep.mubr.msk.bf16.mxu0 %vm1522_vm15, %v2516_v18  ;;  %v1902_v12 = vpop.permute.xlu0 %1901 }
 0x1ce   : > { %v2022_v13 = vsel %vm1148_vm14, %v2007_v10, %v1902_v12  ;;  %v1916_v36 = vsel %vm1029_vm7, %v3607_v15, %v1775_v25 }
 0x1d1   : > { %v1900_v40 = vpop.permute.xlu1 %1899  ;;  %v1781_v28 = vpop.permute.xlu0 %1780 }
 0x1d2   : > { %v2020_v19 = vsel %vm1148_vm14, %v2005_v35, %v1900_v40  ;;  %v1922_v41 = vsel %vm1029_vm7, %v3796_v45, %v1781_v28 }
 0x1d3   : > { %v2517_v47 = vcombine.low %v2020_v19, %v2022_v13 }
 0x1d5   : > { %v1779_v27 = vpop.permute.xlu1 %1778  ;;  %2626 = vmatmul.mubr.msk.bf16.vlgmr.msra.gmra.mrb[0].mxu0 %vm1522_vm15, %v2517_v47  ;;  %v1805_v29 = vpop.permute.xlu0 %1804 }
 0x1d6   : > { %v1932_v42 = vsel %vm1046_vm8, %v1918_v4, %v1805_v29  ;;  %v1920_v38 = vsel %vm1029_vm7, %v3877_v26, %v1779_v27 }
 0x1d9   : > { %v1803_v7 = vpop.permute.xlu1 %1802  ;;  %v1809_v6 = vpop.permute.xlu0 %1808 }
 0x1da   : > { %v1930_v22 = vsel %vm1046_vm8, %v1916_v36, %v1803_v7  ;;  %v1936_v51 = vsel %vm1046_vm8, %v1922_v41, %v1809_v6 }
 0x1dd   : > { %v1807_v8 = vpop.permute.xlu1 %1806  ;;  %v1822_v39 = vpop.permute.xlu0 %1821 }
 0x1de   : > { %v1948_v32 = vsel %vm1063_vm9, %v1932_v42, %v1822_v39  ;;  %v1934_v58 = vsel %vm1046_vm8, %v1920_v38, %v1807_v8 }
 0x1e1   : > { %v1820_v49 = vpop.permute.xlu1 %1819  ;;  %v1826_v0 = vpop.permute.xlu0 %1825 }
 0x1e2   : > { %v1946_v11 = vsel %vm1063_vm9, %v1930_v22, %v1820_v49  ;;  %v1952_v45 = vsel %vm1063_vm9, %v1936_v51, %v1826_v0 }
 0x1e5   : > { %v1824_v53 = vpop.permute.xlu1 %1823  ;;  %v1845_v43 = vpop.permute.xlu0 %1844 }
 0x1e6   : > { %v1964_v30 = vsel %vm1080_vm10, %v1948_v32, %v1845_v43  ;;  %v1950_v44 = vsel %vm1063_vm9, %v1934_v58, %v1824_v53 }
 0x1e9   : > { %v1843_v21 = vpop.permute.xlu1 %1842  ;;  %v1849_v55 = vpop.permute.xlu0 %1848 }
 0x1ea   : > { %v1962_v34 = vsel %vm1080_vm10, %v1946_v11, %v1843_v21  ;;  %v1968_v15 = vsel %vm1080_vm10, %v1952_v45, %v1849_v55 }
 0x1ed   : > { %v1847_v54 = vpop.permute.xlu1 %1846  ;;  %v1862_v31 = vpop.permute.xlu0 %1861 }
 0x1ee   : > { %v1980_v20 = vsel %vm1097_vm11, %v1964_v30, %v1862_v31  ;;  %v1966_v26 = vsel %vm1080_vm10, %v1950_v44, %v1847_v54 }
 0x1f1   : > { %v1860_v59 = vpop.permute.xlu1 %1859  ;;  %v1866_v50 = vpop.permute.xlu0 %1865 }
 0x1f2   : > { %v1978_v33 = vsel %vm1097_vm11, %v1962_v34, %v1860_v59  ;;  %v1984_v1 = vsel %vm1097_vm11, %v1968_v15, %v1866_v50 }
 0x1f3   : > { %v1999_v25 = vsel %vm1114_vm12, %v1984_v1, %v3686_v56 }
 0x1f4   : > { %v2014_v35 = vsel %vm1131_vm13, %v1999_v25, %v3738_v37 }
 0x1f5   : > { %v1864_v46 = vpop.permute.xlu1 %1863  ;;  %v1878_v16 = vpop.permute.xlu0 %1877  ;;  %v2029_v28 = vsel %vm1148_vm14, %v2014_v35, %v3883_v61 }
 0x1f6   : > { %v1996_v62 = vsel %vm1114_vm12, %v1980_v20, %v1878_v16  ;;  %v1982_v12 = vsel %vm1097_vm11, %v1966_v26, %v1864_v46 }
 0x1f9   : > { %v1876_v24 = vpop.permute.xlu1 %1875  ;;  %v1890_v63 = vpop.permute.xlu0 %1889 }
 0x1fa   : > { %v1994_v17 = vsel %vm1114_vm12, %v1978_v33, %v1876_v24 }
 0x1fb   : > { %v2009_v2 = vsel %vm1131_vm13, %v1994_v17, %v1890_v63 }
 0x1fd   : > { %v1880_v5 = vpop.permute.xlu1 %1879  ;;  %v1894_v52 = vpop.permute.xlu0 %1893 }
 0x1fe   : > { %v1998_v60 = vsel %vm1114_vm12, %v1982_v12, %v1880_v5 }
 0x1ff   : > { %v2013_v10 = vsel %vm1131_vm13, %v1998_v60, %v1894_v52 }
 0x201   : > { %v1892_v14 = vpop.permute.xlu1 %1891  ;;  %v1906_v18 = vpop.permute.xlu0 %1905 }
 0x202   : > { %v2011_v48 = vsel %vm1131_vm13, %v1996_v62, %v1892_v14 }
 0x203   : > { %v2026_v23 = vsel %vm1148_vm14, %v2011_v48, %v1906_v18 }
 0x205   : > { %v1904_v57 = vpop.permute.xlu1 %1903 }
 0x206   : > { %v2024_v3 = vsel %vm1148_vm14, %v2009_v2, %v1904_v57 }
 0x207   : > { %v2518_v9 = vcombine.low %v2024_v3, %v2026_v23 }
 0x209   : > { %v1908_v40 = vpop.permute.xlu1 %1907  ;;  %2629 = vmatprep.mubr.msk.bf16.mxu1 %vm1522_vm15, %v2518_v9 }
 0x20a   : > { %v2028_v56 = vsel %vm1148_vm14, %v2013_v10, %v1908_v40 }
 0x20b   : > { %v2519_v13 = vcombine.low %v2028_v56, %v2029_v28 }
 0x20d   : > { %2630 = vmatmul.mubr.msk.bf16.vlgmr.msra.gmra.mrb[8].mxu1 %vm1522_vm15, %v2519_v13 }
 0x22c   : > { %v2617_v19 = vpop.f32.mrb[4].mxu0 }
 0x22d   : > { %v1704_v47 = vpop.f32.mrb[5].mxu0 }
 0x22e   : > { %v2618_v27 = vpop.f32.mrb[6].mxu0 }
 0x22f   : > { %v1707_v29 = vpop.f32.mrb[7].mxu0 }
 0x234   : > { %v2599_v7 = vpop.f32.mrb[0].mxu1 }
 0x235   : > { %v1573_v6 = vpop.f32.mrb[1].mxu1 }
 0x236   : > { %v2600_v37 = vpop.f32.mrb[2].mxu1 }
 0x237   : > { %v1576_v8 = vpop.f32.mrb[3].mxu1 }
 0x29c   : > { %v2603_v39 = vpop.f32.mrb[4].mxu1 }
 0x29d   : > { %v1713_v49 = vadd.f32 %v2617_v19, %v2603_v39  ;;  %v1589_v0 = vpop.f32.mrb[5].mxu1 }
 0x29e   : > { %v1705_v53 = vadd.f32 %v1704_v47, %v1589_v0  ;;  %v2604_v43 = vpop.f32.mrb[6].mxu1 }
 0x29f   : > { %v1716_v21 = vadd.f32 %v2618_v27, %v2604_v43  ;;  %v1592_v55 = vpop.f32.mrb[7].mxu1 }
 0x2a0   : > { %v1708_v61 = vadd.f32 %v1707_v29, %v1592_v55 }
 0x2a8   : > { %v2627_v54 = vpop.f32.mrb[0].mxu0 }
 0x2a9   : > { %v2639_v31 = vadd.f32 %v2627_v54, %v2599_v7  ;;  %v2120_v59 = vpop.f32.mrb[1].mxu0 }
 0x2aa   : > { %v2640_v50 = vadd.f32 %v2120_v59, %v1573_v6  ;;  %v2628_v46 = vpop.f32.mrb[2].mxu0 }
 0x2ab   : > { %v2641_v16 = vadd.f32 %v2628_v46, %v2600_v37  ;;  %v2123_v24 = vpop.f32.mrb[3].mxu0  ;;  %v2215_v42 = vmul.f32 %v2639_v31, %v2639_v31 }
 0x2ac   : > { %v2642_v63 = vadd.f32 %v2123_v24, %v1576_v8  ;;  %v2213_v4 = vmul.f32 %v2640_v50, %v2640_v50 }
 0x2ad   : > { %v2555_v41 = vpack.c.bf16 %v2641_v16, %v2639_v31  ;;  %v2216_v32 = vmul.f32 %v2641_v16, %v2641_v16 }
 0x2ae   : > { %v2550_v36 = vpack.c.bf16 %v2642_v63, %v2640_v50  ;;  %v2199_v5 = vadd.f32 %v2642_v63, %v2640_v50  ;;  %v2214_v52 = vmul.f32 %v2642_v63, %v2642_v63 }
 0x2af   : > { %2567 = vst [vmem:[%s4166_s19 + $0x8] sm:$0xff] %v2555_v41  }
 0x2b0   : > { %2551 = vst [vmem:[%s4166_s19] sm:$0xff] %v2550_v36   ;;  %v2200_v22 = vadd.f32 %v2639_v31, %v2199_v5  ;;  %v2221_v51 = vadd.f32 %v2214_v52, %v2213_v4 }
 0x2b2   : > { %v2222_v11 = vadd.f32 %v2221_v51, %v2215_v42  ;;  %v2201_v45 = vadd.f32 %v2641_v16, %v2200_v22 }
 0x2b4   : > { %v2223_v30 = vadd.f32 %v2222_v11, %v2216_v32 }
 0x2e0   : > { %v2631_v34 = vpop.f32.mrb[8].mxu1 }
 0x2e1   : > { %v2157_v15 = vadd.f32 %v2631_v34, %v1713_v49  ;;  %v2136_v38 = vpop.f32.mrb[9].mxu1 }
 0x2e2   : > { %v2155_v20 = vadd.f32 %v2136_v38, %v1705_v53  ;;  %v2632_v33 = vpop.f32.mrb[10].mxu1 }
 0x2e3   : > { %v2158_v1 = vadd.f32 %v2632_v33, %v1716_v21  ;;  %v2139_v14 = vpop.f32.mrb[11].mxu1  ;;  %v2219_v12 = vmul.f32 %v2157_v15, %v2157_v15 }
 0x2e4   : > { %v2202_v58 = vadd.f32 %v2201_v45, %v2155_v20  ;;  %v2217_v62 = vmul.f32 %v2155_v20, %v2155_v20  ;;  %v2156_v17 = vadd.f32 %v2139_v14, %v1708_v61 }
 0x2e5   : > { %v2565_v44 = vpack.c.bf16 %v2158_v1, %v2157_v15  ;;  %v2220_v60 = vmul.f32 %v2158_v1, %v2158_v1 }
 0x2e6   : > { %v2224_v48 = vadd.f32 %v2223_v30, %v2217_v62  ;;  %v2560_v18 = vpack.c.bf16 %v2156_v17, %v2155_v20  ;;  %v2203_v26 = vadd.f32 %v2202_v58, %v2156_v17  ;;  %v2218_v25 = vmul.f32 %v2156_v17, %v2156_v17 }
 0x2e7   : > { %2569 = vst [vmem:[%s4166_s19 + $0x18] sm:$0xff] %v2565_v44  }
 0x2e8   : > { %2568 = vst [vmem:[%s4166_s19 + $0x10] sm:$0xff] %v2560_v18   ;;  %v2204_v2 = vadd.f32 %v2203_v26, %v2157_v15  ;;  %v2225_v57 = vadd.f32 %v2224_v48, %v2218_v25 }
 0x2ea   : > { %v2205_v23 = vadd.f32 %v2204_v2, %v2158_v1  ;;  %v2226_v3 = vadd.f32 %v2225_v57, %v2219_v12 }
 0x2ec   : > { %v2206_v9 = vrot.slane %v2205_v23, 4  ;;  %v2227_v35 = vadd.f32 %v2226_v3, %v2220_v60 }
 0x2ee   : > { %v2207_v10 = vadd.f32 %v2206_v9, %v2205_v23  ;;  %v2228_v40 = vrot.slane %v2227_v35, 4 }
 0x2f0   : > { %v2208_v56 = vrot.slane %v2207_v10, 2  ;;  %v2229_v28 = vadd.f32 %v2228_v40, %v2227_v35 }
 0x2f2   : > { %v2209_v13 = vadd.f32 %v2208_v56, %v2207_v10  ;;  %v2230_v19 = vrot.slane %v2229_v28, 2 }
 0x2f4   : > { %v2210_v47 = vrot.slane %v2209_v13, 1  ;;  %v2231_v27 = vadd.f32 %v2230_v19, %v2229_v28 }
 0x2f6   : > { %v2211_v29 = vadd.f32 %v2210_v47, %v2209_v13  ;;  %v2232_v7 = vrot.slane %v2231_v27, 1 }
 0x2f8   : > { %2212 = vst [vmem:[%s481_s10] sm:$0x1] %v2211_v29  ;;  %v2233_v6 = vadd.f32 %v2232_v7, %v2231_v27 }
 0x2fa   : > { %2234 = vst [vmem:[%s488_s23] sm:$0x1] %v2233_v6 }
 0x2fb PF: > { %s19_s4 = sadd.s32 1, %s2755_s4   ;;  %s4289_s27 = smov %s2747_s29 }
 0x2fc   : > { %p16_p13 = scmp.ge.s32.totalorder %s19_s4, 18   ;;  %s4290_s28 = smov %s2751_s30 }
 0x2fd   : > { %s4291_s29 = smov %s4294_s5  ;;  %s4292_s30 = smov %s4298_s9 }
 0x2fe   :  { %18 = sbr.rel (!%p16_p13) target bundleno = 3 (0x3), region = 106 }

// kernel: double_conv_forward.4
= control target key start
LH: loop header
LB: loop body
LE: loop exit
PB: predicated region body
PF: predicated region fallthrough
CT: control target
= control target key end

     0   :  { %s6130_s27 = smov 0   ;;  %s6132_s28 = smov 0   ;;  %s7667_s0 = inlined_call_operand.vmem [shape: bf16[2,8,8,8,128], index: 0, kind: input, shape index: {}, may-alias: {0,1,2}]   ;;  %s7668_s1 = inlined_call_operand.vmem [shape: bf16[2,8,8,8,128], index: 1, kind: input, shape index: {}, may-alias: {0,1,2}]   ;;  %s7669_s2 = inlined_call_operand.vmem [shape: bf16[2,8,8,8,128], index: 2, kind: input, shape index: {}, may-alias: {0,1,2}]   ;;  %s7670_s3 = inlined_call_operand.vmem [shape: bf16[3,1152,128], index: 3, kind: input, shape index: {}]   ;;  %s7671_s4 = inlined_call_operand.vmem [shape: f32[1,128], index: 4, kind: input, shape index: {}]   ;;  %s7672_s5 = inlined_call_operand.vmem [shape: f32[1,128], index: 5, kind: input, shape index: {}]   ;;  %s7673_s6 = inlined_call_operand.vmem [shape: bf16[2,8,8,8,128], index: 6, kind: output, shape index: {0}]   ;;  %s7674_s7 = inlined_call_operand.vmem [shape: f32[2,8,1,128], index: 7, kind: output, shape index: {1}]   ;;  %s7675_s8 = inlined_call_operand.vmem [shape: f32[2,8,1,128], index: 8, kind: output, shape index: {2}]  }
   0x1   :  { %s6134_s29 = smov 0   ;;  %s6136_s30 = smov 0  }
   0x2   :  { %s6138_s9 = smov 0  }
   0x3 LB: > { %s28_s10 = sadd.s32 1, %s6074_s29  ;;  %s31_s11 = sadd.s32 1, %s6078_s30  ;;  %s6082_s9 = sphi %s6138_s9, %s19_s9   ;;  %s6078_s30 = sphi %s6136_s30, %s7684_s30   ;;  %s6074_s29 = sphi %s6134_s29, %s7683_s29   ;;  %s6070_s28 = sphi %s6132_s28, %s7682_s28   ;;  %s6066_s27 = sphi %s6130_s27, %s7681_s27  }
   0x4   : > { %p29_p0 = scmp.ge.s32.totalorder %s28_s10, 8  ;;  %p4404_p1 = scmp.ge.s32.totalorder %s6082_s9, 1 }
   0x5   : > { %p347_p2 = scmp.lt.s32.totalorder %s6082_s9, 17 }
   0x6   : > { %s7686_s10 = smov (%p29_p0, %s28_s10), 0  ;;  %s7688_s11 = smov (!%p29_p0, %s31_s11), %s6078_s30 }
   0x7   : > { %p348_p3 = pnand %p4404_p1, %p347_p2  ;;  %p33_p4 = scmp.ge.s32.totalorder %s7688_s11, 2 }
   0x8   : > { %v5824_v0 = vld [vmem:[%s7670_s3 + $0x280] sm:$0xff] (!%p348_p3)   ;;  %v5828_v4 = vld [vmem:[%s7670_s3 + $0x288] sm:$0xff] (!%p348_p3)   ;;  %v5832_v8 = vld [vmem:[%s7670_s3 + $0x290] sm:$0xff] (!%p348_p3)   ;;  %p430_p5 = scmp.lt.s32.totalorder (!%p348_p3), %s6070_s28, 1  ;;  %p444_p6 = scmp.lt.s32.totalorder (!%p348_p3), %s6066_s27, 7  ;;  %vm636_vm0 = vcmask (!%p348_p3), 1040384  }
   0x9   : > { %s7690_s11 = smov (%p33_p4, %s7688_s11), 0  ;;  %351 = sbr.rel (%p348_p3) target bundleno = 525 (0x20d), region = 44 }
   0xa   : > { %v5825_v1 = vld [vmem:[%s7670_s3 + $0x300] sm:$0xff] (!%p348_p3)   ;;  %5115 = vmatprep.subr.bf16.mxu0 (!%p348_p3), %v5824_v0  ;;  %v5829_v5 = vld [vmem:[%s7670_s3 + $0x308] sm:$0xff] (!%p348_p3)   ;;  %v5833_v9 = vld [vmem:[%s7670_s3 + $0x310] sm:$0xff] (!%p348_p3)   ;;  %vm648_vm1 = vcmask (!%p348_p3), 1044480   ;;  %vm637_vm2 = vsmask.f32 (!%p348_p3), 256 }
   0xb   : > { %v5826_v2 = vld [vmem:[%s7670_s3 + $0x240] sm:$0xff] (!%p348_p3)   ;;  %5155 = vmatprep.subr.bf16.mxu1 (!%p348_p3), %v5825_v1  ;;  %v5830_v6 = vld [vmem:[%s7670_s3 + $0x248] sm:$0xff] (!%p348_p3)   ;;  %v5834_v10 = vld [vmem:[%s7670_s3 + $0x250] sm:$0xff] (!%p348_p3)   ;;  %v6084_v38 = vmov (!%p348_p3), 0   ;;  %vm649_vm4 = vsmask.f32 (!%p348_p3), 4352 }
   0xc   : > { %v5827_v3 = vld [vmem:[%s7670_s3 + $0x2c0] sm:$0xff] (!%p348_p3)   ;;  %5116 = vmatpush3.bf16.msra.mxu0 (!%p348_p3), %v5826_v2  ;;  %v5831_v7 = vld [vmem:[%s7670_s3 + $0x2c8] sm:$0xff] (!%p348_p3)   ;;  %v5835_v11 = vld [vmem:[%s7670_s3 + $0x2d0] sm:$0xff] (!%p348_p3)   ;;  %v567_v39 = vrot.slane (!%p348_p3), %v6084_v38, 7  ;;  %s6344_s12 = sadd.s32 (!%p348_p3), 4294967295, %s6066_s27  ;;  %p498_p9 = scmp.gt.s32.totalorder (!%p348_p3), %s6066_s27, 0 }
   0xd   : > { %5156 = vmatpush3.bf16.msra.mxu1 (!%p348_p3), %v5827_v3  ;;  %5117 = vmatprep.subr.bf16.mxu0 (!%p348_p3), %v5828_v4  ;;  %v5836_v12 = vld [vmem:[%s7670_s3 + $0x298] sm:$0xff] (!%p348_p3)   ;;  %v5840_v16 = vld [vmem:[%s7670_s3 + $0x2a0] sm:$0xff] (!%p348_p3)   ;;  %v5844_v20 = vld [vmem:[%s7670_s3 + $0x2a8] sm:$0xff] (!%p348_p3)   ;;  %p428_p7 = scmp.gt.s32.totalorder (!%p348_p3), %s6344_s12, 0  ;;  %p4406_p8 = scmp.lt.s32.totalorder (!%p348_p3), %s6344_s12, 7 }
   0xe   : > { %5157 = vmatprep.subr.bf16.mxu1 (!%p348_p3), %v5829_v5  ;;  %v5837_v13 = vld [vmem:[%s7670_s3 + $0x318] sm:$0xff] (!%p348_p3)   ;;  %v5841_v17 = vld [vmem:[%s7670_s3 + $0x320] sm:$0xff] (!%p348_p3)   ;;  %v5845_v21 = vld [vmem:[%s7670_s3 + $0x328] sm:$0xff] (!%p348_p3)   ;;  %s451_s19 = sadd.s32 (!%p348_p3), 1, %s6066_s27 }
   0xf   : > { %v5838_v14 = vld [vmem:[%s7670_s3 + $0x258] sm:$0xff] (!%p348_p3)   ;;  %v5842_v18 = vld [vmem:[%s7670_s3 + $0x260] sm:$0xff] (!%p348_p3)   ;;  %v5846_v22 = vld [vmem:[%s7670_s3 + $0x268] sm:$0xff] (!%p348_p3)   ;;  %p6870_p10 = scmp.lt.s32.totalorder (!%p348_p3), %s451_s19, 7 }
  0x10   : > { %5118 = vmatpush3.bf16.msra.mxu0 %v5830_v6  ;;  %v5839_v15 = vld [vmem:[%s7670_s3 + $0x2d8] sm:$0xff]   ;;  %s7692_s28 = smov (!%p430_p5, %s6070_s28), 1  ;;  %v5843_v19 = vld [vmem:[%s7670_s3 + $0x2e0] sm:$0xff]   ;;  %v5847_v23 = vld [vmem:[%s7670_s3 + $0x2e8] sm:$0xff]  }
  0x11   : > { %5158 = vmatpush3.bf16.msra.mxu1 %v5831_v7  ;;  %5119 = vmatprep.subr.bf16.mxu0 %v5832_v8  ;;  %s6226_s18 = scalar_select %p444_p6, %s6066_s27, 7  ;;  %v5848_v24 = vld [vmem:[%s7670_s3 + $0x2b0] sm:$0xff]   ;;  %v5852_v28 = vld [vmem:[%s7670_s3 + $0x2b8] sm:$0xff]   ;;  %v6288_v32 = vld [vmem:[%s7671_s4] ss:$0 sm:$0xff] }
  0x12   : > { %5159 = vmatprep.subr.bf16.mxu1 %v5833_v9  ;;  %s6238_s25 = sshll.u32 %s7692_s28, 6  ;;  %v5849_v25 = vld [vmem:[%s7670_s3 + $0x330] sm:$0xff]   ;;  %v5853_v29 = vld [vmem:[%s7670_s3 + $0x338] sm:$0xff]   ;;  %v5856_v34 = vld [vmem:[%s7670_s3 + $0x380] sm:$0xff]   ;;  %s7696_s19 = smov (!%p6870_p10, %s451_s19), 7 }
  0x13   : > { %s4414_s13 = sshll.u32 %s6226_s18, 3  ;;  %v5850_v26 = vld [vmem:[%s7670_s3 + $0x270] sm:$0xff]   ;;  %v5854_v30 = vld [vmem:[%s7670_s3 + $0x278] sm:$0xff]   ;;  %v6297_v35 = vld [vmem:[%s7672_s5] ss:$0 sm:$0xff]  ;;  %s7698_s19 = smov (!%p6870_p10, %s7696_s19), 7 }
  0x14   : > { %5120 = vmatpush3.bf16.msra.mxu0 %v5834_v10  ;;  %s6254_s21 = sadd.s32 %s4414_s13, %s6238_s25  ;;  %v5851_v27 = vld [vmem:[%s7670_s3 + $0x2f0] sm:$0xff]   ;;  %v5855_v31 = vld [vmem:[%s7670_s3 + $0x2f8] sm:$0xff]   ;;  %v5857_v40 = vld [vmem:[%s7670_s3 + $0x400] sm:$0xff]   ;;  %s4420_s14 = sshll.u32 %s7698_s19, 3 }
  0x15   : > { %5160 = vmatpush3.bf16.msra.mxu1 %v5835_v11  ;;  %5121 = vmatprep.subr.bf16.mxu0 %v5836_v12  ;;  %s4416_s15 = sshll.u32 %s6254_s21, 2  ;;  %vm6302_vm3 = vmand %vm636_vm0, %vm637_vm2  ;;  %v5863_v38 = vld [vmem:[%s7670_s3 + $0x3c8] sm:$0xff]   ;;  %s460_s17 = sadd.s32 %s4420_s14, %s6238_s25  ;;  %v6009_v46 = vld [vmem:[%s7670_s3 + $0x650] sm:$0xff]  }
  0x16   : > { %5161 = vmatprep.subr.bf16.mxu1 %v5837_v13  ;;  %s6280_s26 = scalar_lea.vmem %s7668_s1, %s4416_s15  ;;  %vm6311_vm5 = vmand %vm648_vm1, %vm649_vm4  ;;  %v639_v47 = vsel %vm6302_vm3, 0, %v567_v39  ;;  %s4426_s21 = sshll.u32 %s7692_s28, 3 }
  0x17   : > { %v5052_v33 = vld [vmem:[%s6280_s26] sm:$0xff]   ;;  %v6319_v52 = vsel %vm6311_vm5, %v639_v47, 0  ;;  %v5106_v53 = vld [vmem:[%s6280_s26 + $0x8] sm:$0xff]   ;;  %s7018_s19 = scalar_select %p444_p6, 1, 0 }
  0x18   : > { %5122 = vmatpush3.bf16.msra.mxu0 %v5838_v14  ;;  %v5053_v36 = vunpack.c.l.bf16 %v5052_v33  ;;  %v5054_v37 = vunpack.c.h.bf16 %v5052_v33  ;;  %v5057_v54 = vunpack.c.l.bf16 %v5106_v53  ;;  %v5058_v55 = vunpack.c.h.bf16 %v5106_v53  ;;  %v5861_v33 = vld [vmem:[%s7670_s3 + $0x408] sm:$0xff]  }
  0x19   : > { %5162 = vmatpush3.bf16.msra.mxu1 %v5839_v15  ;;  %5123 = vmatprep.subr.bf16.mxu0 %v5840_v16  ;;  %v931_v60 = vshll.u32 %v6319_v52, 16  ;;  %v929_v5 = vshrl.u32 %v6319_v52, 16  ;;  %v6329_v7 = vrot.slane %v6319_v52, 1  ;;  %s830_s13 = scvt.s32.f32 %s7018_s19 }
  0x1a   : > { %5163 = vmatprep.subr.bf16.mxu1 %v5841_v17  ;;  %v676_v42 = vmul.f32 %v5053_v36, %v6288_v32  ;;  %v677_v43 = vmul.f32 %v5054_v37, %v6288_v32  ;;  %v678_v61 = vmul.f32 %v5057_v54, %v6288_v32  ;;  %v679_v62 = vmul.f32 %v5058_v55, %v6288_v32  ;;  %v5858_v37 = vld [vmem:[%s7670_s3 + $0x340] sm:$0xff]   ;;  %v5862_v55 = vld [vmem:[%s7670_s3 + $0x348] sm:$0xff]  }
  0x1b   : > { %v933_v6 = vrot.slane %v931_v60, 1 }
  0x1c   : > { %5124 = vmatpush3.bf16.msra.mxu0 %v5842_v18  ;;  %v684_v44 = vadd.f32 %v6297_v35, %v676_v42  ;;  %v685_v45 = vadd.f32 %v6297_v35, %v677_v43  ;;  %v686_v1 = vadd.f32 %v6297_v35, %v678_v61  ;;  %v687_v2 = vadd.f32 %v6297_v35, %v679_v62 }
  0x1d   : > { %5164 = vmatpush3.bf16.msra.mxu1 %v5843_v19  ;;  %5125 = vmatprep.subr.bf16.mxu0 %v5844_v20  ;;  %v5859_v19 = vld [vmem:[%s7670_s3 + $0x3c0] sm:$0xff]   ;;  %v6353_v20 = vor.u32 %v933_v6, %v929_v5 }
  0x1e   : > { %5165 = vmatprep.subr.bf16.mxu1 %v5845_v21  ;;  %v692_v48 = vmax.f32 %v684_v44, 0.0  ;;  %v693_v49 = vmax.f32 %v685_v45, 0.0  ;;  %v694_v8 = vmax.f32 %v686_v1, 0.0  ;;  %v695_v9 = vmax.f32 %v687_v2, 0.0  ;;  %v5860_v44 = vld [vmem:[%s7670_s3 + $0x388] sm:$0xff]   ;;  %v5867_v1 = vld [vmem:[%s7670_s3 + $0x3d0] sm:$0xff]  }
  0x20   : > { %5126 = vmatpush3.bf16.msra.mxu0 %v5846_v22  ;;  %v700_v50 = vpack.c.bf16 %v692_v48, %v692_v48  ;;  %v701_v51 = vpack.c.bf16 %v693_v49, %v693_v49  ;;  %v702_v14 = vpack.c.bf16 %v694_v8, %v694_v8  ;;  %v703_v15 = vpack.c.bf16 %v695_v9, %v695_v9  ;;  %v5865_v49 = vld [vmem:[%s7670_s3 + $0x410] sm:$0xff]  }
  0x21   : > { %5166 = vmatpush3.bf16.msra.mxu1 %v5847_v23  ;;  %5127 = vmatprep.subr.bf16.mxu0 %v5848_v24  ;;  %v5107_v24 = vld [vmem:[%s6280_s26 + $0x10] sm:$0xff]  }
  0x22   : > { %5167 = vmatprep.subr.bf16.mxu1 %v5849_v25  ;;  %v709_v56 = vshrl.u32 %v700_v50, 16  ;;  %v712_v57 = vshll.u32 %v700_v50, 16  ;;  %v716_v58 = vshrl.u32 %v701_v51, 16  ;;  %v719_v59 = vshll.u32 %v701_v51, 16  ;;  %v5864_v9 = vld [vmem:[%s7670_s3 + $0x390] sm:$0xff]  }
  0x23   : > { %v723_v23 = vshrl.u32 %v702_v14, 16  ;;  %v5062_v42 = vunpack.c.h.bf16 %v5107_v24 }
  0x24   : > { %5128 = vmatpush3.bf16.msra.mxu0 %v5850_v26  ;;  %v711_v63 = vrot.slane %v709_v56, 7  ;;  %v718_v0 = vrot.slane %v716_v58, 7  ;;  %v726_v26 = vshll.u32 %v702_v14, 16 }
  0x25   : > { %5168 = vmatpush3.bf16.msra.mxu1 %v5851_v27  ;;  %5129 = vmatprep.subr.bf16.mxu0 %v5852_v28  ;;  %v730_v27 = vshrl.u32 %v703_v15, 16  ;;  %v733_v28 = vshll.u32 %v703_v15, 16  ;;  %v681_v51 = vmul.f32 %v5062_v42, %v6288_v32 }
  0x26   : > { %5169 = vmatprep.subr.bf16.mxu1 %v5853_v29  ;;  %v714_v3 = vor.u32 %v712_v57, %v711_v63  ;;  %v721_v4 = vor.u32 %v719_v59, %v718_v0 }
  0x27   : > { %v732_v39 = vrot.slane %v730_v27, 7  ;;  %v689_v59 = vadd.f32 %v6297_v35, %v681_v51 }
  0x28   : > { %5130 = vmatpush3.bf16.msra.mxu0 %v5854_v30  ;;  %v772_v10 = vsel %vm6302_vm3, 0, %v714_v3  ;;  %v773_v11 = vsel %vm6302_vm3, 0, %v721_v4  ;;  %v5108_v4 = vld [vmem:[%s6280_s26 + $0x18] sm:$0xff]   ;;  %s6430_s26 = scalar_select %p428_p7, %s6344_s12, 0 }
  0x29   : > { %5170 = vmatpush3.bf16.msra.mxu1 %v5855_v31  ;;  %5195 = vmatprep.subr.bf16.mxu0 %v5856_v34  ;;  %v6337_v12 = vsel %vm6311_vm5, %v772_v10, 0  ;;  %v6341_v13 = vsel %vm6311_vm5, %v773_v11, 0  ;;  %v725_v34 = vrot.slane %v723_v23, 7  ;;  %v735_v48 = vor.u32 %v733_v28, %v732_v39  ;;  %v5869_v10 = vld [vmem:[%s7670_s3 + $0x418] sm:$0xff]  }
  0x2a   : > { %5235 = vmatprep.subr.bf16.mxu1 %v5857_v40  ;;  %v4577_v16 = vcombine.low %v6337_v12, %v6341_v13  ;;  %v1181_v17 = vshrl.u32 %v6337_v12, 16  ;;  %v1183_v18 = vshll.u32 %v6337_v12, 16  ;;  %v1190_v21 = vshll.u32 %v6341_v13, 16  ;;  %v5871_v11 = vld [vmem:[%s7670_s3 + $0x3d8] sm:$0xff]   ;;  %s7694_s26 = smov (!%p4406_p8, %s6430_s26), 7 }
  0x2b   : > { %v1236_v22 = vrot.slane %v6337_v12, 1  ;;  %v1188_v29 = vshrl.u32 %v6341_v13, 16  ;;  %v5061_v40 = vunpack.c.l.bf16 %v5107_v24  ;;  %v4574_v43 = vcombine.low %v6319_v52, %v6337_v12  ;;  %v5868_v24 = vld [vmem:[%s7670_s3 + $0x398] sm:$0xff]   ;;  %s4411_s16 = sshll.u32 %s7694_s26, 3  ;;  %v5892_v12 = vld [vmem:[%s7670_s3 + $0x48] sm:$0xff]  }
  0x2c   : > { %2004 = vmatprep.mubr.bf16.mxu1 %v4577_v16  ;;  %v1185_v25 = vrot.slane %v1183_v18, 1  ;;  %v1192_v30 = vrot.slane %v1190_v21, 1  ;;  %v728_v45 = vor.u32 %v726_v26, %v725_v34  ;;  %v1237_v54 = vrot.slane %v6341_v13, 1  ;;  %v5873_v21 = vld [vmem:[%s7670_s3 + $0x420] sm:$0xff]   ;;  %v5870_v39 = vld [vmem:[%s7670_s3 + $0x358] sm:$0xff]   ;;  %s436_s20 = sadd.s32 %s6238_s25, %s4411_s16  ;;  %s4422_s25 = sshll.u32 %s460_s17, 2 }
  0x2d   : > { %v4576_v31 = vcombine.low %v6329_v7, %v1236_v22  ;;  %v680_v50 = vmul.f32 %v5061_v40, %v6288_v32  ;;  %v775_v56 = vsel %vm6302_vm3, 0, %v735_v48  ;;  %v697_v3 = vmax.f32 %v689_v59, 0.0  ;;  %s4413_s24 = sshll.u32 %s436_s20, 2 }
  0x2e   : > { %v6365_v36 = vor.u32 %v1185_v25, %v1181_v17  ;;  %v774_v53 = vsel %vm6302_vm3, 0, %v728_v45  ;;  %v6402_v60 = vsel %vm6311_vm5, %v775_v56, 0  ;;  %v6413_v5 = vor.u32 %v1192_v30, %v1188_v29  ;;  %v5872_v45 = vld [vmem:[%s7670_s3 + $0x3a0] sm:$0xff]   ;;  %s6614_s22 = scalar_lea.vmem %s7667_s0, %s4413_s24 }
  0x2f   : > { %2005 = vmatmul.mubr.bf16.vlgmr.msra.gmra.mrb[0].mxu1 %v4576_v31  ;;  %v6396_v57 = vsel %vm6311_vm5, %v774_v53, 0  ;;  %v688_v58 = vadd.f32 %v6297_v35, %v680_v50  ;;  %v705_v15 = vpack.c.bf16 %v697_v3, %v697_v3  ;;  %v5065_v16 = vunpack.c.l.bf16 %v5108_v4  ;;  %v5874_v3 = vld [vmem:[%s7670_s3 + $0x360] sm:$0xff]   ;;  %s6619_s20 = scalar_select %p498_p9, 1, 0 }
  0x30   : > { %v4575_v47 = vcombine.low %v6353_v20, %v6365_v36  ;;  %5236 = vmatpush3.bf16.msra.mxu1 %v5859_v19  ;;  %v1195_v61 = vshrl.u32 %v6396_v57, 16  ;;  %v1197_v62 = vshll.u32 %v6396_v57, 16  ;;  %v1238_v63 = vrot.slane %v6396_v57, 1  ;;  %v5866_v19 = vld [vmem:[%s7670_s3 + $0x350] sm:$0xff]  }
  0x31   : > { %5237 = vmatprep.subr.bf16.mxu1 %v5861_v33  ;;  %v4583_v0 = vcombine.low %v6396_v57, %v6402_v60  ;;  %v696_v2 = vmax.f32 %v688_v58, 0.0  ;;  %v6441_v18 = vcombine.low %v6341_v13, %v6396_v57  ;;  %v5066_v23 = vunpack.c.h.bf16 %v5108_v4  ;;  %v5879_v4 = vld [vmem:[%s7670_s3 + $0x3e8] sm:$0xff]   ;;  %s546_s12 = scvt.s32.f32 %s6619_s20  ;;  %v5898_v57 = vld [vmem:[%s7670_s3 + $0x58] sm:$0xff]  }
  0x32   : > { %1939 = vmatprep.mubr.bf16.mxu0 %v4575_v47  ;;  %v1199_v6 = vrot.slane %v1197_v62, 1  ;;  %v6419_v8 = vcombine.low %v1237_v54, %v1238_v63  ;;  %v744_v27 = vshrl.u32 %v705_v15, 16  ;;  %v747_v28 = vshll.u32 %v705_v15, 16  ;;  %v5877_v47 = vld [vmem:[%s7670_s3 + $0x428] sm:$0xff]  }
  0x33   : > { %1940 = vmatmul.mubr.bf16.vlgmr.msra.gmra.mrb[0].mxu0 %v4574_v43  ;;  %2012 = vmatprep.mubr.bf16.mxu1 %v4583_v0  ;;  %v704_v14 = vpack.c.bf16 %v696_v2, %v696_v2  ;;  %v682_v30 = vmul.f32 %v5065_v16, %v6288_v32  ;;  %v1204_v34 = vshll.u32 %v6402_v60, 16  ;;  %v5876_v16 = vld [vmem:[%s7670_s3 + $0x3a8] sm:$0xff]   ;;  %v4578_v13 = vcombine.low %v6365_v36, %v6413_v5 }
  0x34   : > { %5196 = vmatpush3.bf16.msra.mxu0 %v5858_v37  ;;  %5238 = vmatpush3.bf16.msra.mxu1 %v5863_v38  ;;  %v6436_v17 = vor.u32 %v1199_v6, %v1195_v61  ;;  %v746_v33 = vrot.slane %v744_v27, 7  ;;  %v5875_v37 = vld [vmem:[%s7670_s3 + $0x3e0] sm:$0xff]   ;;  %v683_v38 = vmul.f32 %v5066_v23, %v6288_v32 }
  0x35   : > { %5197 = vmatprep.subr.bf16.mxu0 %v5860_v44  ;;  %5239 = vmatprep.subr.bf16.mxu1 %v5865_v49  ;;  %v737_v25 = vshrl.u32 %v704_v14, 16  ;;  %v740_v26 = vshll.u32 %v704_v14, 16  ;;  %v690_v40 = vadd.f32 %v6297_v35, %v682_v30  ;;  %v1202_v44 = vshrl.u32 %v6402_v60, 16 }
  0x36   : > { %v6454_v29 = vcombine.low %v6413_v5, %v6436_v17  ;;  %v749_v43 = vor.u32 %v747_v28, %v746_v33  ;;  %v691_v48 = vadd.f32 %v6297_v35, %v683_v38  ;;  %v1239_v49 = vrot.slane %v6402_v60, 1  ;;  %v5878_v28 = vld [vmem:[%s7670_s3 + $0x368] sm:$0xff]  }
  0x37   : > { %2013 = vmatmul.mubr.bf16.gmra.mrb[4].mxu1 %v6419_v8  ;;  %v739_v31 = vrot.slane %v737_v25, 7  ;;  %v698_v50 = vmax.f32 %v690_v40, 0.0 }
  0x38   : > { %5198 = vmatpush3.bf16.msra.mxu0 %v5862_v55  ;;  %5240 = vmatpush3.bf16.msra.mxu1 %v5867_v1  ;;  %v777_v53 = vsel %vm6302_vm3, 0, %v749_v43  ;;  %v1206_v55 = vrot.slane %v1204_v34, 1  ;;  %v699_v56 = vmax.f32 %v691_v48, 0.0  ;;  %v4585_v36 = vcombine.low %v1238_v63, %v1239_v49 }
  0x39   : > { %5199 = vmatprep.subr.bf16.mxu0 %v5864_v9  ;;  %5241 = vmatprep.subr.bf16.mxu1 %v5869_v10  ;;  %v742_v42 = vor.u32 %v740_v26, %v739_v31  ;;  %v6487_v59 = vsel %vm6311_vm5, %v777_v53, 0  ;;  %v706_v61 = vpack.c.bf16 %v698_v50, %v698_v50  ;;  %v5883_v26 = vld [vmem:[%s7670_s3 + $0x3f0] sm:$0xff]   ;;  %v5885_v31 = vld [vmem:[%s7670_s3 + $0x438] sm:$0xff]  }
  0x3a   : > { %1947 = vmatprep.mubr.bf16.mxu0 %v6454_v29  ;;  %v707_v6 = vpack.c.bf16 %v699_v56, %v699_v56  ;;  %v1218_v25 = vshll.u32 %v6487_v59, 16  ;;  %v1216_v30 = vshrl.u32 %v6487_v59, 16  ;;  %v1241_v38 = vrot.slane %v6487_v59, 1  ;;  %v5882_v56 = vld [vmem:[%s7670_s3 + $0x370] sm:$0xff]  }
  0x3b   : > { %1948 = vmatmul.mubr.bf16.gmra.mrb[4].mxu0 %v6441_v18  ;;  %v776_v51 = vsel %vm6302_vm3, 0, %v742_v42  ;;  %v751_v9 = vshrl.u32 %v706_v61, 16  ;;  %v754_v10 = vshll.u32 %v706_v61, 16 }
  0x3c   : > { %5242 = vmatpush3.bf16.msra.mxu1 %v5871_v11  ;;  %5200 = vmatpush3.bf16.msra.mxu0 %v5866_v19  ;;  %v6483_v58 = vsel %vm6311_vm5, %v776_v51, 0  ;;  %v6505_v11 = vor.u32 %v1206_v55, %v1202_v44  ;;  %v5881_v19 = vld [vmem:[%s7670_s3 + $0x430] sm:$0xff]   ;;  %v758_v23 = vshrl.u32 %v707_v6, 16  ;;  %v1220_v44 = vrot.slane %v1218_v25, 1 }
  0x3d   : > { %5243 = vmatprep.subr.bf16.mxu1 %v5873_v21  ;;  %5201 = vmatprep.subr.bf16.mxu0 %v5868_v24  ;;  %v4589_v62 = vcombine.low %v6483_v58, %v6487_v59  ;;  %v1209_v0 = vshrl.u32 %v6483_v58, 16  ;;  %v1211_v1 = vshll.u32 %v6483_v58, 16  ;;  %v1240_v2 = vrot.slane %v6483_v58, 1  ;;  %v5894_v25 = vld [vmem:[%s7670_s3 + $0x450] sm:$0xff]  }
  0x3e   : > { %v753_v21 = vrot.slane %v751_v9, 7  ;;  %v761_v24 = vshll.u32 %v707_v6, 16  ;;  %v6535_v33 = vcombine.low %v6402_v60, %v6483_v58  ;;  %v5896_v60 = vld [vmem:[%s7670_s3 + $0x10] sm:$0xff]  }
  0x3f   : > { %2020 = vmatprep.mubr.bf16.mxu1 %v4589_v62  ;;  %v1213_v14 = vrot.slane %v1211_v1, 1  ;;  %v6511_v15 = vcombine.low %v1239_v49, %v1240_v2  ;;  %v6567_v62 = vor.u32 %v1220_v44, %v1216_v30  ;;  %v5901_v44 = vld [vmem:[%s7670_s3 + $0x60] sm:$0xff]  }
  0x40   : > { %5244 = vmatpush3.bf16.msra.mxu1 %v5875_v37  ;;  %5202 = vmatpush3.bf16.msra.mxu0 %v5870_v39  ;;  %v756_v34 = vor.u32 %v754_v10, %v753_v21  ;;  %v760_v37 = vrot.slane %v758_v23, 7  ;;  %v5880_v39 = vld [vmem:[%s7670_s3 + $0x3b0] sm:$0xff]  }
  0x41   : > { %5245 = vmatprep.subr.bf16.mxu1 %v5877_v47  ;;  %5203 = vmatprep.subr.bf16.mxu0 %v5872_v45  ;;  %v6523_v27 = vor.u32 %v1213_v14, %v1209_v0  ;;  %v5887_v47 = vld [vmem:[%s7670_s3 + $0x3f8] sm:$0xff]   ;;  %v5895_v21 = vld [vmem:[%s7670_s3 + $0x50] sm:$0xff]  }
  0x42   : > { %2021 = vmatmul.mubr.bf16.gmra.mrb[8].mxu1 %v6511_v15  ;;  %v763_v42 = vor.u32 %v761_v24, %v760_v37  ;;  %v778_v43 = vsel %vm6302_vm3, 0, %v756_v34  ;;  %v5886_v14 = vld [vmem:[%s7670_s3 + $0x378] sm:$0xff]   ;;  %v4584_v34 = vcombine.low %v6436_v17, %v6505_v11  ;;  %v6654_v37 = vstv %s546_s12 }
  0x43   : > { %v4587_v40 = vcombine.low %v6505_v11, %v6523_v27  ;;  %v6547_v45 = vsel %vm6311_vm5, %v778_v43, 0  ;;  %v4591_v17 = vcombine.low %v1240_v2, %v1241_v38  ;;  %v5902_v2 = vld [vmem:[%s7670_s3 + $0x20] sm:$0xff]  }
  0x44   : > { %5204 = vmatpush3.bf16.msra.mxu0 %v5874_v3  ;;  %5246 = vmatpush3.bf16.msra.mxu1 %v5879_v4  ;;  %v779_v48 = vsel %vm6302_vm3, 0, %v763_v42  ;;  %v1223_v50 = vshrl.u32 %v6547_v45, 16  ;;  %v1225_v51 = vshll.u32 %v6547_v45, 16  ;;  %v1242_v53 = vrot.slane %v6547_v45, 1  ;;  %v5884_v3 = vld [vmem:[%s7670_s3 + $0x3b8] sm:$0xff]   ;;  %v5889_v4 = vld [vmem:[%s7670_s3 + $0x40] sm:$0xff]  }
  0x45   : > { %5205 = vmatprep.subr.bf16.mxu0 %v5876_v16  ;;  %5247 = vmatprep.subr.bf16.mxu1 %v5881_v19  ;;  %v6560_v55 = vsel %vm6311_vm5, %v779_v48, 0  ;;  %v6587_v9 = vcombine.low %v6487_v59, %v6547_v45  ;;  %v4579_v16 = vcombine.low %v1236_v22, %v1237_v54  ;;  %v5888_v19 = vld [vmem:[%s7670_s3 + $0x440] sm:$0xff]   ;;  %v5893_v22 = vld [vmem:[%s7670_s3 + $0x8] sm:$0xff]   ;;  %v5897_v42 = vld [vmem:[%s7670_s3 + $0x458] sm:$0xff]  }
  0x46   : > { %1955 = vmatprep.mubr.bf16.mxu0 %v4587_v40  ;;  %v4595_v61 = vcombine.low %v6547_v45, %v6560_v55  ;;  %v1227_v0 = vrot.slane %v1225_v51, 1  ;;  %v6573_v1 = vcombine.low %v1241_v38, %v1242_v53  ;;  %v5891_v54 = vld [vmem:[%s7670_s3 + $0x448] sm:$0xff]   ;;  %v1246_v5 = vshll.u32 %v6560_v55, 16  ;;  %v5900_v59 = vld [vmem:[%s7670_s3 + $0x460] sm:$0xff]   ;;  %v5906_v45 = vld [vmem:[%s7670_s3 + $0x470] sm:$0xff]  }
  0x47   : > { %1956 = vmatmul.mubr.bf16.gmra.mrb[8].mxu0 %v6535_v33 }
  0x48   : > { %5248 = vmatpush3.bf16.msra.mxu1 %v5883_v26  ;;  %5206 = vmatpush3.bf16.msra.mxu0 %v5878_v28  ;;  %v6582_v6 = vor.u32 %v1227_v0, %v1223_v50  ;;  %v1244_v26 = vshrl.u32 %v6560_v55, 16  ;;  %v1248_v28 = vrot.slane %v1246_v5, 1 }
  0x49   : > { %5249 = vmatprep.subr.bf16.mxu1 %v5885_v31  ;;  %5207 = vmatprep.subr.bf16.mxu0 %v5880_v39  ;;  %v5899_v39 = vld [vmem:[%s7670_s3 + $0x18] sm:$0xff]  }
  0x4a   : > { %2028 = vmatprep.mubr.bf16.mxu1 %v4595_v61  ;;  %v4593_v10 = vcombine.low %v6567_v62, %v6582_v6  ;;  %v6666_v11 = vor.u32 %v1248_v28, %v1244_v26  ;;  %v5904_v61 = vld [vmem:[%s7670_s3 + $0x68] sm:$0xff]  }
  0x4b   : > { %2029 = vmatmul.mubr.bf16.gmra.mrb[12].mxu1 %v6573_v1 }
  0x4c   : > { %5250 = vmatpush3.bf16.msra.mxu1 %v5887_v47  ;;  %5208 = vmatpush3.bf16.msra.mxu0 %v5882_v56  ;;  %v4599_v0 = vcombine.low %v6666_v11, %v6353_v20 }
  0x4d   : > { %5209 = vmatprep.subr.bf16.mxu0 %v5884_v3  ;;  %2134 = vmatprep.mubr.bf16.mxu1 %v6454_v29  ;;  %v5890_v29 = vld [vmem:[%s7670_s3] sm:$0xff]   ;;  %v1251_v3 = vrot.slane %v6560_v55, 1 }
  0x4e   : > { %5287 = vmatprep.subr.bf16.mxu1 %v5889_v4  ;;  %1963 = vmatprep.mubr.bf16.mxu0 %v4593_v10 }
  0x4f   : > { %1964 = vmatmul.mubr.bf16.gmra.mrb[12].mxu0 %v6587_v9 }
  0x50   : > { %5210 = vmatpush3.bf16.msra.mxu0 %v5886_v14  ;;  %2069 = vmatprep.mubr.bf16.mxu0 %v4579_v16 }
  0x51   : > { %5631 = vmatprep.subr.bf16.mxu0 %v5888_v19 }
  0x53   : > { %2135 = vmatmul.mubr.bf16.vlgmr.msra.gmra.mrb[16].mxu1 %v6441_v18  ;;  %v5036_v18 = vld [vmem:[%s6614_s22] sm:$0xff]  }
  0x54   : > { %5288 = vmatpush3.bf16.msra.mxu1 %v5890_v29  ;;  %2142 = vmatprep.mubr.bf16.mxu1 %v4587_v40  ;;  %v5037_v23 = vunpack.c.l.bf16 %v5036_v18  ;;  %v5038_v24 = vunpack.c.h.bf16 %v5036_v18  ;;  %v4590_v29 = vcombine.low %v6523_v27, %v6567_v62  ;;  %v4597_v27 = vcombine.low %v1242_v53, %v1251_v3  ;;  %v5908_v53 = vld [vmem:[%s7670_s3 + $0x30] sm:$0xff]  }
  0x55   : > { %5289 = vmatprep.subr.bf16.mxu1 %v5892_v12  ;;  %v5905_v12 = vld [vmem:[%s7670_s3 + $0x28] sm:$0xff]  }
  0x56   : > { %v514_v63 = vmul.f32 %v5037_v23, %v6288_v32  ;;  %v515_v49 = vmul.f32 %v5038_v24, %v6288_v32  ;;  %v4598_v24 = vcombine.low %v6560_v55, %v6319_v52 }
  0x57   : > { %2070 = vmatmul.mubr.bf16.vlgmr.msra.gmra.mrb[16].mxu0 %v4578_v13 }
  0x58   : > { %5632 = vmatpush3.bf16.msra.mxu0 %v5888_v19  ;;  %5290 = vmatpush3.bf16.msra.mxu1 %v5893_v22  ;;  %v529_v30 = vadd.f32 %v6297_v35, %v514_v63  ;;  %v530_v31 = vadd.f32 %v6297_v35, %v515_v49 }
  0x59   : > { %5633 = vmatprep.subr.bf16.mxu0 %v5891_v54  ;;  %2077 = vmatprep.mubr.bf16.mxu0 %v4585_v36 }
  0x5a   : > { %5291 = vmatprep.subr.bf16.mxu1 %v5895_v21  ;;  %v537_v40 = vmax.f32 %v529_v30, 0.0  ;;  %v538_v43 = vmax.f32 %v530_v31, 0.0  ;;  %v5104_v21 = vld [vmem:[%s6614_s22 + $0x10] sm:$0xff]  }
  0x5b   : > { %2143 = vmatmul.mubr.bf16.gmra.mrb[20].mxu1 %v6535_v33  ;;  %v5103_v33 = vld [vmem:[%s6614_s22 + $0x8] sm:$0xff]   ;;  %v5046_v28 = vunpack.c.h.bf16 %v5104_v21 }
  0x5c   : > { %5634 = vmatpush3.bf16.msra.mxu0 %v5891_v54  ;;  %5292 = vmatpush3.bf16.msra.mxu1 %v5896_v60  ;;  %v548_v47 = vmul.f32 %v6654_v37, %v537_v40  ;;  %v5041_v48 = vunpack.c.l.bf16 %v5103_v33  ;;  %v5042_v50 = vunpack.c.h.bf16 %v5103_v33  ;;  %v549_v58 = vmul.f32 %v6654_v37, %v538_v43  ;;  %v5909_v33 = vld [vmem:[%s7670_s3 + $0x478] sm:$0xff]  }
  0x5d   : > { %5635 = vmatprep.subr.bf16.mxu0 %v5894_v25  ;;  %5293 = vmatprep.subr.bf16.mxu1 %v5898_v57  ;;  %v5045_v60 = vunpack.c.l.bf16 %v5104_v21  ;;  %v5910_v57 = vld [vmem:[%s7670_s3 + $0x78] sm:$0xff]  }
  0x5e   : > { %2150 = vmatprep.mubr.bf16.mxu1 %v4593_v10  ;;  %v556_v38 = vpack.c.bf16 %v548_v47, %v548_v47  ;;  %v516_v51 = vmul.f32 %v5041_v48, %v6288_v32  ;;  %v517_v56 = vmul.f32 %v5042_v50, %v6288_v32  ;;  %v557_v4 = vpack.c.bf16 %v549_v58, %v549_v58  ;;  %v5911_v47 = vld [vmem:[%s7670_s3 + $0x38] sm:$0xff]   ;;  %v6753_v58 = vld [vmem:[%s7671_s4] ss:$0 sm:$0xff] }
  0x5f   : > { %2078 = vmatmul.mubr.bf16.gmra.mrb[20].mxu0 %v4584_v34  ;;  %v518_v34 = vmul.f32 %v5045_v60, %v6288_v32  ;;  %v6743_v32 = vld [vmem:[%s7672_s5] ss:$0 sm:$0xff]  ;;  %v5919_v60 = vld [vmem:[%s7670_s3 + $0x108] sm:$0xff]  }
  0x60   : > { %5636 = vmatpush3.bf16.msra.mxu0 %v5894_v25  ;;  %5294 = vmatpush3.bf16.msra.mxu1 %v5899_v39  ;;  %v572_v10 = vshrl.u32 %v556_v38, 16  ;;  %v575_v14 = vshll.u32 %v556_v38, 16  ;;  %v531_v16 = vadd.f32 %v6297_v35, %v516_v51  ;;  %v532_v19 = vadd.f32 %v6297_v35, %v517_v56  ;;  %v5903_v35 = vld [vmem:[%s7670_s3 + $0x468] sm:$0xff]   ;;  %v5913_v38 = vld [vmem:[%s7670_s3 + $0x140] sm:$0xff]  }
  0x61   : > { %5637 = vmatprep.subr.bf16.mxu0 %v5897_v42  ;;  %2085 = vmatprep.mubr.bf16.mxu0 %v4591_v17  ;;  %v579_v13 = vshrl.u32 %v557_v4, 16  ;;  %v582_v22 = vshll.u32 %v557_v4, 16  ;;  %v4596_v39 = vcombine.low %v6582_v6, %v6666_v11  ;;  %v533_v6 = vadd.f32 %v6743_v32, %v518_v34  ;;  %v5915_v4 = vld [vmem:[%s7670_s3 + $0x100] sm:$0xff]  }
  0x62   : > { %5295 = vmatprep.subr.bf16.mxu1 %v5901_v44  ;;  %v574_v54 = vrot.slane %v572_v10, 7  ;;  %v539_v36 = vmax.f32 %v531_v16, 0.0  ;;  %v540_v23 = vmax.f32 %v532_v19, 0.0  ;;  %v5912_v19 = vld [vmem:[%s7670_s3 + $0xc0] sm:$0xff]  }
  0x63   : > { %2151 = vmatmul.mubr.bf16.gmra.mrb[24].mxu1 %v6587_v9  ;;  %v581_v62 = vrot.slane %v579_v13, 7  ;;  %v5907_v9 = vld [vmem:[%s7670_s3 + $0x70] sm:$0xff]   ;;  %v541_v51 = vmax.f32 %v533_v6, 0.0 }
  0x64   : > { %5638 = vmatpush3.bf16.msra.mxu0 %v5897_v42  ;;  %5296 = vmatpush3.bf16.msra.mxu1 %v5902_v2  ;;  %v577_v5 = vor.u32 %v575_v14, %v574_v54  ;;  %v550_v18 = vmul.f32 %v6654_v37, %v539_v36  ;;  %v551_v26 = vmul.f32 %v6654_v37, %v540_v23  ;;  %v6776_v36 = vld [vmem:[%s6614_s22 + $0x18] sm:$0xff]   ;;  %v5920_v6 = vld [vmem:[%s7670_s3 + $0xd0] sm:$0xff]   ;;  %s7029_s22 = scalar_lea.vmem %s7669_s2, %s4422_s25  ;;  %s474_s25 = scalar_lea.vmem %s7673_s6, %s4416_s15 }
  0x65   : > { %5639 = vmatprep.subr.bf16.mxu0 %v5900_v59  ;;  %5297 = vmatprep.subr.bf16.mxu1 %v5904_v61  ;;  %v584_v25 = vor.u32 %v582_v22, %v581_v62  ;;  %v519_v2 = vmul.f32 %v6753_v58, %v5046_v28  ;;  %v5916_v28 = vld [vmem:[%s7670_s3 + $0xc8] sm:$0xff]   ;;  %s480_s15 = sadd.s32 %s4426_s21, %s6226_s18 }
  0x66   : > { %2158 = vmatprep.mubr.bf16.mxu1 %v4599_v0  ;;  %v640_v63 = vsel %vm6302_vm3, 0, %v577_v5  ;;  %v558_v49 = vpack.c.bf16 %v550_v18, %v550_v18  ;;  %v559_v11 = vpack.c.bf16 %v551_v26, %v551_v26  ;;  %v5049_v18 = vunpack.c.l.bf16 %v6776_v36  ;;  %s481_s19 = scalar_lea.vmem %s7674_s7, %s480_s15  ;;  %s488_s23 = scalar_lea.vmem %s7675_s8, %s480_s15 }
  0x67   : > { %2086 = vmatmul.mubr.bf16.gmra.mrb[24].mxu0 %v4590_v29  ;;  %v6724_v30 = vsel %vm6311_vm5, %v640_v63, 0  ;;  %v641_v31 = vsel %vm6302_vm3, 0, %v584_v25 }
  0x68   : > { %5640 = vmatpush3.bf16.msra.mxu0 %v5900_v59  ;;  %5298 = vmatpush3.bf16.msra.mxu1 %v5905_v12  ;;  %v936_v40 = vshrl.u32 %v6724_v30, 16  ;;  %v938_v42 = vshll.u32 %v6724_v30, 16  ;;  %v586_v17 = vshrl.u32 %v558_v49, 16  ;;  %v589_v43 = vshll.u32 %v558_v49, 16 }
  0x69   : > { %5641 = vmatprep.subr.bf16.mxu0 %v5903_v35  ;;  %2093 = vmatprep.mubr.bf16.mxu0 %v4597_v27  ;;  %v6738_v44 = vsel %vm6311_vm5, %v641_v31, 0  ;;  %v593_v56 = vshrl.u32 %v559_v11, 16  ;;  %v596_v61 = vshll.u32 %v559_v11, 16  ;;  %v4673_v16 = vcombine.low %v6319_v52, %v6724_v30  ;;  %v5917_v27 = vld [vmem:[%s7670_s3 + $0x148] sm:$0xff]   ;;  %v5921_v31 = vld [vmem:[%s7670_s3 + $0x150] sm:$0xff]  }
  0x6a   : > { %5299 = vmatprep.subr.bf16.mxu1 %v5907_v9  ;;  %v940_v48 = vrot.slane %v938_v42, 1  ;;  %v588_v50 = vrot.slane %v586_v17, 7  ;;  %v945_v59 = vshll.u32 %v6738_v44, 16  ;;  %v943_v14 = vshrl.u32 %v6738_v44, 16  ;;  %v5918_v42 = vld [vmem:[%s7670_s3 + $0x88] sm:$0xff]   ;;  %v5923_v11 = vld [vmem:[%s7670_s3 + $0x110] sm:$0xff]  }
  0x6b   : > { %2159 = vmatmul.mubr.bf16.gmra.mrb[28].mxu1 %v4598_v24  ;;  %v552_v12 = vmul.f32 %v6654_v37, %v541_v51  ;;  %v595_v13 = vrot.slane %v593_v56, 7  ;;  %v520_v25 = vmul.f32 %v6753_v58, %v5049_v18  ;;  %v5050_v18 = vunpack.c.h.bf16 %v6776_v36  ;;  %v5928_v36 = vld [vmem:[%s7670_s3 + $0xe0] sm:$0xff]  }
  0x6c   : > { %5642 = vmatpush3.bf16.msra.mxu0 %v5903_v35  ;;  %5300 = vmatpush3.bf16.msra.mxu1 %v5908_v53  ;;  %v6759_v0 = vor.u32 %v940_v48, %v936_v40  ;;  %v591_v10 = vor.u32 %v589_v43, %v588_v50  ;;  %v947_v29 = vrot.slane %v945_v59, 1  ;;  %v534_v35 = vadd.f32 %v6743_v32, %v519_v2 }
  0x6d   : > { %5643 = vmatprep.subr.bf16.mxu0 %v5906_v45  ;;  %5301 = vmatprep.subr.bf16.mxu1 %v5910_v57  ;;  %v560_v9 = vpack.c.bf16 %v552_v12, %v552_v12  ;;  %v598_v5 = vor.u32 %v596_v61, %v595_v13  ;;  %v535_v40 = vadd.f32 %v6743_v32, %v520_v25  ;;  %v5922_v61 = vld [vmem:[%s7670_s3 + $0x90] sm:$0xff]   ;;  %v5931_v25 = vld [vmem:[%s7670_s3 + $0x120] sm:$0xff]  }
  0x6e   : > { %v4674_v22 = vcombine.low %v6353_v20, %v6759_v0  ;;  %v642_v54 = vsel %vm6302_vm3, 0, %v591_v10  ;;  %v6799_v57 = vor.u32 %v947_v29, %v943_v14  ;;  %v542_v26 = vmax.f32 %v534_v35, 0.0 }
  0x6f   : > { %2094 = vmatmul.mubr.bf16.gmra.mrb[28].mxu0 %v4596_v39  ;;  %v6785_v62 = vsel %vm6311_vm5, %v642_v54, 0  ;;  %v600_v24 = vshrl.u32 %v560_v9, 16  ;;  %v643_v53 = vsel %vm6302_vm3, 0, %v598_v5  ;;  %v543_v50 = vmax.f32 %v535_v40, 0.0  ;;  %v5935_v40 = vld [vmem:[%s7670_s3 + $0x128] sm:$0xff]  }
  0x70   : > { %5644 = vmatpush3.bf16.msra.mxu0 %v5906_v45  ;;  %5302 = vmatpush3.bf16.msra.mxu1 %v5911_v47  ;;  %v950_v21 = vshrl.u32 %v6785_v62, 16  ;;  %v952_v23 = vshll.u32 %v6785_v62, 16  ;;  %v603_v45 = vshll.u32 %v560_v9, 16  ;;  %v6803_v49 = vsel %vm6311_vm5, %v643_v53, 0  ;;  %v5925_v47 = vld [vmem:[%s7670_s3 + $0x158] sm:$0xff]  }
  0x71   : > { %5645 = vmatprep.subr.bf16.mxu0 %v5909_v33  ;;  %5647 = vmatprep.mubr.bf16.mxu0 %v6419_v8  ;;  %v5914_v8 = vld [vmem:[%s7670_s3 + $0x80] sm:$0xff]   ;;  %v602_v34 = vrot.slane %v600_v24, 7  ;;  %v959_v39 = vshll.u32 %v6803_v49, 16  ;;  %v6822_v43 = vcombine.low %v6738_v44, %v6785_v62  ;;  %v554_v56 = vmul.f32 %v6654_v37, %v543_v50 }
  0x72   : > { %2750 = vmatprep.mubr.bf16.mxu1 %v4674_v22  ;;  %5367 = vmatprep.subr.bf16.mxu1 %v5913_v38  ;;  %v954_v63 = vrot.slane %v952_v23, 1  ;;  %v4600_v13 = vcombine.low %v1251_v3, %v6329_v7  ;;  %v4676_v3 = vcombine.low %v6724_v30, %v6738_v44  ;;  %v993_v50 = vrot.slane %v6724_v30, 1  ;;  %v5936_v30 = vld [vmem:[%s7670_s3 + $0xf0] sm:$0xff]  }
  0x73   : > { %2751 = vmatmul.mubr.bf16.vlgmr.msra.gmra.mrb[32].mxu1 %v4673_v16  ;;  %v605_v48 = vor.u32 %v603_v45, %v602_v34  ;;  %v961_v51 = vrot.slane %v959_v39, 1  ;;  %v5924_v16 = vld [vmem:[%s7670_s3 + $0xd8] sm:$0xff]   ;;  %v562_v12 = vpack.c.bf16 %v554_v56, %v554_v56  ;;  %v521_v34 = vmul.f32 %v6753_v58, %v5050_v18  ;;  %v5932_v39 = vld [vmem:[%s7670_s3 + $0xe8] sm:$0xff]  }
  0x74   : > { %5646 = vmatpush3.bf16.msra.mxu0 %v5909_v33  ;;  %5368 = vmatpush3.bf16.msra.mxu1 %v5915_v4  ;;  %v6816_v17 = vor.u32 %v954_v63, %v950_v21  ;;  %v553_v33 = vmul.f32 %v6654_v37, %v542_v26  ;;  %v5926_v21 = vld [vmem:[%s7670_s3 + $0x98] sm:$0xff]   ;;  %v5930_v26 = vld [vmem:[%s7670_s3 + $0xa0] sm:$0xff]   ;;  %v994_v56 = vrot.slane %v6738_v44, 1  ;;  %v995_v18 = vrot.slane %v6785_v62, 1 }
  0x75   : > { %5327 = vmatprep.subr.bf16.mxu0 %v5912_v19  ;;  %5369 = vmatprep.subr.bf16.mxu1 %v5917_v27  ;;  %v644_v38 = vsel %vm6302_vm3, 0, %v605_v48  ;;  %v5929_v27 = vld [vmem:[%s7670_s3 + $0x160] sm:$0xff]   ;;  %v614_v9 = vshrl.u32 %v562_v12, 16  ;;  %v617_v5 = vshll.u32 %v562_v12, 16  ;;  %v5939_v12 = vld [vmem:[%s7670_s3 + $0x130] sm:$0xff]   ;;  %v5956_v44 = vld [vmem:[%s7670_s3 + $0x1d8] sm:$0xff]  }
  0x76   : > { %v6836_v59 = vcombine.low %v6799_v57, %v6816_v17  ;;  %v561_v2 = vpack.c.bf16 %v553_v33, %v553_v33  ;;  %v6848_v4 = vsel %vm6311_vm5, %v644_v38, 0 }
  0x77   : > { %5648 = vmatmul.mubr.bf16.vlgmr.msra.gmra.mrb[32].mxu0 %v6511_v15  ;;  %v957_v15 = vshrl.u32 %v6803_v49, 16  ;;  %v964_v19 = vshrl.u32 %v6848_v4, 16  ;;  %v966_v29 = vshll.u32 %v6848_v4, 16  ;;  %v6884_v24 = vcombine.low %v6803_v49, %v6848_v4 }
  0x78   : > { %5328 = vmatpush3.bf16.msra.mxu0 %v5914_v8  ;;  %5370 = vmatpush3.bf16.msra.mxu1 %v5919_v60  ;;  %v607_v10 = vshrl.u32 %v561_v2, 16  ;;  %v610_v14 = vshll.u32 %v561_v2, 16  ;;  %v616_v8 = vrot.slane %v614_v9, 7  ;;  %v536_v2 = vadd.f32 %v6743_v32, %v521_v34  ;;  %v5943_v9 = vld [vmem:[%s7670_s3 + $0x138] sm:$0xff]  }
  0x79   : > { %5329 = vmatprep.subr.bf16.mxu0 %v5916_v28  ;;  %5371 = vmatprep.subr.bf16.mxu1 %v5921_v31  ;;  %v6863_v54 = vor.u32 %v961_v51, %v957_v15  ;;  %v968_v35 = vrot.slane %v966_v29, 1  ;;  %v5933_v28 = vld [vmem:[%s7670_s3 + $0x168] sm:$0xff]   ;;  %v5937_v15 = vld [vmem:[%s7670_s3 + $0x170] sm:$0xff]  }
  0x7a   : > { %2758 = vmatprep.mubr.bf16.mxu1 %v6836_v59  ;;  %5651 = vmatprep.mubr.bf16.mxu0 %v6573_v1  ;;  %v5927_v1 = vld [vmem:[%s7670_s3 + $0x118] sm:$0xff]   ;;  %v609_v22 = vrot.slane %v607_v10, 7  ;;  %v619_v60 = vor.u32 %v617_v5, %v616_v8  ;;  %v4677_v8 = vcombine.low %v6759_v0, %v6799_v57  ;;  %v5949_v0 = vld [vmem:[%s7670_s3 + $0x4c8] sm:$0xff]  }
  0x7b   : > { %2759 = vmatmul.mubr.bf16.gmra.mrb[36].mxu1 %v6822_v43  ;;  %v6880_v23 = vor.u32 %v968_v35, %v964_v19  ;;  %v544_v19 = vmax.f32 %v536_v2, 0.0  ;;  %v5940_v35 = vld [vmem:[%s7670_s3 + $0xf8] sm:$0xff]   ;;  %v7047_v2 = vcombine.low %v994_v56, %v995_v18 }
  0x7c   : > { %5330 = vmatpush3.bf16.msra.mxu0 %v5918_v42  ;;  %5372 = vmatpush3.bf16.msra.mxu1 %v5923_v11  ;;  %v612_v55 = vor.u32 %v610_v14, %v609_v22  ;;  %v646_v42 = vsel %vm6302_vm3, 0, %v619_v60  ;;  %v4675_v60 = vcombine.low %v6329_v7, %v993_v50 }
  0x7d   : > { %5331 = vmatprep.subr.bf16.mxu0 %v5920_v6  ;;  %5373 = vmatprep.subr.bf16.mxu1 %v5925_v47  ;;  %v6893_v53 = vcombine.low %v6863_v54, %v6880_v23  ;;  %v6929_v6 = vsel %vm6311_vm5, %v646_v42, 0  ;;  %v555_v22 = vmul.f32 %v6654_v37, %v544_v19  ;;  %v5944_v37 = vld [vmem:[%s7670_s3 + $0x1c0] sm:$0xff]   ;;  %v5953_v42 = vld [vmem:[%s7670_s3 + $0x4d0] sm:$0xff]   ;;  %v5958_v19 = vld [vmem:[%s7670_s3 + $0x198] sm:$0xff]  }
  0x7e   : > { %v645_v45 = vsel %vm6302_vm3, 0, %v612_v55  ;;  %v978_v47 = vshrl.u32 %v6929_v6, 16  ;;  %v980_v48 = vshll.u32 %v6929_v6, 16  ;;  %v5945_v55 = vld [vmem:[%s7670_s3 + $0x4c0] sm:$0xff]  }
  0x7f   : > { %5652 = vmatmul.mubr.bf16.gmra.mrb[36].mxu0 %v4600_v13  ;;  %v6900_v63 = vsel %vm6311_vm5, %v645_v45, 0  ;;  %2766 = vmatprep.mubr.bf16.mxu1 %v6893_v53  ;;  %v4678_v13 = vcombine.low %v993_v50, %v994_v56  ;;  %v563_v5 = vpack.c.bf16 %v555_v22, %v555_v22  ;;  %v996_v45 = vrot.slane %v6803_v49, 1 }
  0x80   : > { %5332 = vmatpush3.bf16.msra.mxu0 %v5922_v61  ;;  %5374 = vmatpush3.bf16.msra.mxu1 %v5927_v1  ;;  %v973_v31 = vshll.u32 %v6900_v63, 16  ;;  %v971_v33 = vshrl.u32 %v6900_v63, 16  ;;  %v982_v51 = vrot.slane %v980_v48, 1  ;;  %v5934_v61 = vld [vmem:[%s7670_s3 + $0xa8] sm:$0xff]   ;;  %v6951_v14 = vcombine.low %v6900_v63, %v6929_v6  ;;  %v5941_v1 = vld [vmem:[%s7670_s3 + $0x178] sm:$0xff]   ;;  %v5954_v48 = vld [vmem:[%s7670_s3 + $0x190] sm:$0xff]  }
  0x81   : > { %5333 = vmatprep.subr.bf16.mxu0 %v5924_v16  ;;  %5375 = vmatprep.subr.bf16.mxu1 %v5929_v27  ;;  %v5938_v16 = vld [vmem:[%s7670_s3 + $0xb0] sm:$0xff]   ;;  %v5942_v27 = vld [vmem:[%s7670_s3 + $0xb8] sm:$0xff]   ;;  %v4684_v34 = vcombine.low %v995_v18, %v996_v45  ;;  %v998_v50 = vrot.slane %v6900_v63, 1  ;;  %v4688_v56 = vcombine.low %v6848_v4, %v6900_v63 }
  0x82   : > { %2815 = vmatprep.mubr.bf16.mxu0 %v4676_v3  ;;  %v975_v11 = vrot.slane %v973_v31, 1  ;;  %v6944_v10 = vor.u32 %v982_v51, %v978_v47  ;;  %v621_v3 = vshrl.u32 %v563_v5, 16  ;;  %v4682_v31 = vcombine.low %v6785_v62, %v6803_v49  ;;  %v5950_v62 = vld [vmem:[%s7670_s3 + $0x188] sm:$0xff]   ;;  %v5955_v51 = vld [vmem:[%s7670_s3 + $0x490] sm:$0xff]  }
  0x83   : > { %2767 = vmatmul.mubr.bf16.gmra.mrb[40].mxu1 %v6884_v24  ;;  %v4683_v47 = vcombine.low %v6816_v17, %v6863_v54  ;;  %v5957_v17 = vld [vmem:[%s7670_s3 + $0x4d8] sm:$0xff]   ;;  %v5964_v49 = vld [vmem:[%s7670_s3 + $0x1e8] sm:$0xff]  }
  0x84   : > { %5334 = vmatpush3.bf16.msra.mxu0 %v5926_v21  ;;  %5376 = vmatpush3.bf16.msra.mxu1 %v5931_v25  ;;  %v6938_v38 = vor.u32 %v975_v11, %v971_v33  ;;  %v624_v21 = vshll.u32 %v563_v5, 16  ;;  %v623_v25 = vrot.slane %v621_v3, 7  ;;  %v5952_v33 = vld [vmem:[%s7670_s3 + $0x1d0] sm:$0xff]   ;;  %v999_v5 = vrot.slane %v6929_v6, 1 }
  0x85   : > { %5335 = vmatprep.subr.bf16.mxu0 %v5928_v36  ;;  %5377 = vmatprep.subr.bf16.mxu1 %v5933_v28  ;;  %v5946_v36 = vld [vmem:[%s7670_s3 + $0x180] sm:$0xff]   ;;  %v5948_v28 = vld [vmem:[%s7670_s3 + $0x1c8] sm:$0xff]   ;;  %v7084_v3 = vstv %s830_s13 }
  0x86   : > { %v6961_v29 = vcombine.low %v6938_v38, %v6944_v10  ;;  %v626_v57 = vor.u32 %v624_v21, %v623_v25  ;;  %v4689_v18 = vcombine.low %v6880_v23, %v6938_v38  ;;  %v5962_v21 = vld [vmem:[%s7670_s3 + $0x1a0] sm:$0xff]   ;;  %v5109_v38 = vld [vmem:[%s7029_s22 + $0x8] sm:$0xff]  }
  0x88   : > { %5336 = vmatpush3.bf16.msra.mxu0 %v5930_v26  ;;  %5378 = vmatpush3.bf16.msra.mxu1 %v5935_v40  ;;  %v5947_v26 = vld [vmem:[%s7670_s3 + $0x480] sm:$0xff]   ;;  %v5951_v40 = vld [vmem:[%s7670_s3 + $0x488] sm:$0xff]  }
  0x89   : > { %5337 = vmatprep.subr.bf16.mxu0 %v5932_v39  ;;  %5379 = vmatprep.subr.bf16.mxu1 %v5937_v15  ;;  %v647_v39 = vsel %vm6302_vm3, 0, %v626_v57  ;;  %v997_v15 = vrot.slane %v6848_v4, 1  ;;  %v5961_v4 = vld [vmem:[%s7670_s3 + $0x4e0] sm:$0xff]   ;;  %v5073_v57 = vunpack.c.l.bf16 %v5109_v38 }
  0x8a   : > { %2774 = vmatprep.mubr.bf16.mxu1 %v6961_v29  ;;  %v7036_v11 = vsel %vm6311_vm5, %v647_v39, 0  ;;  %v5966_v39 = vld [vmem:[%s7670_s3 + $0x1a8] sm:$0xff]  }
  0x8b   : > { %2775 = vmatmul.mubr.bf16.gmra.mrb[44].mxu1 %v6951_v14  ;;  %v1003_v54 = vshll.u32 %v7036_v11, 16  ;;  %v7097_v25 = vcombine.low %v996_v45, %v997_v15  ;;  %v4694_v45 = vcombine.low %v6929_v6, %v7036_v11  ;;  %v5967_v6 = vld [vmem:[%s7670_s3 + $0x4a8] sm:$0xff]  }
  0x8c   : > { %5338 = vmatpush3.bf16.msra.mxu0 %v5934_v61  ;;  %5380 = vmatpush3.bf16.msra.mxu1 %v5939_v12  ;;  %v5068_v61 = vld [vmem:[%s7029_s22] sm:$0xff]   ;;  %v5959_v12 = vld [vmem:[%s7670_s3 + $0x498] sm:$0xff]  }
  0x8d   : > { %5339 = vmatprep.subr.bf16.mxu0 %v5936_v30  ;;  %2880 = vmatprep.mubr.bf16.mxu1 %v4678_v13  ;;  %v5069_v30 = vunpack.c.l.bf16 %v5068_v61  ;;  %v4690_v13 = vcombine.low %v997_v15, %v998_v50  ;;  %v5969_v15 = vld [vmem:[%s7670_s3 + $0x4f0] sm:$0xff]  }
  0x8e   : > { %5381 = vmatprep.subr.bf16.mxu1 %v5941_v1 }
  0x8f   : > { %v805_v1 = vmul.f32 %v6753_v58, %v5069_v30 }
  0x90   : > { %5340 = vmatpush3.bf16.msra.mxu0 %v5938_v16  ;;  %5382 = vmatpush3.bf16.msra.mxu1 %v5943_v9  ;;  %v5070_v16 = vunpack.c.h.bf16 %v5068_v61  ;;  %v5960_v9 = vld [vmem:[%s7670_s3 + $0x1e0] sm:$0xff]  }
  0x91   : > { %5341 = vmatprep.subr.bf16.mxu0 %v5940_v35  ;;  %5459 = vmatprep.subr.bf16.mxu1 %v5945_v55  ;;  %v1001_v35 = vshrl.u32 %v7036_v11, 16 }
  0x92   : > { %v806_v22 = vmul.f32 %v6753_v58, %v5070_v16  ;;  %v5110_v16 = vld [vmem:[%s7029_s22 + $0x10] sm:$0xff]  }
  0x93   : > { %2881 = vmatmul.mubr.bf16.vlgmr.msra.gmra.mrb[48].mxu1 %v4677_v8  ;;  %v5963_v8 = vld [vmem:[%s7670_s3 + $0x4a0] sm:$0xff]  }
  0x94   : > { %5342 = vmatpush3.bf16.msra.mxu0 %v5942_v27  ;;  %5460 = vmatpush3.bf16.msra.mxu1 %v5947_v26  ;;  %v1005_v27 = vrot.slane %v1003_v54, 1  ;;  %v814_v55 = vadd.f32 %v6743_v32, %v806_v22  ;;  %v5968_v54 = vld [vmem:[%s7670_s3 + $0x1f0] sm:$0xff]  }
  0x95   : > { %5407 = vmatprep.subr.bf16.mxu0 %v5944_v37  ;;  %5461 = vmatprep.subr.bf16.mxu1 %v5949_v0  ;;  %v813_v37 = vadd.f32 %v6743_v32, %v805_v1  ;;  %v7139_v1 = vcombine.low %v998_v50, %v999_v5  ;;  %v5971_v22 = vld [vmem:[%s7670_s3 + $0x4b0] sm:$0xff]   ;;  %v5972_v50 = vld [vmem:[%s7670_s3 + $0x1f8] sm:$0xff]  }
  0x96   : > { %2888 = vmatprep.mubr.bf16.mxu1 %v4684_v34  ;;  %v822_v26 = vmax.f32 %v814_v55, 0.0  ;;  %v7103_v0 = vor.u32 %v1005_v27, %v1001_v35  ;;  %v5973_v35 = vld [vmem:[%s7670_s3 + $0x4f8] sm:$0xff]  }
  0x97   : > { %2816 = vmatmul.mubr.bf16.vlgmr.msra.gmra.mrb[40].mxu0 %v4675_v60  ;;  %v5965_v60 = vld [vmem:[%s7670_s3 + $0x4e8] sm:$0xff]   ;;  %v821_v23 = vmax.f32 %v813_v37, 0.0 }
  0x98   : > { %5408 = vmatpush3.bf16.msra.mxu0 %v5946_v36  ;;  %2823 = vmatprep.mubr.bf16.mxu0 %v4682_v31  ;;  %v1008_v36 = vrot.slane %v7036_v11, 1  ;;  %v833_v34 = vmul.f32 %v7084_v3, %v822_v26 }
  0x99   : > { %5409 = vmatprep.subr.bf16.mxu0 %v5948_v28  ;;  %5462 = vmatpush3.bf16.msra.mxu1 %v5951_v40  ;;  %v5074_v28 = vunpack.c.h.bf16 %v5109_v38  ;;  %v832_v31 = vmul.f32 %v7084_v3, %v821_v23 }
  0x9a   : > { %5463 = vmatprep.subr.bf16.mxu1 %v5953_v42  ;;  %v4696_v40 = vcombine.low %v999_v5, %v1008_v36 }
  0x9b   : > { %2889 = vmatmul.mubr.bf16.gmra.mrb[52].mxu1 %v4683_v47  ;;  %v808_v42 = vmul.f32 %v6753_v58, %v5074_v28  ;;  %v841_v47 = vpack.c.bf16 %v833_v34, %v833_v34  ;;  %v5976_v28 = vld [vmem:[%s7670_s3 + $0x200] sm:$0xff]  }
  0x9c   : > { %5410 = vmatpush3.bf16.msra.mxu0 %v5950_v62  ;;  %2896 = vmatprep.mubr.bf16.mxu1 %v4690_v13  ;;  %v807_v62 = vmul.f32 %v6753_v58, %v5073_v57 }
  0x9d   : > { %5411 = vmatprep.subr.bf16.mxu0 %v5952_v33  ;;  %5464 = vmatpush3.bf16.msra.mxu1 %v5955_v51  ;;  %v840_v33 = vpack.c.bf16 %v832_v31, %v832_v31  ;;  %v859_v30 = vshll.u32 %v841_v47, 16 }
  0x9e   : > { %5465 = vmatprep.subr.bf16.mxu1 %v5957_v17  ;;  %v815_v51 = vadd.f32 %v6743_v32, %v807_v62  ;;  %v816_v17 = vadd.f32 %v6743_v32, %v808_v42 }
  0x9f   : > { %2824 = vmatmul.mubr.bf16.gmra.mrb[44].mxu0 %v7047_v2  ;;  %v849_v61 = vshrl.u32 %v840_v33, 16 }
  0xa0   : > { %5412 = vmatpush3.bf16.msra.mxu0 %v5954_v48  ;;  %2831 = vmatprep.mubr.bf16.mxu0 %v4688_v56  ;;  %v4695_v48 = vcombine.low %v6944_v10, %v7103_v0  ;;  %v856_v56 = vshrl.u32 %v841_v47, 16  ;;  %v5970_v10 = vld [vmem:[%s7670_s3 + $0x1b0] sm:$0xff]   ;;  %v824_v13 = vmax.f32 %v816_v17, 0.0  ;;  %v7188_v47 = vld [vmem:[%s7029_s22 + $0x18] sm:$0xff]  }
  0xa1   : > { %5413 = vmatprep.subr.bf16.mxu0 %v5956_v44  ;;  %5466 = vmatpush3.bf16.msra.mxu1 %v5959_v12  ;;  %v852_v44 = vshll.u32 %v840_v33, 16  ;;  %v5077_v12 = vunpack.c.l.bf16 %v5110_v16  ;;  %v851_v27 = vrot.slane %v849_v61, 7 }
  0xa2   : > { %5467 = vmatprep.subr.bf16.mxu1 %v5961_v4  ;;  %v5078_v4 = vunpack.c.h.bf16 %v5110_v16  ;;  %v835_v63 = vmul.f32 %v7084_v3, %v824_v13 }
  0xa3   : > { %2897 = vmatmul.mubr.bf16.gmra.mrb[56].mxu1 %v4689_v18  ;;  %v809_v55 = vmul.f32 %v6753_v58, %v5077_v12  ;;  %v854_v5 = vor.u32 %v852_v44, %v851_v27 }
  0xa4   : > { %5414 = vmatpush3.bf16.msra.mxu0 %v5958_v19  ;;  %2904 = vmatprep.mubr.bf16.mxu1 %v4696_v40  ;;  %v823_v19 = vmax.f32 %v815_v51, 0.0  ;;  %v843_v26 = vpack.c.bf16 %v835_v63, %v835_v63 }
  0xa5   : > { %5415 = vmatprep.subr.bf16.mxu0 %v5960_v9  ;;  %5468 = vmatpush3.bf16.msra.mxu1 %v5963_v8  ;;  %v858_v9 = vrot.slane %v856_v56, 7  ;;  %v5974_v8 = vld [vmem:[%s7670_s3 + $0x1b8] sm:$0xff]   ;;  %v817_v38 = vadd.f32 %v6743_v32, %v809_v55  ;;  %v912_v57 = vsel %vm6302_vm3, 0, %v854_v5  ;;  %v5979_v56 = vld [vmem:[%s7670_s3 + $0x208] sm:$0xff]  }
  0xa6   : > { %5469 = vmatprep.subr.bf16.mxu1 %v5965_v60  ;;  %v834_v37 = vmul.f32 %v7084_v3, %v823_v19  ;;  %v5975_v60 = vld [vmem:[%s7670_s3 + $0x4b8] sm:$0xff]   ;;  %v7175_v34 = vsel %vm6311_vm5, %v912_v57, 0  ;;  %v870_v17 = vshrl.u32 %v843_v26, 16  ;;  %v873_v61 = vshll.u32 %v843_v26, 16 }
  0xa7   : > { %2832 = vmatmul.mubr.bf16.gmra.mrb[48].mxu0 %v7097_v25  ;;  %v861_v18 = vor.u32 %v859_v30, %v858_v9  ;;  %v3044_v42 = vshrl.u32 %v7175_v34, 16  ;;  %v825_v51 = vmax.f32 %v817_v38, 0.0 }
  0xa8   : > { %5416 = vmatpush3.bf16.msra.mxu0 %v5962_v21  ;;  %2839 = vmatprep.mubr.bf16.mxu0 %v4694_v45  ;;  %v810_v21 = vmul.f32 %v6753_v58, %v5078_v4  ;;  %v842_v23 = vpack.c.bf16 %v834_v37, %v834_v37  ;;  %v872_v19 = vrot.slane %v870_v17, 7 }
  0xa9   : > { %5417 = vmatprep.subr.bf16.mxu0 %v5964_v49  ;;  %5470 = vmatpush3.bf16.msra.mxu1 %v5967_v6  ;;  %v5977_v49 = vld [vmem:[%s7670_s3 + $0x540] sm:$0xff]   ;;  %v913_v45 = vsel %vm6302_vm3, 0, %v861_v18  ;;  %v3046_v6 = vshll.u32 %v7175_v34, 16 }
  0xaa   : > { %5471 = vmatprep.subr.bf16.mxu1 %v5969_v15  ;;  %v818_v31 = vadd.f32 %v6743_v32, %v810_v21  ;;  %v866_v40 = vshll.u32 %v842_v23, 16  ;;  %v7179_v62 = vsel %vm6311_vm5, %v913_v45, 0  ;;  %v4916_v32 = vcombine.low %v6319_v52, %v7175_v34 }
  0xab   : > { %2905 = vmatmul.mubr.bf16.gmra.mrb[60].mxu1 %v4695_v48  ;;  %v3051_v33 = vshrl.u32 %v7179_v62, 16  ;;  %v3053_v15 = vshll.u32 %v7179_v62, 16  ;;  %v875_v37 = vor.u32 %v873_v61, %v872_v19  ;;  %v5985_v61 = vld [vmem:[%s7670_s3 + $0x218] sm:$0xff]   ;;  %v3100_v19 = vrot.slane %v7179_v62, 1 }
  0xac   : > { %5418 = vmatpush3.bf16.msra.mxu0 %v5966_v39  ;;  %v863_v39 = vshrl.u32 %v842_v23, 16  ;;  %v826_v44 = vmax.f32 %v818_v31, 0.0  ;;  %v5982_v23 = vld [vmem:[%s7670_s3 + $0x210] sm:$0xff]  }
  0xad   : > { %5419 = vmatprep.subr.bf16.mxu0 %v5968_v54  ;;  %5472 = vmatpush3.bf16.msra.mxu1 %v5971_v22  ;;  %v3048_v54 = vrot.slane %v3046_v6, 1  ;;  %v3055_v16 = vrot.slane %v3053_v15, 1  ;;  %v4919_v22 = vcombine.low %v7175_v34, %v7179_v62 }
  0xae   : > { %5473 = vmatprep.subr.bf16.mxu1 %v5973_v35  ;;  %v865_v48 = vrot.slane %v863_v39, 7  ;;  %v837_v4 = vmul.f32 %v7084_v3, %v826_v44 }
  0xaf   : > { %2840 = vmatmul.mubr.bf16.gmra.mrb[52].mxu0 %v7139_v1  ;;  %v7196_v12 = vor.u32 %v3048_v54, %v3044_v42  ;;  %v7204_v27 = vor.u32 %v3055_v16, %v3051_v33  ;;  %v5983_v42 = vld [vmem:[%s7670_s3 + $0x550] sm:$0xff]  }
  0xb0   : > { %5420 = vmatpush3.bf16.msra.mxu0 %v5970_v10  ;;  %2945 = vmatprep.mubr.bf16.mxu0 %v6836_v59  ;;  %v5081_v59 = vunpack.c.l.bf16 %v7188_v47  ;;  %v868_v30 = vor.u32 %v866_v40, %v865_v48  ;;  %v836_v10 = vmul.f32 %v7084_v3, %v825_v51  ;;  %v845_v18 = vpack.c.bf16 %v837_v4, %v837_v4  ;;  %v5981_v40 = vld [vmem:[%s7670_s3 + $0x508] sm:$0xff]   ;;  %v5984_v54 = vld [vmem:[%s7670_s3 + $0x510] sm:$0xff]  }
  0xb1   : > { %5421 = vmatprep.subr.bf16.mxu0 %v5972_v50  ;;  %5474 = vmatpush3.bf16.msra.mxu1 %v5975_v60  ;;  %v4917_v55 = vcombine.low %v6353_v20, %v7196_v12  ;;  %v7219_v50 = vld [vmem:[%s7672_s5] ss:$0 sm:$0xff]  ;;  %v4920_v60 = vcombine.low %v7196_v12, %v7204_v27  ;;  %v6035_v12 = vld [vmem:[%s7670_s3 + $0x698] sm:$0xff]  }
  0xb2   : > { %5499 = vmatprep.subr.bf16.mxu1 %v5977_v49  ;;  %v811_v13 = vmul.f32 %v6753_v58, %v5081_v59  ;;  %v914_v35 = vsel %vm6302_vm3, 0, %v868_v30  ;;  %v844_v9 = vpack.c.bf16 %v836_v10, %v836_v10  ;;  %v5978_v58 = vld [vmem:[%s7670_s3 + $0x500] sm:$0xff]   ;;  %v884_v31 = vshrl.u32 %v845_v18, 16 }
  0xb3   : > { %v7214_v63 = vsel %vm6311_vm5, %v914_v35, 0  ;;  %3802 = vmatprep.mubr.bf16.mxu1 %v4917_v55  ;;  %v887_v39 = vshll.u32 %v845_v18, 16  ;;  %v3099_v10 = vrot.slane %v7175_v34, 1  ;;  %v6006_v34 = vld [vmem:[%s7670_s3 + $0x588] sm:$0xff]  }
  0xb4   : > { %5422 = vmatpush3.bf16.msra.mxu0 %v5974_v8  ;;  %v819_v5 = vadd.f32 %v7219_v50, %v811_v13  ;;  %v3058_v21 = vshrl.u32 %v7214_v63, 16  ;;  %v3060_v8 = vshll.u32 %v7214_v63, 16  ;;  %v7235_v38 = vcombine.low %v7179_v62, %v7214_v63  ;;  %3803 = vmatmul.mubr.bf16.vlgmr.msra.gmra.mrb[64].mxu1 %v4916_v32  ;;  %v5986_v13 = vld [vmem:[%s7670_s3 + $0x558] sm:$0xff]  }
  0xb5   : > { %5655 = vmatprep.subr.bf16.mxu0 %v5976_v28  ;;  %v877_v26 = vshrl.u32 %v844_v9, 16  ;;  %v880_v57 = vshll.u32 %v844_v9, 16  ;;  %5500 = vmatpush3.bf16.msra.mxu1 %v5978_v58  ;;  %v886_v51 = vrot.slane %v884_v31, 7  ;;  %v5989_v31 = vld [vmem:[%s7670_s3 + $0x560] sm:$0xff]   ;;  %v4918_v62 = vcombine.low %v6329_v7, %v3099_v10 }
  0xb6   : > { %v3062_v49 = vrot.slane %v3060_v8, 1  ;;  %v5988_v8 = vld [vmem:[%s7670_s3 + $0x220] sm:$0xff]  }
  0xb7   : > { %2946 = vmatmul.mubr.bf16.vlgmr.msra.gmra.mrb[56].mxu0 %v6822_v43  ;;  %v5980_v43 = vld [vmem:[%s7670_s3 + $0x548] sm:$0xff]   ;;  %v879_v6 = vrot.slane %v877_v26, 7  ;;  %v889_v16 = vor.u32 %v887_v39, %v886_v51  ;;  %v5987_v26 = vld [vmem:[%s7670_s3 + $0x518] sm:$0xff]   ;;  %v4698_v39 = vcombine.low %v7103_v0, %v6353_v20 }
  0xb8   : > { %5656 = vmatpush3.bf16.msra.mxu0 %v5976_v28  ;;  %2953 = vmatprep.mubr.bf16.mxu0 %v6893_v53  ;;  %v915_v53 = vsel %vm6302_vm3, 0, %v875_v37  ;;  %v827_v28 = vmax.f32 %v819_v5, 0.0  ;;  %v7251_v48 = vor.u32 %v3062_v49, %v3058_v21  ;;  %v5082_v37 = vunpack.c.h.bf16 %v7188_v47  ;;  %v5991_v0 = vld [vmem:[%s7670_s3 + $0x228] sm:$0xff]  }
  0xb9   : > { %5657 = vmatprep.subr.bf16.mxu0 %v5979_v56  ;;  %v7241_v45 = vsel %vm6311_vm5, %v915_v53, 0  ;;  %5501 = vmatprep.subr.bf16.mxu1 %v5980_v43  ;;  %v882_v59 = vor.u32 %v880_v57, %v879_v6  ;;  %v7286_v5 = vcombine.low %v3099_v10, %v3100_v19  ;;  %v6043_v6 = vld [vmem:[%s7671_s4] ss:$0 sm:$0xff] }
  0xba   : > { %v3067_v33 = vshll.u32 %v7241_v45, 16  ;;  %v838_v32 = vmul.f32 %v7084_v3, %v827_v28  ;;  %v3065_v15 = vshrl.u32 %v7241_v45, 16  ;;  %v4925_v17 = vcombine.low %v7214_v63, %v7241_v45  ;;  %5502 = vmatpush3.bf16.msra.mxu1 %v5981_v40 }
  0xbb   : > { %v7264_v30 = vcombine.low %v7204_v27, %v7251_v48  ;;  %v916_v4 = vsel %vm6302_vm3, 0, %v882_v59  ;;  %5503 = vmatprep.subr.bf16.mxu1 %v5983_v42  ;;  %v3101_v40 = vrot.slane %v7214_v63, 1  ;;  %v6010_v63 = vld [vmem:[%s7670_s3 + $0x590] sm:$0xff]  }
  0xbc   : > { %5658 = vmatpush3.bf16.msra.mxu0 %v5979_v56  ;;  %v3069_v44 = vrot.slane %v3067_v33, 1  ;;  %v846_v56 = vpack.c.bf16 %v838_v32, %v838_v32  ;;  %v7278_v55 = vsel %vm6311_vm5, %v916_v4, 0  ;;  %v812_v33 = vmul.f32 %v6043_v6, %v5082_v37  ;;  %v5994_v37 = vld [vmem:[%s7670_s3 + $0x230] sm:$0xff]  }
  0xbd   : > { %5659 = vmatprep.subr.bf16.mxu0 %v5982_v23  ;;  %3810 = vmatprep.mubr.bf16.mxu1 %v7264_v30  ;;  %v3072_v47 = vshrl.u32 %v7278_v55, 16  ;;  %v3074_v18 = vshll.u32 %v7278_v55, 16  ;;  %v7293_v43 = vcombine.low %v7241_v45, %v7278_v55  ;;  %v7332_v59 = vcombine.low %v3100_v19, %v3101_v40 }
  0xbe   : > { %v891_v35 = vshrl.u32 %v846_v56, 16  ;;  %v894_v9 = vshll.u32 %v846_v56, 16  ;;  %v7280_v58 = vor.u32 %v3069_v44, %v3065_v15  ;;  %3811 = vmatmul.mubr.bf16.gmra.mrb[68].mxu1 %v7235_v38  ;;  %v5990_v44 = vld [vmem:[%s7670_s3 + $0x520] sm:$0xff]   ;;  %v5992_v56 = vld [vmem:[%s7670_s3 + $0x568] sm:$0xff]  }
  0xbf   : > { %2954 = vmatmul.mubr.bf16.gmra.mrb[60].mxu0 %v6884_v24  ;;  %v917_v24 = vsel %vm6302_vm3, 0, %v889_v16  ;;  %5504 = vmatpush3.bf16.msra.mxu1 %v5984_v54  ;;  %v3076_v57 = vrot.slane %v3074_v18, 1  ;;  %v3103_v18 = vrot.slane %v7278_v55, 1 }
  0xc0   : > { %5660 = vmatpush3.bf16.msra.mxu0 %v5982_v23  ;;  %2961 = vmatprep.mubr.bf16.mxu0 %v6961_v29  ;;  %v893_v21 = vrot.slane %v891_v35, 7  ;;  %v7301_v23 = vsel %vm6311_vm5, %v917_v24, 0  ;;  %v4926_v29 = vcombine.low %v7251_v48, %v7280_v58  ;;  %v3102_v24 = vrot.slane %v7241_v45, 1  ;;  %v6012_v45 = vld [vmem:[%s7670_s3 + $0x5d8] sm:$0xff]  }
  0xc1   : > { %5661 = vmatprep.subr.bf16.mxu0 %v5985_v61  ;;  %v3079_v28 = vshrl.u32 %v7301_v23, 16  ;;  %v3081_v49 = vshll.u32 %v7301_v23, 16  ;;  %5505 = vmatprep.subr.bf16.mxu1 %v5986_v13  ;;  %v4931_v42 = vcombine.low %v7278_v55, %v7301_v23  ;;  %v7321_v32 = vor.u32 %v3076_v57, %v3072_v47  ;;  %v6019_v55 = vld [vmem:[%s7670_s3 + $0x620] sm:$0xff]  }
  0xc2   : > { %v896_v53 = vor.u32 %v894_v9, %v893_v21  ;;  %v4697_v21 = vcombine.low %v7036_v11, %v6319_v52  ;;  %v7373_v57 = vcombine.low %v3101_v40, %v3102_v24  ;;  %v5996_v40 = vld [vmem:[%s7670_s3 + $0x530] sm:$0xff]  }
  0xc3   : > { %v3083_v51 = vrot.slane %v3081_v49, 1  ;;  %5506 = vmatpush3.bf16.msra.mxu1 %v5987_v26  ;;  %v3104_v49 = vrot.slane %v7301_v23, 1 }
  0xc4   : > { %5662 = vmatpush3.bf16.msra.mxu0 %v5985_v61  ;;  %v918_v15 = vsel %vm6302_vm3, 0, %v896_v53  ;;  %v7336_v61 = vcombine.low %v7280_v58, %v7321_v32  ;;  %5507 = vmatprep.subr.bf16.mxu1 %v5989_v31  ;;  %v5997_v31 = vld [vmem:[%s7670_s3 + $0x238] sm:$0xff]  }
  0xc5   : > { %5663 = vmatprep.subr.bf16.mxu0 %v5988_v8  ;;  %v7330_v54 = vsel %vm6311_vm5, %v918_v15, 0  ;;  %v7345_v16 = vor.u32 %v3083_v51, %v3079_v28  ;;  %v7379_v28 = vcombine.low %v3102_v24, %v3103_v18  ;;  %v5998_v15 = vld [vmem:[%s7670_s3 + $0x578] sm:$0xff]   ;;  %v6005_v24 = vld [vmem:[%s7670_s3 + $0x648] sm:$0xff]  }
  0xc6   : > { %v3086_v19 = vshrl.u32 %v7330_v54, 16  ;;  %v3088_v13 = vshll.u32 %v7330_v54, 16  ;;  %v7351_v4 = vcombine.low %v7301_v23, %v7330_v54  ;;  %3818 = vmatprep.mubr.bf16.mxu1 %v7336_v61  ;;  %v3105_v6 = vrot.slane %v7330_v54, 1  ;;  %v6021_v23 = vld [vmem:[%s7670_s3 + $0x668] sm:$0xff]  }
  0xc7   : > { %2962 = vmatmul.mubr.bf16.gmra.mrb[64].mxu0 %v6951_v14  ;;  %v820_v14 = vadd.f32 %v7219_v50, %v812_v33  ;;  %v4932_v9 = vcombine.low %v7321_v32, %v7345_v16  ;;  %3819 = vmatmul.mubr.bf16.gmra.mrb[72].mxu1 %v7293_v43  ;;  %v5993_v50 = vld [vmem:[%s7670_s3 + $0x528] sm:$0xff]   ;;  %v7391_v33 = vcombine.low %v3103_v18, %v3104_v49 }
  0xc8   : > { %2969 = vmatprep.mubr.bf16.mxu0 %v4698_v39  ;;  %5664 = vmatpush3.bf16.msra.mxu0 %v5988_v8  ;;  %v3090_v35 = vrot.slane %v3088_v13, 1  ;;  %v5995_v8 = vld [vmem:[%s7670_s3 + $0x570] sm:$0xff]  }
  0xc9   : > { %5665 = vmatprep.subr.bf16.mxu0 %v5991_v0  ;;  %5508 = vmatpush3.bf16.msra.mxu1 %v5990_v44  ;;  %v828_v26 = vmax.f32 %v820_v14, 0.0  ;;  %v6000_v44 = vld [vmem:[%s7670_s3 + $0x5c0] sm:$0xff]  }
  0xca   : > { %v7365_v47 = vor.u32 %v3090_v35, %v3086_v19  ;;  %5509 = vmatprep.subr.bf16.mxu1 %v5992_v56  ;;  %v6001_v19 = vld [vmem:[%s7670_s3 + $0x640] sm:$0xff]  }
  0xcb   : > { %v839_v39 = vmul.f32 %v7084_v3, %v828_v26  ;;  %v5999_v3 = vld [vmem:[%s7670_s3 + $0x538] sm:$0xff]   ;;  %v6003_v35 = vld [vmem:[%s7670_s3 + $0x600] sm:$0xff]  }
  0xcc   : > { %5666 = vmatpush3.bf16.msra.mxu0 %v5991_v0  ;;  %v7377_v53 = vcombine.low %v7345_v16, %v7365_v47  ;;  %v7396_v0 = vcombine.low %v3104_v49, %v3105_v6 }
  0xcd   : > { %5667 = vmatprep.subr.bf16.mxu0 %v5994_v37  ;;  %5510 = vmatpush3.bf16.msra.mxu1 %v5993_v50  ;;  %v847_v51 = vpack.c.bf16 %v839_v39, %v839_v39  ;;  %v6007_v50 = vld [vmem:[%s7670_s3 + $0x608] sm:$0xff]   ;;  %v6016_v39 = vld [vmem:[%s7670_s3 + $0x5e0] sm:$0xff]  }
  0xce   : > { %3826 = vmatprep.mubr.bf16.mxu1 %v7377_v53  ;;  %5511 = vmatprep.subr.bf16.mxu1 %v5995_v8 }
  0xcf   : > { %2970 = vmatmul.mubr.bf16.gmra.mrb[68].mxu0 %v4697_v21  ;;  %3827 = vmatmul.mubr.bf16.gmra.mrb[76].mxu1 %v7351_v4  ;;  %v898_v56 = vshrl.u32 %v847_v51, 16  ;;  %v901_v13 = vshll.u32 %v847_v51, 16  ;;  %v6020_v51 = vld [vmem:[%s7670_s3 + $0x5e8] sm:$0xff]  }
  0xd0   : > { %5668 = vmatpush3.bf16.msra.mxu0 %v5994_v37  ;;  %5671 = vmatprep.mubr.bf16.mxu0 %v7047_v2  ;;  %v6002_v2 = vld [vmem:[%s7670_s3 + $0x580] sm:$0xff]  }
  0xd1   : > { %5669 = vmatprep.subr.bf16.mxu0 %v5997_v31  ;;  %5512 = vmatpush3.bf16.msra.mxu1 %v5996_v40  ;;  %v900_v14 = vrot.slane %v898_v56, 7  ;;  %v6015_v40 = vld [vmem:[%s7670_s3 + $0x618] sm:$0xff]   ;;  %v6025_v56 = vld [vmem:[%s7670_s3 + $0x670] sm:$0xff]  }
  0xd2   : > { %3867 = vmatprep.mubr.bf16.mxu1 %v4919_v22  ;;  %5513 = vmatprep.subr.bf16.mxu1 %v5998_v15  ;;  %v6004_v22 = vld [vmem:[%s7670_s3 + $0x5c8] sm:$0xff]   ;;  %v6018_v15 = vld [vmem:[%s7670_s3 + $0x5a0] sm:$0xff]  }
  0xd3   : > { %v903_v37 = vor.u32 %v901_v13, %v900_v14  ;;  %v6028_v13 = vld [vmem:[%s7670_s3 + $0x5f8] sm:$0xff]  }
  0xd4   : > { %5670 = vmatpush3.bf16.msra.mxu0 %v5997_v31  ;;  %v6014_v31 = vld [vmem:[%s7670_s3 + $0x598] sm:$0xff]  }
  0xd5   : > { %5539 = vmatprep.subr.bf16.mxu0 %v6000_v44  ;;  %5514 = vmatpush3.bf16.msra.mxu1 %v5999_v3  ;;  %v919_v10 = vsel %vm6302_vm3, 0, %v903_v37  ;;  %v6024_v3 = vld [vmem:[%s7670_s3 + $0x5f0] sm:$0xff]   ;;  %v6023_v44 = vld [vmem:[%s7670_s3 + $0x628] sm:$0xff]   ;;  %v6029_v14 = vld [vmem:[%s7670_s3 + $0x678] sm:$0xff]  }
  0xd6   : > { %5579 = vmatprep.subr.bf16.mxu1 %v6001_v19  ;;  %v7439_v18 = vsel %vm6311_vm5, %v919_v10, 0  ;;  %v6026_v19 = vld [vmem:[%s7670_s3 + $0x5b0] sm:$0xff]   ;;  %v6033_v37 = vld [vmem:[%s7670_s3 + $0x688] sm:$0xff]  }
  0xd7   : > { %5672 = vmatmul.mubr.bf16.vlgmr.msra.gmra.mrb[32].mxu0 %v7097_v25  ;;  %v6008_v25 = vld [vmem:[%s7670_s3 + $0x5d0] sm:$0xff]   ;;  %v4937_v41 = vcombine.low %v7330_v54, %v7439_v18  ;;  %v3114_v21 = vrot.slane %v7439_v18, 1  ;;  %v3107_v54 = vshrl.u32 %v7439_v18, 16  ;;  %v3109_v26 = vshll.u32 %v7439_v18, 16 }
  0xd8   : > { %5540 = vmatpush3.bf16.msra.mxu0 %v6002_v2  ;;  %5675 = vmatprep.mubr.bf16.mxu0 %v7139_v1  ;;  %v4699_v1 = vcombine.low %v1008_v36, %v6329_v7  ;;  %v6011_v36 = vld [vmem:[%s7670_s3 + $0x610] sm:$0xff]  }
  0xd9   : > { %3868 = vmatmul.mubr.bf16.vlgmr.msra.gmra.mrb[80].mxu1 %v4918_v62  ;;  %5541 = vmatprep.subr.bf16.mxu0 %v6004_v22  ;;  %v7458_v8 = vcombine.low %v3105_v6, %v3114_v21  ;;  %v3111_v11 = vrot.slane %v3109_v26, 1  ;;  %v6027_v2 = vld [vmem:[%s7670_s3 + $0x630] sm:$0xff]   ;;  %v6032_v62 = vld [vmem:[%s7670_s3 + $0x680] sm:$0xff]   ;;  %v6031_v22 = vld [vmem:[%s7670_s3 + $0x638] sm:$0xff]  }
  0xda   : > { %5580 = vmatpush3.bf16.msra.mxu1 %v6003_v35  ;;  %3875 = vmatprep.mubr.bf16.mxu1 %v4925_v17  ;;  %v6013_v17 = vld [vmem:[%s7670_s3 + $0x658] sm:$0xff]  }
  0xdb   : > { %5581 = vmatprep.subr.bf16.mxu1 %v6005_v24  ;;  %v7474_v49 = vor.u32 %v3111_v11, %v3107_v54  ;;  %v6030_v35 = vld [vmem:[%s7670_s3 + $0x5b8] sm:$0xff]  }
  0xdc   : > { %5542 = vmatpush3.bf16.msra.mxu0 %v6006_v34 }
  0xdd   : > { %5543 = vmatprep.subr.bf16.mxu0 %v6008_v25  ;;  %v4938_v6 = vcombine.low %v7365_v47, %v7474_v49  ;;  %v4942_v47 = vcombine.low %v3114_v21, %v6329_v7 }
  0xde   : > { %5582 = vmatpush3.bf16.msra.mxu1 %v6007_v50 }
  0xdf   : > { %5676 = vmatmul.mubr.bf16.gmra.mrb[36].mxu0 %v4699_v1  ;;  %5583 = vmatprep.subr.bf16.mxu1 %v6009_v46 }
  0xe0   : > { %5544 = vmatpush3.bf16.msra.mxu0 %v6010_v63  ;;  %3932 = vmatprep.mubr.bf16.mxu0 %v7286_v5  ;;  %v6017_v5 = vld [vmem:[%s7670_s3 + $0x660] sm:$0xff]  }
  0xe1   : > { %3876 = vmatmul.mubr.bf16.gmra.mrb[84].mxu1 %v7332_v59  ;;  %5545 = vmatprep.subr.bf16.mxu0 %v6012_v45 }
  0xe2   : > { %5584 = vmatpush3.bf16.msra.mxu1 %v6011_v36  ;;  %3883 = vmatprep.mubr.bf16.mxu1 %v4931_v42  ;;  %v6022_v42 = vld [vmem:[%s7670_s3 + $0x5a8] sm:$0xff]  }
  0xe3   : > { %5585 = vmatprep.subr.bf16.mxu1 %v6013_v17 }
  0xe4   : > { %5546 = vmatpush3.bf16.msra.mxu0 %v6014_v31 }
  0xe5   : > { %5547 = vmatprep.subr.bf16.mxu0 %v6016_v39 }
  0xe6   : > { %5586 = vmatpush3.bf16.msra.mxu1 %v6015_v40 }
  0xe7   : > { %5587 = vmatprep.subr.bf16.mxu1 %v6017_v5 }
  0xe8   : > { %5548 = vmatpush3.bf16.msra.mxu0 %v6018_v15 }
  0xe9   : > { %3884 = vmatmul.mubr.bf16.gmra.mrb[88].mxu1 %v7379_v28  ;;  %5549 = vmatprep.subr.bf16.mxu0 %v6020_v51 }
  0xea   : > { %5588 = vmatpush3.bf16.msra.mxu1 %v6019_v55  ;;  %3891 = vmatprep.mubr.bf16.mxu1 %v4937_v41 }
  0xeb   : > { %5589 = vmatprep.subr.bf16.mxu1 %v6021_v23 }
  0xec   : > { %5550 = vmatpush3.bf16.msra.mxu0 %v6022_v42 }
  0xed   : > { %5551 = vmatprep.subr.bf16.mxu0 %v6024_v3 }
  0xee   : > { %5590 = vmatpush3.bf16.msra.mxu1 %v6023_v44 }
  0xef   : > { %5591 = vmatprep.subr.bf16.mxu1 %v6025_v56 }
  0xf0   : > { %5552 = vmatpush3.bf16.msra.mxu0 %v6026_v19 }
  0xf1   : > { %3892 = vmatmul.mubr.bf16.gmra.mrb[92].mxu1 %v7396_v0  ;;  %5553 = vmatprep.subr.bf16.mxu0 %v6028_v13 }
  0xf2   : > { %5592 = vmatpush3.bf16.msra.mxu1 %v6027_v2  ;;  %3997 = vmatprep.mubr.bf16.mxu1 %v7264_v30  ;;  %v6034_v30 = vld [vmem:[%s7670_s3 + $0x690] sm:$0xff]  }
  0xf3   : > { %5593 = vmatprep.subr.bf16.mxu1 %v6029_v14 }
  0xf4   : > { %5554 = vmatpush3.bf16.msra.mxu0 %v6030_v35 }
  0xf5   : > { %5679 = vmatprep.subr.bf16.mxu0 %v6032_v62 }
  0xf6   : > { %5594 = vmatpush3.bf16.msra.mxu1 %v6031_v22 }
  0xf7   : > { %3933 = vmatmul.mubr.bf16.vlgmr.msra.gmra.mrb[72].mxu0 %v4920_v60  ;;  %5703 = vmatprep.subr.bf16.mxu1 %v6032_v62 }
  0xf8   : > { %5680 = vmatpush3.bf16.msra.mxu0 %v6032_v62  ;;  %3940 = vmatprep.mubr.bf16.mxu0 %v7373_v57  ;;  %v6036_v57 = vld [vmem:[%s7670_s3 + $0x6a0] sm:$0xff]  }
  0xf9   : > { %3998 = vmatmul.mubr.bf16.vlgmr.msra.gmra.mrb[96].mxu1 %v7235_v38  ;;  %5681 = vmatprep.subr.bf16.mxu0 %v6033_v37 }
  0xfa   : > { %5711 = vmatpush3.bf16.msra.mxu1 %v6032_v62  ;;  %4005 = vmatprep.mubr.bf16.mxu1 %v7336_v61 }
  0xfb   : > { %5704 = vmatprep.subr.bf16.mxu1 %v6033_v37 }
  0xfc   : > { %5682 = vmatpush3.bf16.msra.mxu0 %v6033_v37 }
  0xfd   : > { %5683 = vmatprep.subr.bf16.mxu0 %v6034_v30 }
  0xfe   : > { %5712 = vmatpush3.bf16.msra.mxu1 %v6033_v37 }
  0xff   : > { %3941 = vmatmul.mubr.bf16.gmra.mrb[76].mxu0 %v4926_v29  ;;  %5705 = vmatprep.subr.bf16.mxu1 %v6034_v30 }
 0x100   : > { %5684 = vmatpush3.bf16.msra.mxu0 %v6034_v30  ;;  %3948 = vmatprep.mubr.bf16.mxu0 %v7391_v33 }
 0x101   : > { %4006 = vmatmul.mubr.bf16.gmra.mrb[100].mxu1 %v7293_v43  ;;  %5685 = vmatprep.subr.bf16.mxu0 %v6035_v12  ;;  %v6037_v43 = vld [vmem:[%s7670_s3 + $0x6a8] sm:$0xff]  }
 0x102   : > { %v5171_v27 = vpop.f32.mrb[0].mxu1  ;;  %5713 = vmatpush3.bf16.msra.mxu1 %v6034_v30  ;;  %4013 = vmatprep.mubr.bf16.mxu1 %v7377_v53  ;;  %v4941_v53 = vcombine.low %v7474_v49, %v6353_v20  ;;  %v6038_v20 = vld [vmem:[%s7670_s3 + $0x6b0] sm:$0xff]  }
 0x103   : > { %v5172_v60 = vpop.f32.mrb[1].mxu1  ;;  %5706 = vmatprep.subr.bf16.mxu1 %v6035_v12 }
 0x104   : > { %v5173_v38 = vadd.f32 %v5172_v60, %v5171_v27  ;;  %v5174_v61 = vpop.f32.mrb[2].mxu1  ;;  %5686 = vmatpush3.bf16.msra.mxu0 %v6035_v12 }
 0x105   : > { %v5175_v24 = vpop.f32.mrb[3].mxu1  ;;  %5687 = vmatprep.subr.bf16.mxu0 %v6036_v57 }
 0x106   : > { %v5131_v48 = vpop.f32.mrb[0].mxu0  ;;  %v5176_v58 = vadd.f32 %v5175_v24, %v5174_v61  ;;  %5714 = vmatpush3.bf16.msra.mxu1 %v6035_v12 }
 0x107   : > { %v5132_v29 = vpop.f32.mrb[1].mxu0  ;;  %3949 = vmatmul.mubr.bf16.gmra.mrb[80].mxu0 %v4932_v9  ;;  %5707 = vmatprep.subr.bf16.mxu1 %v6036_v57 }
 0x108   : > { %v5133_v34 = vadd.f32 %v5132_v29, %v5131_v48  ;;  %v5134_v33 = vpop.f32.mrb[2].mxu0  ;;  %5688 = vmatpush3.bf16.msra.mxu0 %v6036_v57  ;;  %3956 = vmatprep.mubr.bf16.mxu0 %v7458_v8  ;;  %v4940_v8 = vcombine.low %v7439_v18, %v6319_v52 }
 0x109   : > { %v5135_v10 = vpop.f32.mrb[3].mxu0  ;;  %4014 = vmatmul.mubr.bf16.gmra.mrb[104].mxu1 %v7351_v4  ;;  %5689 = vmatprep.subr.bf16.mxu0 %v6037_v43  ;;  %v6039_v4 = vld [vmem:[%s7670_s3 + $0x6b8] sm:$0xff]  }
 0x10a   : > { %v7570_v50 = vadd.f32 %v5173_v38, %v5133_v34  ;;  %v5136_v25 = vadd.f32 %v5135_v10, %v5134_v33  ;;  %v5177_v41 = vpop.f32.mrb[4].mxu1  ;;  %5715 = vmatpush3.bf16.msra.mxu1 %v6036_v57  ;;  %4021 = vmatprep.mubr.bf16.mxu1 %v4941_v53 }
 0x10b   : > { %v5178_v46 = vpop.f32.mrb[5].mxu1  ;;  %5708 = vmatprep.subr.bf16.mxu1 %v6037_v43 }
 0x10c   : > { %v7577_v1 = vadd.f32 %v5176_v58, %v5136_v25  ;;  %v5179_v54 = vadd.f32 %v5178_v46, %v5177_v41  ;;  %v5180_v26 = vpop.f32.mrb[6].mxu1  ;;  %5690 = vmatpush3.bf16.msra.mxu0 %v6037_v43 }
 0x10d   : > { %v5181_v63 = vpop.f32.mrb[7].mxu1  ;;  %5691 = vmatprep.subr.bf16.mxu0 %v6038_v20 }
 0x10e   : > { %v5182_v32 = vadd.f32 %v5181_v63, %v5180_v26  ;;  %v5137_v16 = vpop.f32.mrb[4].mxu0  ;;  %5716 = vmatpush3.bf16.msra.mxu1 %v6037_v43 }
 0x10f   : > { %v5138_v9 = vpop.f32.mrb[5].mxu0  ;;  %3957 = vmatmul.mubr.bf16.gmra.mrb[84].mxu0 %v4938_v6  ;;  %5709 = vmatprep.subr.bf16.mxu1 %v6038_v20 }
 0x110   : > { %v5139_v45 = vadd.f32 %v5138_v9, %v5137_v16  ;;  %v5140_v11 = vpop.f32.mrb[6].mxu0  ;;  %5692 = vmatpush3.bf16.msra.mxu0 %v6038_v20  ;;  %5695 = vmatprep.mubr.bf16.mxu0 %v7332_v59 }
 0x111   : > { %v5141_v36 = vpop.f32.mrb[7].mxu0  ;;  %4022 = vmatmul.mubr.bf16.gmra.mrb[108].mxu1 %v4940_v8  ;;  %5693 = vmatprep.subr.bf16.mxu0 %v6039_v4 }
 0x112   : > { %v7592_v17 = vadd.f32 %v5179_v54, %v5139_v45  ;;  %v5142_v31 = vadd.f32 %v5141_v36, %v5140_v11  ;;  %5717 = vmatpush3.bf16.msra.mxu1 %v6038_v20  ;;  %5699 = vmatprep.mubr.bf16.mxu1 %v7396_v0 }
 0x113   : > { %5710 = vmatprep.subr.bf16.mxu1 %v6039_v4 }
 0x114   : > { %v7595_v52 = vadd.f32 %v5182_v32, %v5142_v31  ;;  %5694 = vmatpush3.bf16.msra.mxu0 %v6039_v4 }
 0x115   : > { %v5183_v39 = vpop.f32.mrb[8].mxu1 }
 0x116   : > { %v5184_v40 = vpop.f32.mrb[9].mxu1  ;;  %5718 = vmatpush3.bf16.msra.mxu1 %v6039_v4 }
 0x117   : > { %v5185_v49 = vadd.f32 %v5184_v40, %v5183_v39  ;;  %v5186_v6 = vpop.f32.mrb[10].mxu1  ;;  %5696 = vmatmul.mubr.bf16.vlgmr.msra.gmra.mrb[32].mxu0 %v7379_v28 }
 0x118   : > { %v5187_v5 = vpop.f32.mrb[11].mxu1 }
 0x119   : > { %v5188_v59 = vadd.f32 %v5187_v5, %v5186_v6  ;;  %5700 = vmatmul.mubr.bf16.vlgmr.msra.gmra.mrb[112].mxu1 %v4942_v47 }
 0x11a   : > { %v5143_v15 = vpop.f32.mrb[8].mxu0 }
 0x11b   : > { %v5144_v51 = vpop.f32.mrb[9].mxu0 }
 0x11c   : > { %v5145_v55 = vadd.f32 %v5144_v51, %v5143_v15  ;;  %v5146_v0 = vpop.f32.mrb[10].mxu0 }
 0x11d   : > { %v5147_v23 = vpop.f32.mrb[11].mxu0 }
 0x11e   : > { %v2023_v42 = vadd.f32 %v5185_v49, %v5145_v55  ;;  %v5148_v3 = vadd.f32 %v5147_v23, %v5146_v0  ;;  %v5189_v44 = vpop.f32.mrb[12].mxu1 }
 0x11f   : > { %v5190_v19 = vpop.f32.mrb[13].mxu1 }
 0x120   : > { %v2026_v56 = vadd.f32 %v5188_v59, %v5148_v3  ;;  %v5191_v18 = vadd.f32 %v5190_v19, %v5189_v44  ;;  %v5192_v7 = vpop.f32.mrb[14].mxu1 }
 0x121   : > { %v5193_v21 = vpop.f32.mrb[15].mxu1 }
 0x122   : > { %v5149_v13 = vpop.f32.mrb[12].mxu0  ;;  %v5194_v2 = vadd.f32 %v5193_v21, %v5192_v7 }
 0x123   : > { %v5150_v14 = vpop.f32.mrb[13].mxu0 }
 0x124   : > { %v5151_v35 = vadd.f32 %v5150_v14, %v5149_v13  ;;  %v5152_v28 = vpop.f32.mrb[14].mxu0 }
 0x125   : > { %v5153_v62 = vpop.f32.mrb[15].mxu0 }
 0x126   : > { %v2031_v22 = vadd.f32 %v5191_v18, %v5151_v35  ;;  %v5154_v37 = vadd.f32 %v5153_v62, %v5152_v28  ;;  %v5251_v30 = vpop.f32.mrb[16].mxu1 }
 0x127   : > { %v5252_v12 = vpop.f32.mrb[17].mxu1 }
 0x128   : > { %v2034_v27 = vadd.f32 %v5194_v2, %v5154_v37  ;;  %v5253_v60 = vadd.f32 %v5252_v12, %v5251_v30  ;;  %v5254_v38 = vpop.f32.mrb[18].mxu1 }
 0x129   : > { %v5255_v61 = vpop.f32.mrb[19].mxu1 }
 0x12a   : > { %v5211_v57 = vpop.f32.mrb[16].mxu0  ;;  %v5256_v24 = vadd.f32 %v5255_v61, %v5254_v38 }
 0x12b   : > { %v5212_v48 = vpop.f32.mrb[17].mxu0 }
 0x12c   : > { %v5213_v58 = vadd.f32 %v5212_v48, %v5211_v57  ;;  %v5214_v29 = vpop.f32.mrb[18].mxu0 }
 0x12d   : > { %v5215_v34 = vpop.f32.mrb[19].mxu0 }
 0x12e   : > { %v2072_v33 = vadd.f32 %v5213_v58, %v7570_v50  ;;  %v5216_v43 = vadd.f32 %v5215_v34, %v5214_v29  ;;  %v5257_v10 = vpop.f32.mrb[20].mxu1 }
 0x12f   : > { %v5258_v25 = vpop.f32.mrb[21].mxu1 }
 0x130   : > { %v2075_v53 = vadd.f32 %v5216_v43, %v7577_v1  ;;  %v2137_v41 = vadd.f32 %v5253_v60, %v2072_v33  ;;  %v5259_v46 = vadd.f32 %v5258_v25, %v5257_v10  ;;  %v5260_v54 = vpop.f32.mrb[22].mxu1 }
 0x131   : > { %v5261_v26 = vpop.f32.mrb[23].mxu1 }
 0x132   : > { %v2140_v20 = vadd.f32 %v5256_v24, %v2075_v53  ;;  %v5217_v63 = vpop.f32.mrb[20].mxu0  ;;  %v5262_v32 = vadd.f32 %v5261_v26, %v5260_v54 }
 0x133   : > { %v5218_v16 = vpop.f32.mrb[21].mxu0 }
 0x134   : > { %v5219_v9 = vadd.f32 %v5218_v16, %v5217_v63  ;;  %v5220_v8 = vpop.f32.mrb[22].mxu0 }
 0x135   : > { %v5221_v4 = vpop.f32.mrb[23].mxu0 }
 0x136   : > { %v2080_v45 = vadd.f32 %v5219_v9, %v7592_v17  ;;  %v5222_v11 = vadd.f32 %v5221_v4, %v5220_v8  ;;  %v5263_v50 = vpop.f32.mrb[24].mxu1 }
 0x137   : > { %v5264_v36 = vpop.f32.mrb[25].mxu1 }
 0x138   : > { %v2083_v31 = vadd.f32 %v5222_v11, %v7595_v52  ;;  %v2145_v39 = vadd.f32 %v5259_v46, %v2080_v45  ;;  %v5265_v1 = vadd.f32 %v5264_v36, %v5263_v50  ;;  %v5266_v40 = vpop.f32.mrb[26].mxu1 }
 0x139   : > { %v5267_v47 = vpop.f32.mrb[27].mxu1 }
 0x13a   : > { %v2148_v49 = vadd.f32 %v5262_v32, %v2083_v31  ;;  %v5223_v6 = vpop.f32.mrb[24].mxu0  ;;  %v5268_v5 = vadd.f32 %v5267_v47, %v5266_v40 }
 0x13b   : > { %v5224_v59 = vpop.f32.mrb[25].mxu0 }
 0x13c   : > { %v5225_v15 = vadd.f32 %v5224_v59, %v5223_v6  ;;  %v5226_v51 = vpop.f32.mrb[26].mxu0 }
 0x13d   : > { %v5227_v55 = vpop.f32.mrb[27].mxu0 }
 0x13e   : > { %v2088_v0 = vadd.f32 %v5225_v15, %v2023_v42  ;;  %v5228_v23 = vadd.f32 %v5227_v55, %v5226_v51  ;;  %v5269_v3 = vpop.f32.mrb[28].mxu1 }
 0x13f   : > { %v5270_v17 = vpop.f32.mrb[29].mxu1 }
 0x140   : > { %v2091_v44 = vadd.f32 %v5228_v23, %v2026_v56  ;;  %v2153_v19 = vadd.f32 %v5265_v1, %v2088_v0  ;;  %v5271_v18 = vadd.f32 %v5270_v17, %v5269_v3  ;;  %v5272_v7 = vpop.f32.mrb[30].mxu1 }
 0x141   : > { %v5273_v52 = vpop.f32.mrb[31].mxu1 }
 0x142   : > { %v2156_v21 = vadd.f32 %v5268_v5, %v2091_v44  ;;  %v5229_v13 = vpop.f32.mrb[28].mxu0  ;;  %v5274_v2 = vadd.f32 %v5273_v52, %v5272_v7 }
 0x143   : > { %v5230_v14 = vpop.f32.mrb[29].mxu0 }
 0x144   : > { %v5231_v35 = vadd.f32 %v5230_v14, %v5229_v13  ;;  %v5232_v28 = vpop.f32.mrb[30].mxu0 }
 0x145   : > { %v5233_v62 = vpop.f32.mrb[31].mxu0 }
 0x146   : > { %v2096_v37 = vadd.f32 %v5231_v35, %v2031_v22  ;;  %v5234_v30 = vadd.f32 %v5233_v62, %v5232_v28  ;;  %v5303_v12 = vpop.f32.mrb[32].mxu1 }
 0x147   : > { %v5304_v60 = vpop.f32.mrb[33].mxu1 }
 0x148   : > { %v2099_v42 = vadd.f32 %v5234_v30, %v2034_v27  ;;  %v2161_v38 = vadd.f32 %v5271_v18, %v2096_v37  ;;  %v5305_v61 = vadd.f32 %v5304_v60, %v5303_v12  ;;  %v5306_v57 = vpop.f32.mrb[34].mxu1 }
 0x149   : > { %v5307_v56 = vpop.f32.mrb[35].mxu1 }
 0x14a   : > { %v2164_v24 = vadd.f32 %v5274_v2, %v2099_v42  ;;  %v5725_v48 = vadd.f32 %v5305_v61, %v2137_v41  ;;  %v5308_v58 = vadd.f32 %v5307_v56, %v5306_v57 }
 0x14c   : > { %v5737_v29 = vadd.f32 %v5308_v58, %v2140_v20 }
 0x14e   : > { %v5309_v34 = vpop.f32.mrb[36].mxu1 }
 0x14f   : > { %v5310_v33 = vpop.f32.mrb[37].mxu1 }
 0x150   : > { %v5311_v43 = vadd.f32 %v5310_v33, %v5309_v34  ;;  %v5312_v10 = vpop.f32.mrb[38].mxu1 }
 0x151   : > { %v5313_v25 = vpop.f32.mrb[39].mxu1 }
 0x152   : > { %v5719_v53 = vadd.f32 %v5311_v43, %v2145_v39  ;;  %v5314_v46 = vadd.f32 %v5313_v25, %v5312_v10 }
 0x154   : > { %v5731_v22 = vadd.f32 %v5314_v46, %v2148_v49 }
 0x156   : > { %v5315_v54 = vpop.f32.mrb[40].mxu1 }
 0x157   : > { %v5316_v26 = vpop.f32.mrb[41].mxu1 }
 0x158   : > { %v5317_v63 = vadd.f32 %v5316_v26, %v5315_v54  ;;  %v5318_v27 = vpop.f32.mrb[42].mxu1 }
 0x159   : > { %v5319_v32 = vpop.f32.mrb[43].mxu1 }
 0x15a   : > { %v5750_v16 = vadd.f32 %v5317_v63, %v2153_v19  ;;  %v5320_v9 = vadd.f32 %v5319_v32, %v5318_v27 }
 0x15c   : > { %v5764_v8 = vadd.f32 %v5320_v9, %v2156_v21 }
 0x15e   : > { %v5321_v4 = vpop.f32.mrb[44].mxu1 }
 0x15f   : > { %v5322_v41 = vpop.f32.mrb[45].mxu1 }
 0x160   : > { %v5323_v45 = vadd.f32 %v5322_v41, %v5321_v4  ;;  %v5324_v20 = vpop.f32.mrb[46].mxu1 }
 0x161   : > { %v5325_v11 = vpop.f32.mrb[47].mxu1 }
 0x162   : > { %v5743_v50 = vadd.f32 %v5323_v45, %v2161_v38  ;;  %v5326_v36 = vadd.f32 %v5325_v11, %v5324_v20 }
 0x164   : > { %v5757_v31 = vadd.f32 %v5326_v36, %v2164_v24 }
 0x166   : > { %v5383_v1 = vpop.f32.mrb[48].mxu1 }
 0x167   : > { %v5384_v40 = vpop.f32.mrb[49].mxu1 }
 0x168   : > { %v5385_v49 = vadd.f32 %v5384_v40, %v5383_v1  ;;  %v5386_v6 = vpop.f32.mrb[50].mxu1 }
 0x169   : > { %v5387_v15 = vpop.f32.mrb[51].mxu1 }
 0x16a   : > { %v5343_v39 = vpop.f32.mrb[40].mxu0  ;;  %v5388_v55 = vadd.f32 %v5387_v15, %v5386_v6 }
 0x16b   : > { %v5344_v47 = vpop.f32.mrb[41].mxu0 }
 0x16c   : > { %v5345_v5 = vadd.f32 %v5344_v47, %v5343_v39  ;;  %v5346_v59 = vpop.f32.mrb[42].mxu0 }
 0x16d   : > { %v5347_v51 = vpop.f32.mrb[43].mxu0 }
 0x16e   : > { %v5726_v0 = vadd.f32 %v5725_v48, %v5345_v5  ;;  %v5348_v23 = vadd.f32 %v5347_v51, %v5346_v59  ;;  %v5389_v44 = vpop.f32.mrb[52].mxu1 }
 0x16f   : > { %v5390_v7 = vpop.f32.mrb[53].mxu1 }
 0x170   : > { %v5738_v3 = vadd.f32 %v5737_v29, %v5348_v23  ;;  %v5727_v17 = vadd.f32 %v5726_v0, %v5385_v49  ;;  %v5391_v21 = vadd.f32 %v5390_v7, %v5389_v44  ;;  %v5392_v13 = vpop.f32.mrb[54].mxu1 }
 0x171   : > { %v5393_v35 = vpop.f32.mrb[55].mxu1 }
 0x172   : > { %v5739_v19 = vadd.f32 %v5738_v3, %v5388_v55  ;;  %v5349_v18 = vpop.f32.mrb[44].mxu0  ;;  %v5394_v62 = vadd.f32 %v5393_v35, %v5392_v13 }
 0x173   : > { %v5350_v52 = vpop.f32.mrb[45].mxu0 }
 0x174   : > { %v5351_v2 = vadd.f32 %v5350_v52, %v5349_v18  ;;  %v5352_v14 = vpop.f32.mrb[46].mxu0 }
 0x175   : > { %v5353_v28 = vpop.f32.mrb[47].mxu0 }
 0x176   : > { %v5720_v37 = vadd.f32 %v5719_v53, %v5351_v2  ;;  %v5354_v30 = vadd.f32 %v5353_v28, %v5352_v14  ;;  %v5395_v42 = vpop.f32.mrb[56].mxu1 }
 0x177   : > { %v5396_v57 = vpop.f32.mrb[57].mxu1 }
 0x178   : > { %v5732_v12 = vadd.f32 %v5731_v22, %v5354_v30  ;;  %v5721_v60 = vadd.f32 %v5720_v37, %v5391_v21  ;;  %v5397_v24 = vadd.f32 %v5396_v57, %v5395_v42  ;;  %v5398_v48 = vpop.f32.mrb[58].mxu1 }
 0x179   : > { %v5399_v34 = vpop.f32.mrb[59].mxu1 }
 0x17a   : > { %v5733_v38 = vadd.f32 %v5732_v12, %v5394_v62  ;;  %v5355_v61 = vpop.f32.mrb[48].mxu0  ;;  %v5400_v43 = vadd.f32 %v5399_v34, %v5398_v48 }
 0x17b   : > { %v5356_v56 = vpop.f32.mrb[49].mxu0 }
 0x17c   : > { %v5357_v58 = vadd.f32 %v5356_v56, %v5355_v61  ;;  %v5358_v29 = vpop.f32.mrb[50].mxu0 }
 0x17d   : > { %v5359_v33 = vpop.f32.mrb[51].mxu0 }
 0x17e   : > { %v5751_v10 = vadd.f32 %v5750_v16, %v5357_v58  ;;  %v5360_v25 = vadd.f32 %v5359_v33, %v5358_v29  ;;  %v5401_v53 = vpop.f32.mrb[60].mxu1 }
 0x17f   : > { %v5402_v63 = vpop.f32.mrb[61].mxu1 }
 0x180   : > { %v5765_v46 = vadd.f32 %v5764_v8, %v5360_v25  ;;  %v5752_v54 = vadd.f32 %v5751_v10, %v5397_v24  ;;  %v5403_v32 = vadd.f32 %v5402_v63, %v5401_v53  ;;  %v5404_v9 = vpop.f32.mrb[62].mxu1 }
 0x181   : > { %v5405_v45 = vpop.f32.mrb[63].mxu1 }
 0x182   : > { %v5766_v26 = vadd.f32 %v5765_v46, %v5400_v43  ;;  %v5361_v22 = vpop.f32.mrb[52].mxu0  ;;  %v5406_v11 = vadd.f32 %v5405_v45, %v5404_v9 }
 0x183   : > { %v5362_v27 = vpop.f32.mrb[53].mxu0 }
 0x184   : > { %v5363_v4 = vadd.f32 %v5362_v27, %v5361_v22  ;;  %v5364_v41 = vpop.f32.mrb[54].mxu0 }
 0x185   : > { %v5365_v20 = vpop.f32.mrb[55].mxu0 }
 0x186   : > { %v5744_v36 = vadd.f32 %v5743_v50, %v5363_v4  ;;  %v5366_v1 = vadd.f32 %v5365_v20, %v5364_v41 }
 0x187   : > { %v5475_v59 = vpop.f32.mrb[64].mxu1 }
 0x188   : > { %v5758_v39 = vadd.f32 %v5757_v31, %v5366_v1  ;;  %v5745_v40 = vadd.f32 %v5744_v36, %v5403_v32  ;;  %v5476_v55 = vpop.f32.mrb[65].mxu1 }
 0x189   : > { %v5477_v0 = vadd.f32 %v5476_v55, %v5475_v59  ;;  %v5478_v23 = vpop.f32.mrb[66].mxu1 }
 0x18a   : > { %v5759_v16 = vadd.f32 %v5758_v39, %v5406_v11  ;;  %v5423_v47 = vpop.f32.mrb[56].mxu0  ;;  %v5479_v44 = vpop.f32.mrb[67].mxu1 }
 0x18b   : > { %v5424_v8 = vpop.f32.mrb[57].mxu0  ;;  %v5480_v50 = vadd.f32 %v5479_v44, %v5478_v23 }
 0x18c   : > { %v5425_v49 = vadd.f32 %v5424_v8, %v5423_v47  ;;  %v5426_v6 = vpop.f32.mrb[58].mxu0 }
 0x18d   : > { %v5427_v5 = vpop.f32.mrb[59].mxu0 }
 0x18e   : > { %v7606_v15 = vadd.f32 %v5727_v17, %v5425_v49  ;;  %v5428_v51 = vadd.f32 %v5427_v5, %v5426_v6 }
 0x190   : > { %v7608_v3 = vadd.f32 %v5739_v19, %v5428_v51 }
 0x191   : > { %v5481_v13 = vpop.f32.mrb[68].mxu1 }
 0x192   : > { %v5429_v18 = vpop.f32.mrb[60].mxu0  ;;  %v5482_v35 = vpop.f32.mrb[69].mxu1 }
 0x193   : > { %v5430_v31 = vpop.f32.mrb[61].mxu0  ;;  %v5483_v17 = vadd.f32 %v5482_v35, %v5481_v13  ;;  %v5484_v28 = vpop.f32.mrb[70].mxu1 }
 0x194   : > { %v5431_v7 = vadd.f32 %v5430_v31, %v5429_v18  ;;  %v5432_v52 = vpop.f32.mrb[62].mxu0  ;;  %v5485_v37 = vpop.f32.mrb[71].mxu1 }
 0x195   : > { %v5433_v21 = vpop.f32.mrb[63].mxu0  ;;  %v5486_v30 = vadd.f32 %v5485_v37, %v5484_v28 }
 0x196   : > { %v7610_v2 = vadd.f32 %v5721_v60, %v5431_v7  ;;  %v5434_v14 = vadd.f32 %v5433_v21, %v5432_v52 }
 0x198   : > { %v7612_v62 = vadd.f32 %v5733_v38, %v5434_v14 }
 0x19a   : > { %v5435_v19 = vpop.f32.mrb[64].mxu0  ;;  %v5487_v56 = vpop.f32.mrb[72].mxu1 }
 0x19b   : > { %v5436_v12 = vpop.f32.mrb[65].mxu0  ;;  %v5488_v48 = vpop.f32.mrb[73].mxu1 }
 0x19c   : > { %v5437_v42 = vadd.f32 %v5436_v12, %v5435_v19  ;;  %v5438_v61 = vpop.f32.mrb[66].mxu0  ;;  %v5489_v29 = vadd.f32 %v5488_v48, %v5487_v56  ;;  %v5490_v60 = vpop.f32.mrb[74].mxu1 }
 0x19d   : > { %v5439_v57 = vpop.f32.mrb[67].mxu0  ;;  %v5491_v34 = vpop.f32.mrb[75].mxu1 }
 0x19e   : > { %v5440_v24 = vadd.f32 %v5439_v57, %v5438_v61  ;;  %v5753_v58 = vadd.f32 %v5752_v54, %v5437_v42  ;;  %v5492_v43 = vadd.f32 %v5491_v34, %v5490_v60 }
 0x1a0   : > { %v5767_v33 = vadd.f32 %v5766_v26, %v5440_v24 }
 0x1a2   : > { %v5441_v10 = vpop.f32.mrb[68].mxu0  ;;  %v5493_v53 = vpop.f32.mrb[76].mxu1 }
 0x1a3   : > { %v5442_v25 = vpop.f32.mrb[69].mxu0  ;;  %v5494_v63 = vpop.f32.mrb[77].mxu1 }
 0x1a4   : > { %v5443_v38 = vadd.f32 %v5442_v25, %v5441_v10  ;;  %v5444_v46 = vpop.f32.mrb[70].mxu0  ;;  %v5495_v32 = vadd.f32 %v5494_v63, %v5493_v53  ;;  %v5496_v9 = vpop.f32.mrb[78].mxu1 }
 0x1a5   : > { %v5445_v22 = vpop.f32.mrb[71].mxu0  ;;  %v5497_v41 = vpop.f32.mrb[79].mxu1 }
 0x1a6   : > { %v5446_v27 = vadd.f32 %v5445_v22, %v5444_v46  ;;  %v5746_v4 = vadd.f32 %v5745_v40, %v5443_v38  ;;  %v5498_v45 = vadd.f32 %v5497_v41, %v5496_v9 }
 0x1a8   : > { %v5760_v20 = vadd.f32 %v5759_v16, %v5446_v27 }
 0x1ac   : > { %v5515_v54 = vpop.f32.mrb[80].mxu1 }
 0x1ad   : > { %v5516_v11 = vpop.f32.mrb[81].mxu1 }
 0x1ae   : > { %v5517_v36 = vadd.f32 %v5516_v11, %v5515_v54  ;;  %v5518_v1 = vpop.f32.mrb[82].mxu1 }
 0x1af   : > { %v5519_v26 = vpop.f32.mrb[83].mxu1 }
 0x1b0   : > { %v3870_v39 = vadd.f32 %v5517_v36, %v5477_v0  ;;  %v5520_v47 = vadd.f32 %v5519_v26, %v5518_v1 }
 0x1b2   : > { %v3873_v8 = vadd.f32 %v5520_v47, %v5480_v50  ;;  %v5677_v49 = vpop.f32.mrb[36].mxu0 }
 0x1b3   : > { %v7614_v6 = vadd.f32 %v5746_v4, %v5677_v49  ;;  %v3028_v5 = vpop.f32.mrb[37].mxu0 }
 0x1b4   : > { %v5521_v59 = vpop.f32.mrb[84].mxu1  ;;  %v7616_v51 = vadd.f32 %v5753_v58, %v3028_v5  ;;  %v5678_v55 = vpop.f32.mrb[38].mxu0 }
 0x1b5   : > { %v5522_v40 = vpop.f32.mrb[85].mxu1  ;;  %v7618_v23 = vadd.f32 %v5760_v20, %v5678_v55  ;;  %v3031_v16 = vpop.f32.mrb[39].mxu0 }
 0x1b6   : > { %v5523_v44 = vadd.f32 %v5522_v40, %v5521_v59  ;;  %v5524_v18 = vpop.f32.mrb[86].mxu1  ;;  %v7620_v31 = vadd.f32 %v5767_v33, %v3031_v16 }
 0x1b7   : > { %v5525_v7 = vpop.f32.mrb[87].mxu1 }
 0x1b8   : > { %v3878_v0 = vadd.f32 %v5523_v44, %v5483_v17  ;;  %v5526_v52 = vadd.f32 %v5525_v7, %v5524_v18 }
 0x1ba   : > { %v3881_v50 = vadd.f32 %v5526_v52, %v5486_v30 }
 0x1bc   : > { %v5527_v21 = vpop.f32.mrb[88].mxu1 }
 0x1bd   : > { %v5528_v13 = vpop.f32.mrb[89].mxu1 }
 0x1be   : > { %v5529_v14 = vadd.f32 %v5528_v13, %v5527_v21  ;;  %v5530_v35 = vpop.f32.mrb[90].mxu1 }
 0x1bf   : > { %v5531_v28 = vpop.f32.mrb[91].mxu1 }
 0x1c0   : > { %v3886_v37 = vadd.f32 %v5529_v14, %v5489_v29  ;;  %v5532_v19 = vadd.f32 %v5531_v28, %v5530_v35 }
 0x1c2   : > { %v3889_v12 = vadd.f32 %v5532_v19, %v5492_v43 }
 0x1c4   : > { %v5533_v42 = vpop.f32.mrb[92].mxu1 }
 0x1c5   : > { %v5534_v61 = vpop.f32.mrb[93].mxu1 }
 0x1c6   : > { %v5535_v57 = vadd.f32 %v5534_v61, %v5533_v42  ;;  %v5536_v56 = vpop.f32.mrb[94].mxu1 }
 0x1c7   : > { %v5537_v24 = vpop.f32.mrb[95].mxu1 }
 0x1c8   : > { %v7622_v48 = vadd.f32 %v5535_v57, %v5495_v32  ;;  %v5538_v58 = vadd.f32 %v5537_v24, %v5536_v56 }
 0x1ca   : > { %v7624_v60 = vadd.f32 %v5538_v58, %v5498_v45  ;;  %v5555_v17 = vpop.f32.mrb[72].mxu0 }
 0x1cb   : > { %v5556_v30 = vpop.f32.mrb[73].mxu0 }
 0x1cc   : > { %v5557_v34 = vadd.f32 %v5556_v30, %v5555_v17  ;;  %v5558_v33 = vpop.f32.mrb[74].mxu0  ;;  %v5595_v10 = vpop.f32.mrb[96].mxu1 }
 0x1cd   : > { %v5559_v25 = vpop.f32.mrb[75].mxu0  ;;  %v5596_v38 = vpop.f32.mrb[97].mxu1 }
 0x1ce   : > { %v3935_v29 = vadd.f32 %v5557_v34, %v3870_v39  ;;  %v5560_v46 = vadd.f32 %v5559_v25, %v5558_v33  ;;  %v5597_v43 = vadd.f32 %v5596_v38, %v5595_v10  ;;  %v5598_v53 = vpop.f32.mrb[98].mxu1 }
 0x1cf   : > { %v5599_v22 = vpop.f32.mrb[99].mxu1 }
 0x1d0   : > { %v3938_v63 = vadd.f32 %v5560_v46, %v3873_v8  ;;  %v4000_v27 = vadd.f32 %v5597_v43, %v3935_v29  ;;  %v5600_v9 = vadd.f32 %v5599_v22, %v5598_v53 }
 0x1d2   : > { %v4003_v32 = vadd.f32 %v5600_v9, %v3938_v63  ;;  %v5561_v4 = vpop.f32.mrb[76].mxu0  ;;  %v5729_v41 = vadd.f32 %v7606_v15, %v4000_v27 }
 0x1d3   : > { %v5562_v45 = vpop.f32.mrb[77].mxu0 }
 0x1d4   : > { %v5563_v20 = vadd.f32 %v5562_v45, %v5561_v4  ;;  %v5564_v54 = vpop.f32.mrb[78].mxu0  ;;  %v5601_v11 = vpop.f32.mrb[100].mxu1  ;;  %v7628_v36 = vadd.f32 %v7608_v3, %v4003_v32 }
 0x1d5   : > { %v5565_v1 = vpop.f32.mrb[79].mxu0  ;;  %v5602_v26 = vpop.f32.mrb[101].mxu1 }
 0x1d6   : > { %v3943_v39 = vadd.f32 %v5563_v20, %v3878_v0  ;;  %v5566_v47 = vadd.f32 %v5565_v1, %v5564_v54  ;;  %v5603_v49 = vadd.f32 %v5602_v26, %v5601_v11  ;;  %v5604_v5 = vpop.f32.mrb[102].mxu1 }
 0x1d7   : > { %v5605_v8 = vpop.f32.mrb[103].mxu1 }
 0x1d8   : > { %v3946_v59 = vadd.f32 %v5566_v47, %v3881_v50  ;;  %v4008_v55 = vadd.f32 %v5603_v49, %v3943_v39  ;;  %v5606_v40 = vadd.f32 %v5605_v8, %v5604_v5 }
 0x1da   : > { %v4011_v16 = vadd.f32 %v5606_v40, %v3946_v59  ;;  %v5567_v44 = vpop.f32.mrb[80].mxu0  ;;  %v5723_v15 = vadd.f32 %v7610_v2, %v4008_v55 }
 0x1db   : > { %v5568_v18 = vpop.f32.mrb[81].mxu0 }
 0x1dc   : > { %v5569_v7 = vadd.f32 %v5568_v18, %v5567_v44  ;;  %v5570_v52 = vpop.f32.mrb[82].mxu0  ;;  %v5607_v21 = vpop.f32.mrb[104].mxu1  ;;  %v5735_v3 = vadd.f32 %v7612_v62, %v4011_v16 }
 0x1dd   : > { %v5571_v13 = vpop.f32.mrb[83].mxu0  ;;  %v5608_v14 = vpop.f32.mrb[105].mxu1 }
 0x1de   : > { %v3951_v0 = vadd.f32 %v5569_v7, %v3886_v37  ;;  %v5572_v35 = vadd.f32 %v5571_v13, %v5570_v52  ;;  %v5609_v28 = vadd.f32 %v5608_v14, %v5607_v21  ;;  %v5610_v19 = vpop.f32.mrb[106].mxu1 }
 0x1df   : > { %v5611_v42 = vpop.f32.mrb[107].mxu1 }
 0x1e0   : > { %v3954_v50 = vadd.f32 %v5572_v35, %v3889_v12  ;;  %v4016_v61 = vadd.f32 %v5609_v28, %v3951_v0  ;;  %v5612_v57 = vadd.f32 %v5611_v42, %v5610_v19 }
 0x1e2   : > { %v4019_v56 = vadd.f32 %v5612_v57, %v3954_v50  ;;  %v5573_v24 = vpop.f32.mrb[84].mxu0  ;;  %v5755_v2 = vadd.f32 %v7616_v51, %v4016_v61 }
 0x1e3   : > { %v5574_v58 = vpop.f32.mrb[85].mxu0 }
 0x1e4   : > { %v5575_v17 = vadd.f32 %v5574_v58, %v5573_v24  ;;  %v5576_v30 = vpop.f32.mrb[86].mxu0  ;;  %v5613_v34 = vpop.f32.mrb[108].mxu1  ;;  %v5769_v62 = vadd.f32 %v7620_v31, %v4019_v56 }
 0x1e5   : > { %v5577_v33 = vpop.f32.mrb[87].mxu0  ;;  %v5614_v10 = vpop.f32.mrb[109].mxu1 }
 0x1e6   : > { %v3959_v37 = vadd.f32 %v5575_v17, %v7622_v48  ;;  %v5578_v25 = vadd.f32 %v5577_v33, %v5576_v30  ;;  %v5615_v38 = vadd.f32 %v5614_v10, %v5613_v34  ;;  %v5616_v29 = vpop.f32.mrb[110].mxu1 }
 0x1e7   : > { %v5617_v12 = vpop.f32.mrb[111].mxu1 }
 0x1e8   : > { %v3962_v46 = vadd.f32 %v5578_v25, %v7624_v60  ;;  %v4024_v43 = vadd.f32 %v5615_v38, %v3959_v37  ;;  %v5618_v53 = vadd.f32 %v5617_v12, %v5616_v29 }
 0x1ea   : > { %v4027_v51 = vadd.f32 %v5618_v53, %v3962_v46  ;;  %v5697_v22 = vpop.f32.mrb[32].mxu0  ;;  %v5748_v63 = vadd.f32 %v7614_v6, %v4024_v43 }
 0x1eb   : > { %v5724_v27 = vadd.f32 %v5723_v15, %v5697_v22  ;;  %v4064_v9 = vpop.f32.mrb[33].mxu0 }
 0x1ec   : > { %v5701_v31 = vpop.f32.mrb[112].mxu1  ;;  %v5730_v32 = vadd.f32 %v5729_v41, %v4064_v9  ;;  %v5698_v4 = vpop.f32.mrb[34].mxu0  ;;  %v5762_v48 = vadd.f32 %v7618_v23, %v4027_v51 }
 0x1ed   : > { %v5749_v45 = vadd.f32 %v5748_v63, %v5701_v31  ;;  %v4080_v20 = vpop.f32.mrb[113].mxu1  ;;  %v5736_v54 = vadd.f32 %v5735_v3, %v5698_v4  ;;  %v4067_v11 = vpop.f32.mrb[35].mxu0  ;;  %v4159_v55 = vmul.f32 %v5724_v27, %v5724_v27 }
 0x1ee   : > { %v5756_v1 = vadd.f32 %v5755_v2, %v4080_v20  ;;  %v5702_v60 = vpop.f32.mrb[114].mxu1  ;;  %v5742_v6 = vadd.f32 %v7628_v36, %v4067_v11  ;;  %v4157_v41 = vmul.f32 %v5730_v32, %v5730_v32 }
 0x1ef   : > { %v5091_v26 = vpack.c.bf16 %v5736_v54, %v5724_v27  ;;  %v5763_v39 = vadd.f32 %v5762_v48, %v5702_v60  ;;  %v4083_v47 = vpop.f32.mrb[115].mxu1  ;;  %v4160_v15 = vmul.f32 %v5736_v54, %v5736_v54  ;;  %v4163_v0 = vmul.f32 %v5749_v45, %v5749_v45 }
 0x1f0   : > { %v5086_v49 = vpack.c.bf16 %v5742_v6, %v5730_v32  ;;  %v4143_v5 = vadd.f32 %v5742_v6, %v5730_v32  ;;  %v4158_v23 = vmul.f32 %v5742_v6, %v5742_v6  ;;  %v5770_v59 = vadd.f32 %v5769_v62, %v4083_v47 }
 0x1f1   : > { %5112 = vst [vmem:[%s474_s25 + $0x8] sm:$0xff] %v5091_v26   ;;  %v5101_v8 = vpack.c.bf16 %v5763_v39, %v5749_v45  ;;  %v4161_v36 = vmul.f32 %v5756_v1, %v5756_v1  ;;  %v4164_v19 = vmul.f32 %v5763_v39, %v5763_v39 }
 0x1f2   : > { %5087 = vst [vmem:[%s474_s25] sm:$0xff] %v5086_v49   ;;  %v4144_v40 = vadd.f32 %v5724_v27, %v4143_v5  ;;  %v4165_v16 = vadd.f32 %v4158_v23, %v4157_v41  ;;  %v5096_v44 = vpack.c.bf16 %v5770_v59, %v5756_v1  ;;  %v4162_v13 = vmul.f32 %v5770_v59, %v5770_v59 }
 0x1f3   : > { %5114 = vst [vmem:[%s474_s25 + $0x18] sm:$0xff] %v5101_v8  }
 0x1f4   : > { %v4166_v18 = vadd.f32 %v4165_v16, %v4159_v55  ;;  %v4145_v7 = vadd.f32 %v5736_v54, %v4144_v40  ;;  %5113 = vst [vmem:[%s474_s25 + $0x10] sm:$0xff] %v5096_v44  }
 0x1f6   : > { %v4146_v52 = vadd.f32 %v5756_v1, %v4145_v7  ;;  %v4167_v21 = vadd.f32 %v4166_v18, %v4160_v15 }
 0x1f8   : > { %v4147_v3 = vadd.f32 %v5770_v59, %v4146_v52  ;;  %v4168_v14 = vadd.f32 %v4167_v21, %v4161_v36 }
 0x1fa   : > { %v4148_v35 = vadd.f32 %v5749_v45, %v4147_v3  ;;  %v4169_v28 = vadd.f32 %v4168_v14, %v4162_v13 }
 0x1fc   : > { %v4149_v42 = vadd.f32 %v5763_v39, %v4148_v35  ;;  %v4170_v50 = vadd.f32 %v4169_v28, %v4163_v0 }
 0x1fe   : > { %v4150_v61 = vrot.slane %v4149_v42, 4  ;;  %v4171_v57 = vadd.f32 %v4170_v50, %v4164_v19 }
 0x200   : > { %v4151_v56 = vadd.f32 %v4150_v61, %v4149_v42  ;;  %v4172_v24 = vrot.slane %v4171_v57, 4 }
 0x202   : > { %v4152_v2 = vrot.slane %v4151_v56, 2  ;;  %v4173_v58 = vadd.f32 %v4172_v24, %v4171_v57 }
 0x204   : > { %v4153_v17 = vadd.f32 %v4152_v2, %v4151_v56  ;;  %v4174_v30 = vrot.slane %v4173_v58, 2 }
 0x206   : > { %v4154_v34 = vrot.slane %v4153_v17, 1  ;;  %v4175_v62 = vadd.f32 %v4174_v30, %v4173_v58 }
 0x208   : > { %v4155_v33 = vadd.f32 %v4154_v34, %v4153_v17  ;;  %v4176_v10 = vrot.slane %v4175_v62, 1 }
 0x20a   : > { %4156 = vst [vmem:[%s481_s19] sm:$0x1] %v4155_v33  ;;  %v4177_v37 = vadd.f32 %v4176_v10, %v4175_v62 }
 0x20c   : > { %4178 = vst [vmem:[%s488_s23] sm:$0x1] %v4177_v37 }
 0x20d PF: > { %s19_s9 = sadd.s32 1, %s6082_s9   ;;  %s7681_s27 = smov %s6074_s29 }
 0x20e   : > { %p16_p11 = scmp.ge.s32.totalorder %s19_s9, 18   ;;  %s7682_s28 = smov %s6078_s30 }
 0x20f   : > { %s7683_s29 = smov %s7686_s10  ;;  %s7684_s30 = smov %s7690_s11 }
 0x210   :  { %18 = sbr.rel (!%p16_p11) target bundleno = 3 (0x3), region = 106 }

</bundles_post_ra>
